<compile_context>
chip_gen: v7x
topology: tpu7x:2x2x1
jax: 0.10.0
libtpu: 0.0.40
codegen_flags: <defaults>
</compile_context>

<pallas_src>
import math
from functools import partial

import jax
import jax.numpy as jnp
import numpy as np
from jax.experimental import pallas as pl
from jax.experimental.pallas import tpu as pltpu

KERNEL_SIZE = 9
LN_EPS = 1e-5          # PyTorch nn.LayerNorm default eps
HEAD_PAD = 128         # pad the 5 nucleotide logits to a full lane tile


def get_dilation_schedule(max_d=32, base=2, cycle=6, n=25):
    return [min(max_d, base ** (i % cycle)) for i in range(n)]


def _exact_recip(v):
    return 1.0 / v


def _approx_recip(v):
    # EUP reciprocal (separate VLIW slot -> essentially free); kernel-only.
    return pl.reciprocal(v, approx=True)


def _erf(x, recip=_exact_recip):
    # Abramowitz & Stegun 7.1.26 rational approximation (|err| < 1.5e-7),
    # built only from ops with guaranteed Mosaic lowerings.
    a1, a2, a3, a4, a5 = 0.254829592, -0.284496736, 1.421413741, -1.453152027, 1.061405429
    p = 0.3275911
    s = jnp.where(x >= 0.0, 1.0, -1.0)
    ax = jnp.abs(x)
    t = recip(1.0 + p * ax)
    poly = ((((a5 * t + a4) * t + a3) * t + a2) * t + a1) * t
    return s * (1.0 - poly * jnp.exp(-ax * ax))


def _gelu(x, recip=_exact_recip):
    # PyTorch nn.GELU() default = exact (erf) form.
    return 0.5 * x * (1.0 + _erf(x * (1.0 / math.sqrt(2.0)), recip))


def _layernorm(x, gamma, beta):
    # One-pass statistics: mean and mean-of-squares (halves the XLU reduces).
    mu = jnp.mean(x, axis=-1, keepdims=True)
    var = jnp.maximum(jnp.mean(x * x, axis=-1, keepdims=True) - mu * mu, 0.0)
    return (x - mu) * jax.lax.rsqrt(var + LN_EPS) * gamma + beta


# ----------------------------------------------------------------------------
# One ConvolutionLayer:  x = x + LN(GELU(Conv1d(x)));  x = x + LN(GELU(Linear(x)))
# Entire layer fused in one kernel; grid iterates over batch (parallel).
# ----------------------------------------------------------------------------
def _conv_layer_kernel(dilation, x_ref, wc_ref, bc_ref, g1_ref, b1_ref,
                       wf_ref, bf_ref, g2_ref, b2_ref, o_ref, pad_ref, xt_ref):
    d = dilation
    L, H = x_ref.shape[1], x_ref.shape[2]
    x = x_ref[0].astype(jnp.float32)                       # (L, H)

    # ---- conv branch: dilated Conv1d (k=9, 'same' pad = 4*d per side) as one
    # fused (L, 9H) @ (9H, H) bf16 matmul with f32 accumulation.
    # Zero only the halos of the pad scratch (interior fully overwritten by x).
    pad_ref[0:4 * d, :] = jnp.zeros((4 * d, H), jnp.float32)
    pad_ref[4 * d + L:4 * d + L + 4 * d, :] = jnp.zeros((4 * d, H), jnp.float32)
    pad_ref[4 * d:4 * d + L, :] = x

    # Build the gathered-tap tile xt (L, 9H) in bf16: shifted f32 reads from
    # the pad scratch, aligned full-row bf16 stores into xt.
    for k in range(KERNEL_SIZE):
        xt_ref[:, k * H:(k + 1) * H] = pad_ref[k * d:k * d + L, :].astype(jnp.bfloat16)

    conv = jnp.dot(xt_ref[...], wc_ref[...], preferred_element_type=jnp.float32)
    conv = conv + bc_ref[...]
    conv = _layernorm(_gelu(conv, _approx_recip), g1_ref[...], b1_ref[...])
    x1 = x + conv

    # ---- ffn branch (bf16 operands, f32 accumulation)
    h = jnp.dot(x1.astype(jnp.bfloat16), wf_ref[...],
                preferred_element_type=jnp.float32) + bf_ref[...]
    ffn = _layernorm(_gelu(h, _approx_recip), g2_ref[...], b2_ref[...])
    o_ref[0] = (x1 + ffn).astype(o_ref.dtype)


def conv_layer(x, wc_flat, bc, g1, b1, wf, bf, g2, b2, *, dilation):
    B, L, H = x.shape
    full2 = lambda s: pl.BlockSpec(s, lambda b: (0, 0))    # grid-invariant weights
    return pl.pallas_call(
        partial(_conv_layer_kernel, dilation),
        out_shape=jax.ShapeDtypeStruct((B, L, H), x.dtype),
        grid=(B,),
        in_specs=[
            pl.BlockSpec((1, L, H), lambda b: (b, 0, 0)),   # x block for this batch
            full2((KERNEL_SIZE * H, H)),                    # fused conv weight (9H, H) bf16
            full2((1, H)), full2((1, H)), full2((1, H)),    # conv bias, LN1 gamma, LN1 beta
            full2((H, H)), full2((1, H)),                   # ffn weight (H, H) bf16, ffn bias
            full2((1, H)), full2((1, H)),                   # LN2 gamma, LN2 beta
        ],
        out_specs=pl.BlockSpec((1, L, H), lambda b: (b, 0, 0)),
        scratch_shapes=[
            pltpu.VMEM((L + 8 * dilation, H), jnp.float32),       # zero-padded sequence
            pltpu.VMEM((L, KERNEL_SIZE * H), jnp.bfloat16),       # gathered tap tile
        ],
        input_output_aliases={0: 0},                        # residual written in place
        compiler_params=pltpu.CompilerParams(
            dimension_semantics=("parallel",),
            vmem_limit_bytes=64 * 1024 * 1024),
    )(x, wc_flat, bc, g1, b1, wf, bf, g2, b2)


# ----------------------------------------------------------------------------
# Head: nuc_logits Linear(H, 5) + nn.Softmax().
# nn.Softmax() with dim=None on a 3-D tensor uses the legacy default dim=0
# (the batch axis) -- reproduced exactly here.
# Single (B*Lt, H) @ (H, 128) matmul on a lane-padded weight; the 5 valid
# lanes are slice-stored. Grid tiles the sequence (parallel).
# ----------------------------------------------------------------------------
def _head_kernel(x_ref, w_ref, b_ref, o_ref):
    B, Lt, H = x_ref.shape
    V = o_ref.shape[2]
    xv = x_ref[...].reshape(B * Lt, H)
    logits = jnp.dot(xv, w_ref[...], preferred_element_type=jnp.float32) + b_ref[...]
    lg = logits.reshape(B, Lt, logits.shape[-1])
    m = jnp.max(lg, axis=0, keepdims=True)                 # softmax over batch axis
    e = jnp.exp(lg - m)
    s = jnp.sum(e, axis=0, keepdims=True)
    probs = e * pl.reciprocal(s, approx=True)
    o_ref[...] = probs[:, :, :V].astype(o_ref.dtype)


def head(x, w_pad, b_pad, num_logits, *, lt=None):
    B, L, H = x.shape
    VP = w_pad.shape[1]
    if lt is None:
        lt = L if L <= 512 else 512
    assert L % lt == 0 and (lt % 8 == 0 or lt == L)
    return pl.pallas_call(
        _head_kernel,
        out_shape=jax.ShapeDtypeStruct((B, L, num_logits), x.dtype),
        grid=(L // lt,),
        in_specs=[
            pl.BlockSpec((B, lt, H), lambda i: (0, i, 0)),
            pl.BlockSpec((H, VP), lambda i: (0, 0)),
            pl.BlockSpec((1, VP), lambda i: (0, 0)),
        ],
        out_specs=pl.BlockSpec((B, lt, num_logits), lambda i: (0, i, 0)),
        compiler_params=pltpu.CompilerParams(dimension_semantics=("parallel",)),
    )(x, w_pad, b_pad)


# ----------------------------------------------------------------------------
# Full GPN forward (inference path): mask (identity) -> embed -> conv blocks -> head
# ----------------------------------------------------------------------------
def gpn_forward(tokens, params, dilations):
    # MaskLayer with training=False is the identity.
    # TODO(synk): training-mode random masking (torch.rand mask) not implemented.
    x = params["embed"][tokens].astype(jnp.float32)        # embedding lookup (glue)
    H = x.shape[-1]
    for lp, d in zip(params["layers"], dilations):
        wc_flat = lp["wc"].reshape(KERNEL_SIZE * H, H).astype(jnp.bfloat16)
        wf_b = lp["wf"].astype(jnp.bfloat16)
        x = conv_layer(x, wc_flat, lp["bc"], lp["g1"], lp["b1"],
                       wf_b, lp["bf"], lp["g2"], lp["b2"], dilation=d)
    V = params["wo"].shape[1]
    wo_pad = jnp.zeros((H, HEAD_PAD), jnp.float32).at[:, :V].set(params["wo"])
    bo_pad = jnp.zeros((1, HEAD_PAD), jnp.float32).at[:, :V].set(params["bo"])
    return head(x, wo_pad, bo_pad, V)


# Pure-JAX reference (independent conv via lax.conv_general_dilated). Matmul
# operands are quantized to bf16 (f32 accumulation) to mirror the kernel.
def ref_forward(tokens, params, dilations):
    x = params["embed"][tokens].astype(jnp.float32)
    for lp, d in zip(params["layers"], dilations):
        conv = jax.lax.conv_general_dilated(
            x.astype(jnp.bfloat16), lp["wc"].astype(jnp.bfloat16),
            window_strides=(1,), padding="SAME", rhs_dilation=(d,),
            dimension_numbers=("NWC", "WIO", "NWC"),
            preferred_element_type=jnp.float32)
        conv = _layernorm(_gelu(conv + lp["bc"]), lp["g1"], lp["b1"])
        x = x + conv
        h = jnp.dot(x.astype(jnp.bfloat16), lp["wf"].astype(jnp.bfloat16),
                    preferred_element_type=jnp.float32) + lp["bf"]
        x = x + _layernorm(_gelu(h), lp["g2"], lp["b2"])
    logits = x @ params["wo"] + params["bo"]
    return jax.nn.softmax(logits, axis=0)                  # legacy nn.Softmax() dim for 3-D


def init_params(key, hidden, vocab, num_layers):
    def nrm(k, shape, scale):
        return scale * jax.random.normal(k, shape, jnp.float32)

    keys = jax.random.split(key, 3 + 4 * num_layers)
    it = iter(keys)
    params = {
        "embed": nrm(next(it), (vocab, hidden), 1.0),          # Embedding(5, H)
        "wo": nrm(next(it), (hidden, vocab), 0.1),             # nuc_logits Linear(H, 5)
        "bo": nrm(next(it), (1, vocab), 0.1),
        "layers": [],
    }
    for _ in range(num_layers):
        params["layers"].append({
            "wc": nrm(next(it), (KERNEL_SIZE, hidden, hidden), 0.05),  # (tap, in, out)
            "bc": nrm(next(it), (1, hidden), 0.05),
            "g1": jnp.ones((1, hidden), jnp.float32),
            "b1": jnp.zeros((1, hidden), jnp.float32),
            "wf": nrm(next(it), (hidden, hidden), 0.05),               # (in, out) = torch W.T
            "bf": nrm(next(it), (1, hidden), 0.05),
            "g2": jnp.ones((1, hidden), jnp.float32),
            "b2": jnp.zeros((1, hidden), jnp.float32),
        })
    return params


if __name__ == "__main__":
    # Small shapes (module default is H=512, 25 layers); H=128 keeps lane tiles
    # aligned while staying far below the real model size.
    B, L, H, V = 2, 16, 128, 5
    NUM_LAYERS = 3
    dilations = get_dilation_schedule()[:NUM_LAYERS]   # [1, 2, 4]

    key = jax.random.PRNGKey(0)
    kp, kt = jax.random.split(key)
    params = init_params(kp, H, V, NUM_LAYERS)
    tokens = jax.random.randint(kt, (B, L), 0, V, dtype=jnp.int32)

    fwd = jax.jit(partial(gpn_forward, dilations=dilations))
    out = jax.block_until_ready(fwd(tokens, params))
    ref = jax.block_until_ready(ref_forward(tokens, params, dilations))

    assert out.shape == (B, L, V)
    # Tolerance covers approx-EUP reciprocal (erf / softmax denom) and
    # accumulation-order differences; bf16 quantization is mirrored in the ref.
    np.testing.assert_allclose(np.asarray(out), np.asarray(ref), atol=2e-2, rtol=2e-2)
    print("KERNEL_OK")
</pallas_src>

<mosaic_0001>
module attributes {stable_mosaic.version = 11 : i64} {
  func.func @_conv_layer_kernel(%arg0: i32, %arg1: memref<1x16x128xf32, #tpu.memory_space<vmem>>, %arg2: memref<1152x128xbf16, #tpu.memory_space<vmem>>, %arg3: memref<1x128xf32, #tpu.memory_space<vmem>>, %arg4: memref<1x128xf32, #tpu.memory_space<vmem>>, %arg5: memref<1x128xf32, #tpu.memory_space<vmem>>, %arg6: memref<128x128xbf16, #tpu.memory_space<vmem>>, %arg7: memref<1x128xf32, #tpu.memory_space<vmem>>, %arg8: memref<1x128xf32, #tpu.memory_space<vmem>>, %arg9: memref<1x128xf32, #tpu.memory_space<vmem>>, %arg10: memref<1x16x128xf32, #tpu.memory_space<vmem>>, %arg11: memref<32x128xf32, #tpu.memory_space<vmem>>, %arg12: memref<16x1152xbf16, #tpu.memory_space<vmem>>) attributes {dimension_semantics = [#tpu.dimension_semantics<parallel>], iteration_bounds = array<i64: 2>, scalar_prefetch = 0 : i64, scratch_operands = 2 : i64, tpu.core_type = #tpu.core_type<tc>, window_params = [{transform_indices = @transform_0, window_bounds = array<i64: 1, 16, 128>}, {pipeline_mode = #tpu.pipeline_mode<synchronous>, transform_indices = @transform_1, window_bounds = array<i64: 1152, 128>}, {pipeline_mode = #tpu.pipeline_mode<synchronous>, transform_indices = @transform_2, window_bounds = array<i64: 1, 128>}, {pipeline_mode = #tpu.pipeline_mode<synchronous>, transform_indices = @transform_3, window_bounds = array<i64: 1, 128>}, {pipeline_mode = #tpu.pipeline_mode<synchronous>, transform_indices = @transform_4, window_bounds = array<i64: 1, 128>}, {pipeline_mode = #tpu.pipeline_mode<synchronous>, transform_indices = @transform_5, window_bounds = array<i64: 128, 128>}, {pipeline_mode = #tpu.pipeline_mode<synchronous>, transform_indices = @transform_6, window_bounds = array<i64: 1, 128>}, {pipeline_mode = #tpu.pipeline_mode<synchronous>, transform_indices = @transform_7, window_bounds = array<i64: 1, 128>}, {pipeline_mode = #tpu.pipeline_mode<synchronous>, transform_indices = @transform_8, window_bounds = array<i64: 1, 128>}, {transform_indices = @transform_9, window_bounds = array<i64: 1, 16, 128>}]} {
    %c0 = arith.constant 0 : index
    %c0_0 = arith.constant 0 : index
    %c0_1 = arith.constant 0 : index
    %0 = vector.load %arg1[%c0, %c0_0, %c0_1] : memref<1x16x128xf32, #tpu.memory_space<vmem>>, vector<1x16x128xf32>
    %1 = vector.shape_cast %0 : vector<1x16x128xf32> to vector<16x128xf32>
    %cst = arith.constant 0.000000e+00 : f32
    %2 = vector.broadcast %cst : f32 to vector<8x128xf32>
    %c0_2 = arith.constant 0 : index
    %c0_3 = arith.constant 0 : index
    %3 = vector.load %arg11[%c0_2, %c0_3] : memref<32x128xf32, #tpu.memory_space<vmem>>, vector<8x128xf32>
    tpu.vector_store %arg11[%c0_2, %c0_3], %2 {strides = array<i32>} : memref<32x128xf32, #tpu.memory_space<vmem>>, vector<8x128xf32>,
    %cst_4 = arith.constant 0.000000e+00 : f32
    %4 = vector.broadcast %cst_4 : f32 to vector<8x128xf32>
    %c24 = arith.constant 24 : index
    %c0_5 = arith.constant 0 : index
    %5 = vector.load %arg11[%c24, %c0_5] : memref<32x128xf32, #tpu.memory_space<vmem>>, vector<8x128xf32>
    tpu.vector_store %arg11[%c24, %c0_5], %4 {strides = array<i32>} : memref<32x128xf32, #tpu.memory_space<vmem>>, vector<8x128xf32>,
    %c8 = arith.constant 8 : index
    %c0_6 = arith.constant 0 : index
    %6 = vector.load %arg11[%c8, %c0_6] : memref<32x128xf32, #tpu.memory_space<vmem>>, vector<16x128xf32>
    tpu.vector_store %arg11[%c8, %c0_6], %1 {strides = array<i32>} : memref<32x128xf32, #tpu.memory_space<vmem>>, vector<16x128xf32>,
    %c0_7 = arith.constant 0 : index
    %c0_8 = arith.constant 0 : index
    %7 = vector.load %arg11[%c0_7, %c0_8] : memref<32x128xf32, #tpu.memory_space<vmem>>, vector<16x128xf32>
    %8 = arith.truncf %7 : vector<16x128xf32> to vector<16x128xbf16>
    %c0_9 = arith.constant 0 : index
    %c0_10 = arith.constant 0 : index
    %9 = vector.load %arg12[%c0_9, %c0_10] : memref<16x1152xbf16, #tpu.memory_space<vmem>>, vector<16x128xbf16>
    tpu.vector_store %arg12[%c0_9, %c0_10], %8 {strides = array<i32>} : memref<16x1152xbf16, #tpu.memory_space<vmem>>, vector<16x128xbf16>,
    %c2 = arith.constant 2 : index
    %c0_11 = arith.constant 0 : index
    %10 = vector.load %arg11[%c2, %c0_11] : memref<32x128xf32, #tpu.memory_space<vmem>>, vector<16x128xf32>
    %11 = arith.truncf %10 : vector<16x128xf32> to vector<16x128xbf16>
    %c0_12 = arith.constant 0 : index
    %c128 = arith.constant 128 : index
    %12 = vector.load %arg12[%c0_12, %c128] : memref<16x1152xbf16, #tpu.memory_space<vmem>>, vector<16x128xbf16>
    tpu.vector_store %arg12[%c0_12, %c128], %11 {strides = array<i32>} : memref<16x1152xbf16, #tpu.memory_space<vmem>>, vector<16x128xbf16>,
    %c4 = arith.constant 4 : index
    %c0_13 = arith.constant 0 : index
    %13 = vector.load %arg11[%c4, %c0_13] : memref<32x128xf32, #tpu.memory_space<vmem>>, vector<16x128xf32>
    %14 = arith.truncf %13 : vector<16x128xf32> to vector<16x128xbf16>
    %c0_14 = arith.constant 0 : index
    %c256 = arith.constant 256 : index
    %15 = vector.load %arg12[%c0_14, %c256] : memref<16x1152xbf16, #tpu.memory_space<vmem>>, vector<16x128xbf16>
    tpu.vector_store %arg12[%c0_14, %c256], %14 {strides = array<i32>} : memref<16x1152xbf16, #tpu.memory_space<vmem>>, vector<16x128xbf16>,
    %c6 = arith.constant 6 : index
    %c0_15 = arith.constant 0 : index
    %16 = vector.load %arg11[%c6, %c0_15] : memref<32x128xf32, #tpu.memory_space<vmem>>, vector<16x128xf32>
    %17 = arith.truncf %16 : vector<16x128xf32> to vector<16x128xbf16>
    %c0_16 = arith.constant 0 : index
    %c384 = arith.constant 384 : index
    %18 = vector.load %arg12[%c0_16, %c384] : memref<16x1152xbf16, #tpu.memory_space<vmem>>, vector<16x128xbf16>
    tpu.vector_store %arg12[%c0_16, %c384], %17 {strides = array<i32>} : memref<16x1152xbf16, #tpu.memory_space<vmem>>, vector<16x128xbf16>,
    %c8_17 = arith.constant 8 : index
    %c0_18 = arith.constant 0 : index
    %19 = vector.load %arg11[%c8_17, %c0_18] : memref<32x128xf32, #tpu.memory_space<vmem>>, vector<16x128xf32>
    %20 = arith.truncf %19 : vector<16x128xf32> to vector<16x128xbf16>
    %c0_19 = arith.constant 0 : index
    %c512 = arith.constant 512 : index
    %21 = vector.load %arg12[%c0_19, %c512] : memref<16x1152xbf16, #tpu.memory_space<vmem>>, vector<16x128xbf16>
    tpu.vector_store %arg12[%c0_19, %c512], %20 {strides = array<i32>} : memref<16x1152xbf16, #tpu.memory_space<vmem>>, vector<16x128xbf16>,
    %c10 = arith.constant 10 : index
    %c0_20 = arith.constant 0 : index
    %22 = vector.load %arg11[%c10, %c0_20] : memref<32x128xf32, #tpu.memory_space<vmem>>, vector<16x128xf32>
    %23 = arith.truncf %22 : vector<16x128xf32> to vector<16x128xbf16>
    %c0_21 = arith.constant 0 : index
    %c640 = arith.constant 640 : index
    %24 = vector.load %arg12[%c0_21, %c640] : memref<16x1152xbf16, #tpu.memory_space<vmem>>, vector<16x128xbf16>
    tpu.vector_store %arg12[%c0_21, %c640], %23 {strides = array<i32>} : memref<16x1152xbf16, #tpu.memory_space<vmem>>, vector<16x128xbf16>,
    %c12 = arith.constant 12 : index
    %c0_22 = arith.constant 0 : index
    %25 = vector.load %arg11[%c12, %c0_22] : memref<32x128xf32, #tpu.memory_space<vmem>>, vector<16x128xf32>
    %26 = arith.truncf %25 : vector<16x128xf32> to vector<16x128xbf16>
    %c0_23 = arith.constant 0 : index
    %c768 = arith.constant 768 : index
    %27 = vector.load %arg12[%c0_23, %c768] : memref<16x1152xbf16, #tpu.memory_space<vmem>>, vector<16x128xbf16>
    tpu.vector_store %arg12[%c0_23, %c768], %26 {strides = array<i32>} : memref<16x1152xbf16, #tpu.memory_space<vmem>>, vector<16x128xbf16>,
    %c14 = arith.constant 14 : index
    %c0_24 = arith.constant 0 : index
    %28 = vector.load %arg11[%c14, %c0_24] : memref<32x128xf32, #tpu.memory_space<vmem>>, vector<16x128xf32>
    %29 = arith.truncf %28 : vector<16x128xf32> to vector<16x128xbf16>
    %c0_25 = arith.constant 0 : index
    %c896 = arith.constant 896 : index
    %30 = vector.load %arg12[%c0_25, %c896] : memref<16x1152xbf16, #tpu.memory_space<vmem>>, vector<16x128xbf16>
    tpu.vector_store %arg12[%c0_25, %c896], %29 {strides = array<i32>} : memref<16x1152xbf16, #tpu.memory_space<vmem>>, vector<16x128xbf16>,
    %c16 = arith.constant 16 : index
    %c0_26 = arith.constant 0 : index
    %31 = vector.load %arg11[%c16, %c0_26] : memref<32x128xf32, #tpu.memory_space<vmem>>, vector<16x128xf32>
    %32 = arith.truncf %31 : vector<16x128xf32> to vector<16x128xbf16>
    %c0_27 = arith.constant 0 : index
    %c1024 = arith.constant 1024 : index
    %33 = vector.load %arg12[%c0_27, %c1024] : memref<16x1152xbf16, #tpu.memory_space<vmem>>, vector<16x128xbf16>
    tpu.vector_store %arg12[%c0_27, %c1024], %32 {strides = array<i32>} : memref<16x1152xbf16, #tpu.memory_space<vmem>>, vector<16x128xbf16>,
    %c0_28 = arith.constant 0 : index
    %c0_29 = arith.constant 0 : index
    %34 = vector.load %arg12[%c0_28, %c0_29] : memref<16x1152xbf16, #tpu.memory_space<vmem>>, vector<16x1152xbf16>
    %c0_30 = arith.constant 0 : index
    %c0_31 = arith.constant 0 : index
    %35 = vector.load %arg2[%c0_30, %c0_31] : memref<1152x128xbf16, #tpu.memory_space<vmem>>, vector<1152x128xbf16>
    %cst_32 = arith.constant dense<0.000000e+00> : vector<16x128xf32>
    %36 = tpu.matmul %34, %35, %cst_32 {dimension_numbers = #tpu.dot_dimension_numbers<[1], [0], [0], [1], [0, 0, 1, 1], [], []>} : vector<16x1152xbf16>, vector<1152x128xbf16>, vector<16x128xf32> -> vector<16x128xf32>
    %c0_33 = arith.constant 0 : index
    %c0_34 = arith.constant 0 : index
    %37 = vector.load %arg3[%c0_33, %c0_34] : memref<1x128xf32, #tpu.memory_space<vmem>>, vector<1x128xf32>
    %38 = vector.broadcast %37 : vector<1x128xf32> to vector<16x128xf32>
    %39 = arith.addf %36, %38 : vector<16x128xf32>
    %cst_35 = arith.constant 5.000000e-01 : f32
    %40 = vector.broadcast %cst_35 : f32 to vector<16x128xf32>
    %41 = arith.mulf %40, %39 : vector<16x128xf32>
    %cst_36 = arith.constant 0.707106769 : f32
    %42 = vector.broadcast %cst_36 : f32 to vector<16x128xf32>
    %43 = arith.mulf %39, %42 : vector<16x128xf32>
    %cst_37 = arith.constant 0.000000e+00 : f32
    %44 = vector.broadcast %cst_37 : f32 to vector<16x128xf32>
    %45 = arith.cmpf oge, %43, %44 : vector<16x128xf32>
    %cst_38 = arith.constant 1.000000e+00 : f32
    %cst_39 = arith.constant -1.000000e+00 : f32
    %46 = vector.broadcast %cst_38 : f32 to vector<16x128xf32>
    %47 = vector.broadcast %cst_39 : f32 to vector<16x128xf32>
    %48 = arith.select %45, %46, %47 : vector<16x128xi1>, vector<16x128xf32>
    %49 = math.absf %43 : vector<16x128xf32>
    %cst_40 = arith.constant 0.327591091 : f32
    %50 = vector.broadcast %cst_40 : f32 to vector<16x128xf32>
    %51 = arith.mulf %50, %49 : vector<16x128xf32>
    %cst_41 = arith.constant 1.000000e+00 : f32
    %52 = vector.broadcast %cst_41 : f32 to vector<16x128xf32>
    %53 = arith.addf %52, %51 : vector<16x128xf32>
    %54 = tpu.reciprocal %53 {approx = true} : vector<16x128xf32> -> vector<16x128xf32>
    %cst_42 = arith.constant 1.06140542 : f32
    %55 = vector.broadcast %cst_42 : f32 to vector<16x128xf32>
    %56 = arith.mulf %55, %54 : vector<16x128xf32>
    %cst_43 = arith.constant -1.45315206 : f32
    %57 = vector.broadcast %cst_43 : f32 to vector<16x128xf32>
    %58 = arith.addf %56, %57 : vector<16x128xf32>
    %59 = arith.mulf %58, %54 : vector<16x128xf32>
    %cst_44 = arith.constant 1.42141378 : f32
    %60 = vector.broadcast %cst_44 : f32 to vector<16x128xf32>
    %61 = arith.addf %59, %60 : vector<16x128xf32>
    %62 = arith.mulf %61, %54 : vector<16x128xf32>
    %cst_45 = arith.constant -0.284496725 : f32
    %63 = vector.broadcast %cst_45 : f32 to vector<16x128xf32>
    %64 = arith.addf %62, %63 : vector<16x128xf32>
    %65 = arith.mulf %64, %54 : vector<16x128xf32>
    %cst_46 = arith.constant 0.254829586 : f32
    %66 = vector.broadcast %cst_46 : f32 to vector<16x128xf32>
    %67 = arith.addf %65, %66 : vector<16x128xf32>
    %68 = arith.mulf %67, %54 : vector<16x128xf32>
    %cst_47 = arith.constant 0.000000e+00 : f32
    %69 = vector.broadcast %cst_47 : f32 to vector<16x128xf32>
    %70 = arith.subf %69, %49 : vector<16x128xf32>
    %71 = arith.mulf %70, %49 : vector<16x128xf32>
    %72 = math.exp %71 : vector<16x128xf32>
    %73 = arith.mulf %68, %72 : vector<16x128xf32>
    %cst_48 = arith.constant 1.000000e+00 : f32
    %74 = vector.broadcast %cst_48 : f32 to vector<16x128xf32>
    %75 = arith.subf %74, %73 : vector<16x128xf32>
    %76 = arith.mulf %48, %75 : vector<16x128xf32>
    %cst_49 = arith.constant 1.000000e+00 : f32
    %77 = vector.broadcast %cst_49 : f32 to vector<16x128xf32>
    %78 = arith.addf %77, %76 : vector<16x128xf32>
    %79 = arith.mulf %41, %78 : vector<16x128xf32>
    %c0_50 = arith.constant 0 : index
    %c0_51 = arith.constant 0 : index
    %80 = vector.load %arg4[%c0_50, %c0_51] : memref<1x128xf32, #tpu.memory_space<vmem>>, vector<1x128xf32>
    %c0_52 = arith.constant 0 : index
    %c0_53 = arith.constant 0 : index
    %81 = vector.load %arg5[%c0_52, %c0_53] : memref<1x128xf32, #tpu.memory_space<vmem>>, vector<1x128xf32>
    %cst_54 = arith.constant dense<0.000000e+00> : vector<16xf32>
    %82 = vector.multi_reduction <add>, %79, %cst_54 [1] : vector<16x128xf32> to vector<16xf32>
    %83 = vector.shape_cast %82 : vector<16xf32> to vector<16x1xf32>
    %cst_55 = arith.constant 1.280000e+02 : f32
    %84 = vector.broadcast %cst_55 : f32 to vector<16x1xf32>
    %85 = arith.divf %83, %84 : vector<16x1xf32>
    %86 = arith.mulf %79, %79 : vector<16x128xf32>
    %cst_56 = arith.constant dense<0.000000e+00> : vector<16xf32>
    %87 = vector.multi_reduction <add>, %86, %cst_56 [1] : vector<16x128xf32> to vector<16xf32>
    %88 = vector.shape_cast %87 : vector<16xf32> to vector<16x1xf32>
    %cst_57 = arith.constant 1.280000e+02 : f32
    %89 = vector.broadcast %cst_57 : f32 to vector<16x1xf32>
    %90 = arith.divf %88, %89 : vector<16x1xf32>
    %91 = arith.mulf %85, %85 : vector<16x1xf32>
    %92 = arith.subf %90, %91 : vector<16x1xf32>
    %cst_58 = arith.constant 0.000000e+00 : f32
    %93 = vector.broadcast %cst_58 : f32 to vector<16x1xf32>
    %94 = arith.maximumf %92, %93 : vector<16x1xf32>
    %95 = vector.broadcast %85 : vector<16x1xf32> to vector<16x128xf32>
    %96 = arith.subf %79, %95 : vector<16x128xf32>
    %cst_59 = arith.constant 9.99999974E-6 : f32
    %97 = vector.broadcast %cst_59 : f32 to vector<16x1xf32>
    %98 = arith.addf %94, %97 : vector<16x1xf32>
    %99 = math.rsqrt %98 : vector<16x1xf32>
    %100 = vector.broadcast %99 : vector<16x1xf32> to vector<16x128xf32>
    %101 = arith.mulf %96, %100 : vector<16x128xf32>
    %102 = vector.broadcast %80 : vector<1x128xf32> to vector<16x128xf32>
    %103 = arith.mulf %101, %102 : vector<16x128xf32>
    %104 = vector.broadcast %81 : vector<1x128xf32> to vector<16x128xf32>
    %105 = arith.addf %103, %104 : vector<16x128xf32>
    %106 = arith.addf %1, %105 : vector<16x128xf32>
    %107 = arith.truncf %106 : vector<16x128xf32> to vector<16x128xbf16>
    %c0_60 = arith.constant 0 : index
    %c0_61 = arith.constant 0 : index
    %108 = vector.load %arg6[%c0_60, %c0_61] : memref<128x128xbf16, #tpu.memory_space<vmem>>, vector<128x128xbf16>
    %cst_62 = arith.constant dense<0.000000e+00> : vector<16x128xf32>
    %109 = tpu.matmul %107, %108, %cst_62 {dimension_numbers = #tpu.dot_dimension_numbers<[1], [0], [0], [1], [0, 0, 1, 1], [], []>} : vector<16x128xbf16>, vector<128x128xbf16>, vector<16x128xf32> -> vector<16x128xf32>
    %c0_63 = arith.constant 0 : index
    %c0_64 = arith.constant 0 : index
    %110 = vector.load %arg7[%c0_63, %c0_64] : memref<1x128xf32, #tpu.memory_space<vmem>>, vector<1x128xf32>
    %111 = vector.broadcast %110 : vector<1x128xf32> to vector<16x128xf32>
    %112 = arith.addf %109, %111 : vector<16x128xf32>
    %cst_65 = arith.constant 5.000000e-01 : f32
    %113 = vector.broadcast %cst_65 : f32 to vector<16x128xf32>
    %114 = arith.mulf %113, %112 : vector<16x128xf32>
    %cst_66 = arith.constant 0.707106769 : f32
    %115 = vector.broadcast %cst_66 : f32 to vector<16x128xf32>
    %116 = arith.mulf %112, %115 : vector<16x128xf32>
    %cst_67 = arith.constant 0.000000e+00 : f32
    %117 = vector.broadcast %cst_67 : f32 to vector<16x128xf32>
    %118 = arith.cmpf oge, %116, %117 : vector<16x128xf32>
    %cst_68 = arith.constant 1.000000e+00 : f32
    %cst_69 = arith.constant -1.000000e+00 : f32
    %119 = vector.broadcast %cst_68 : f32 to vector<16x128xf32>
    %120 = vector.broadcast %cst_69 : f32 to vector<16x128xf32>
    %121 = arith.select %118, %119, %120 : vector<16x128xi1>, vector<16x128xf32>
    %122 = math.absf %116 : vector<16x128xf32>
    %cst_70 = arith.constant 0.327591091 : f32
    %123 = vector.broadcast %cst_70 : f32 to vector<16x128xf32>
    %124 = arith.mulf %123, %122 : vector<16x128xf32>
    %cst_71 = arith.constant 1.000000e+00 : f32
    %125 = vector.broadcast %cst_71 : f32 to vector<16x128xf32>
    %126 = arith.addf %125, %124 : vector<16x128xf32>
    %127 = tpu.reciprocal %126 {approx = true} : vector<16x128xf32> -> vector<16x128xf32>
    %cst_72 = arith.constant 1.06140542 : f32
    %128 = vector.broadcast %cst_72 : f32 to vector<16x128xf32>
    %129 = arith.mulf %128, %127 : vector<16x128xf32>
    %cst_73 = arith.constant -1.45315206 : f32
    %130 = vector.broadcast %cst_73 : f32 to vector<16x128xf32>
    %131 = arith.addf %129, %130 : vector<16x128xf32>
    %132 = arith.mulf %131, %127 : vector<16x128xf32>
    %cst_74 = arith.constant 1.42141378 : f32
    %133 = vector.broadcast %cst_74 : f32 to vector<16x128xf32>
    %134 = arith.addf %132, %133 : vector<16x128xf32>
    %135 = arith.mulf %134, %127 : vector<16x128xf32>
    %cst_75 = arith.constant -0.284496725 : f32
    %136 = vector.broadcast %cst_75 : f32 to vector<16x128xf32>
    %137 = arith.addf %135, %136 : vector<16x128xf32>
    %138 = arith.mulf %137, %127 : vector<16x128xf32>
    %cst_76 = arith.constant 0.254829586 : f32
    %139 = vector.broadcast %cst_76 : f32 to vector<16x128xf32>
    %140 = arith.addf %138, %139 : vector<16x128xf32>
    %141 = arith.mulf %140, %127 : vector<16x128xf32>
    %cst_77 = arith.constant 0.000000e+00 : f32
    %142 = vector.broadcast %cst_77 : f32 to vector<16x128xf32>
    %143 = arith.subf %142, %122 : vector<16x128xf32>
    %144 = arith.mulf %143, %122 : vector<16x128xf32>
    %145 = math.exp %144 : vector<16x128xf32>
    %146 = arith.mulf %141, %145 : vector<16x128xf32>
    %cst_78 = arith.constant 1.000000e+00 : f32
    %147 = vector.broadcast %cst_78 : f32 to vector<16x128xf32>
    %148 = arith.subf %147, %146 : vector<16x128xf32>
    %149 = arith.mulf %121, %148 : vector<16x128xf32>
    %cst_79 = arith.constant 1.000000e+00 : f32
    %150 = vector.broadcast %cst_79 : f32 to vector<16x128xf32>
    %151 = arith.addf %150, %149 : vector<16x128xf32>
    %152 = arith.mulf %114, %151 : vector<16x128xf32>
    %c0_80 = arith.constant 0 : index
    %c0_81 = arith.constant 0 : index
    %153 = vector.load %arg8[%c0_80, %c0_81] : memref<1x128xf32, #tpu.memory_space<vmem>>, vector<1x128xf32>
    %c0_82 = arith.constant 0 : index
    %c0_83 = arith.constant 0 : index
    %154 = vector.load %arg9[%c0_82, %c0_83] : memref<1x128xf32, #tpu.memory_space<vmem>>, vector<1x128xf32>
    %cst_84 = arith.constant dense<0.000000e+00> : vector<16xf32>
    %155 = vector.multi_reduction <add>, %152, %cst_84 [1] : vector<16x128xf32> to vector<16xf32>
    %156 = vector.shape_cast %155 : vector<16xf32> to vector<16x1xf32>
    %cst_85 = arith.constant 1.280000e+02 : f32
    %157 = vector.broadcast %cst_85 : f32 to vector<16x1xf32>
    %158 = arith.divf %156, %157 : vector<16x1xf32>
    %159 = arith.mulf %152, %152 : vector<16x128xf32>
    %cst_86 = arith.constant dense<0.000000e+00> : vector<16xf32>
    %160 = vector.multi_reduction <add>, %159, %cst_86 [1] : vector<16x128xf32> to vector<16xf32>
    %161 = vector.shape_cast %160 : vector<16xf32> to vector<16x1xf32>
    %cst_87 = arith.constant 1.280000e+02 : f32
    %162 = vector.broadcast %cst_87 : f32 to vector<16x1xf32>
    %163 = arith.divf %161, %162 : vector<16x1xf32>
    %164 = arith.mulf %158, %158 : vector<16x1xf32>
    %165 = arith.subf %163, %164 : vector<16x1xf32>
    %cst_88 = arith.constant 0.000000e+00 : f32
    %166 = vector.broadcast %cst_88 : f32 to vector<16x1xf32>
    %167 = arith.maximumf %165, %166 : vector<16x1xf32>
    %168 = vector.broadcast %158 : vector<16x1xf32> to vector<16x128xf32>
    %169 = arith.subf %152, %168 : vector<16x128xf32>
    %cst_89 = arith.constant 9.99999974E-6 : f32
    %170 = vector.broadcast %cst_89 : f32 to vector<16x1xf32>
    %171 = arith.addf %167, %170 : vector<16x1xf32>
    %172 = math.rsqrt %171 : vector<16x1xf32>
    %173 = vector.broadcast %172 : vector<16x1xf32> to vector<16x128xf32>
    %174 = arith.mulf %169, %173 : vector<16x128xf32>
    %175 = vector.broadcast %153 : vector<1x128xf32> to vector<16x128xf32>
    %176 = arith.mulf %174, %175 : vector<16x128xf32>
    %177 = vector.broadcast %154 : vector<1x128xf32> to vector<16x128xf32>
    %178 = arith.addf %176, %177 : vector<16x128xf32>
    %179 = arith.addf %106, %178 : vector<16x128xf32>
    %c0_90 = arith.constant 0 : index
    %c0_91 = arith.constant 0 : index
    %c0_92 = arith.constant 0 : index
    %180 = vector.load %arg10[%c0_90, %c0_91, %c0_92] : memref<1x16x128xf32, #tpu.memory_space<vmem>>, vector<1x16x128xf32>
    %181 = vector.shape_cast %180 : vector<1x16x128xf32> to vector<16x128xf32>
    %182 = vector.shape_cast %179 : vector<16x128xf32> to vector<1x16x128xf32>
    tpu.vector_store %arg10[%c0_90, %c0_91, %c0_92], %182 {strides = array<i32>} : memref<1x16x128xf32, #tpu.memory_space<vmem>>, vector<1x16x128xf32>,
    return
  }
  func.func @transform_0(%arg0: i32) -> (i32, i32, i32) {
    %c0_i32 = arith.constant 0 : i32
    %c0_i32_0 = arith.constant 0 : i32
    %c0_i32_1 = arith.constant 0 : i32
    return %arg0, %c0_i32, %c0_i32_0 : i32, i32, i32
  }
  func.func @transform_1(%arg0: i32) -> (i32, i32) {
    %c0_i32 = arith.constant 0 : i32
    %c0_i32_0 = arith.constant 0 : i32
    %c0_i32_1 = arith.constant 0 : i32
    return %c0_i32, %c0_i32_0 : i32, i32
  }
  func.func @transform_2(%arg0: i32) -> (i32, i32) {
    %c0_i32 = arith.constant 0 : i32
    %c0_i32_0 = arith.constant 0 : i32
    %c0_i32_1 = arith.constant 0 : i32
    return %c0_i32, %c0_i32_0 : i32, i32
  }
  func.func @transform_3(%arg0: i32) -> (i32, i32) {
    %c0_i32 = arith.constant 0 : i32
    %c0_i32_0 = arith.constant 0 : i32
    %c0_i32_1 = arith.constant 0 : i32
    return %c0_i32, %c0_i32_0 : i32, i32
  }
  func.func @transform_4(%arg0: i32) -> (i32, i32) {
    %c0_i32 = arith.constant 0 : i32
    %c0_i32_0 = arith.constant 0 : i32
    %c0_i32_1 = arith.constant 0 : i32
    return %c0_i32, %c0_i32_0 : i32, i32
  }
  func.func @transform_5(%arg0: i32) -> (i32, i32) {
    %c0_i32 = arith.constant 0 : i32
    %c0_i32_0 = arith.constant 0 : i32
    %c0_i32_1 = arith.constant 0 : i32
    return %c0_i32, %c0_i32_0 : i32, i32
  }
  func.func @transform_6(%arg0: i32) -> (i32, i32) {
    %c0_i32 = arith.constant 0 : i32
    %c0_i32_0 = arith.constant 0 : i32
    %c0_i32_1 = arith.constant 0 : i32
    return %c0_i32, %c0_i32_0 : i32, i32
  }
  func.func @transform_7(%arg0: i32) -> (i32, i32) {
    %c0_i32 = arith.constant 0 : i32
    %c0_i32_0 = arith.constant 0 : i32
    %c0_i32_1 = arith.constant 0 : i32
    return %c0_i32, %c0_i32_0 : i32, i32
  }
  func.func @transform_8(%arg0: i32) -> (i32, i32) {
    %c0_i32 = arith.constant 0 : i32
    %c0_i32_0 = arith.constant 0 : i32
    %c0_i32_1 = arith.constant 0 : i32
    return %c0_i32, %c0_i32_0 : i32, i32
  }
  func.func @transform_9(%arg0: i32) -> (i32, i32, i32) {
    %c0_i32 = arith.constant 0 : i32
    %c0_i32_0 = arith.constant 0 : i32
    %c0_i32_1 = arith.constant 0 : i32
    return %arg0, %c0_i32, %c0_i32_0 : i32, i32, i32
  }
}

module attributes {stable_mosaic.version = 11 : i64} {
  func.func @_conv_layer_kernel(%arg0: i32, %arg1: memref<1x16x128xf32, #tpu.memory_space<vmem>>, %arg2: memref<1152x128xbf16, #tpu.memory_space<vmem>>, %arg3: memref<1x128xf32, #tpu.memory_space<vmem>>, %arg4: memref<1x128xf32, #tpu.memory_space<vmem>>, %arg5: memref<1x128xf32, #tpu.memory_space<vmem>>, %arg6: memref<128x128xbf16, #tpu.memory_space<vmem>>, %arg7: memref<1x128xf32, #tpu.memory_space<vmem>>, %arg8: memref<1x128xf32, #tpu.memory_space<vmem>>, %arg9: memref<1x128xf32, #tpu.memory_space<vmem>>, %arg10: memref<1x16x128xf32, #tpu.memory_space<vmem>>, %arg11: memref<24x128xf32, #tpu.memory_space<vmem>>, %arg12: memref<16x1152xbf16, #tpu.memory_space<vmem>>) attributes {dimension_semantics = [#tpu.dimension_semantics<parallel>], iteration_bounds = array<i64: 2>, scalar_prefetch = 0 : i64, scratch_operands = 2 : i64, tpu.core_type = #tpu.core_type<tc>, window_params = [{transform_indices = @transform_0, window_bounds = array<i64: 1, 16, 128>}, {pipeline_mode = #tpu.pipeline_mode<synchronous>, transform_indices = @transform_1, window_bounds = array<i64: 1152, 128>}, {pipeline_mode = #tpu.pipeline_mode<synchronous>, transform_indices = @transform_2, window_bounds = array<i64: 1, 128>}, {pipeline_mode = #tpu.pipeline_mode<synchronous>, transform_indices = @transform_3, window_bounds = array<i64: 1, 128>}, {pipeline_mode = #tpu.pipeline_mode<synchronous>, transform_indices = @transform_4, window_bounds = array<i64: 1, 128>}, {pipeline_mode = #tpu.pipeline_mode<synchronous>, transform_indices = @transform_5, window_bounds = array<i64: 128, 128>}, {pipeline_mode = #tpu.pipeline_mode<synchronous>, transform_indices = @transform_6, window_bounds = array<i64: 1, 128>}, {pipeline_mode = #tpu.pipeline_mode<synchronous>, transform_indices = @transform_7, window_bounds = array<i64: 1, 128>}, {pipeline_mode = #tpu.pipeline_mode<synchronous>, transform_indices = @transform_8, window_bounds = array<i64: 1, 128>}, {transform_indices = @transform_9, window_bounds = array<i64: 1, 16, 128>}]} {
    %c0 = arith.constant 0 : index
    %c0_0 = arith.constant 0 : index
    %c0_1 = arith.constant 0 : index
    %0 = vector.load %arg1[%c0, %c0_0, %c0_1] : memref<1x16x128xf32, #tpu.memory_space<vmem>>, vector<1x16x128xf32>
    %1 = vector.shape_cast %0 : vector<1x16x128xf32> to vector<16x128xf32>
    %cst = arith.constant 0.000000e+00 : f32
    %2 = vector.broadcast %cst : f32 to vector<4x128xf32>
    %c0_2 = arith.constant 0 : index
    %c0_3 = arith.constant 0 : index
    %3 = vector.load %arg11[%c0_2, %c0_3] : memref<24x128xf32, #tpu.memory_space<vmem>>, vector<4x128xf32>
    tpu.vector_store %arg11[%c0_2, %c0_3], %2 {strides = array<i32>} : memref<24x128xf32, #tpu.memory_space<vmem>>, vector<4x128xf32>,
    %cst_4 = arith.constant 0.000000e+00 : f32
    %4 = vector.broadcast %cst_4 : f32 to vector<4x128xf32>
    %c20 = arith.constant 20 : index
    %c0_5 = arith.constant 0 : index
    %5 = vector.load %arg11[%c20, %c0_5] : memref<24x128xf32, #tpu.memory_space<vmem>>, vector<4x128xf32>
    tpu.vector_store %arg11[%c20, %c0_5], %4 {strides = array<i32>} : memref<24x128xf32, #tpu.memory_space<vmem>>, vector<4x128xf32>,
    %c4 = arith.constant 4 : index
    %c0_6 = arith.constant 0 : index
    %6 = vector.load %arg11[%c4, %c0_6] : memref<24x128xf32, #tpu.memory_space<vmem>>, vector<16x128xf32>
    tpu.vector_store %arg11[%c4, %c0_6], %1 {strides = array<i32>} : memref<24x128xf32, #tpu.memory_space<vmem>>, vector<16x128xf32>,
    %c0_7 = arith.constant 0 : index
    %c0_8 = arith.constant 0 : index
    %7 = vector.load %arg11[%c0_7, %c0_8] : memref<24x128xf32, #tpu.memory_space<vmem>>, vector<16x128xf32>
    %8 = arith.truncf %7 : vector<16x128xf32> to vector<16x128xbf16>
    %c0_9 = arith.constant 0 : index
    %c0_10 = arith.constant 0 : index
    %9 = vector.load %arg12[%c0_9, %c0_10] : memref<16x1152xbf16, #tpu.memory_space<vmem>>, vector<16x128xbf16>
    tpu.vector_store %arg12[%c0_9, %c0_10], %8 {strides = array<i32>} : memref<16x1152xbf16, #tpu.memory_space<vmem>>, vector<16x128xbf16>,
    %c1 = arith.constant 1 : index
    %c0_11 = arith.constant 0 : index
    %10 = vector.load %arg11[%c1, %c0_11] : memref<24x128xf32, #tpu.memory_space<vmem>>, vector<16x128xf32>
    %11 = arith.truncf %10 : vector<16x128xf32> to vector<16x128xbf16>
    %c0_12 = arith.constant 0 : index
    %c128 = arith.constant 128 : index
    %12 = vector.load %arg12[%c0_12, %c128] : memref<16x1152xbf16, #tpu.memory_space<vmem>>, vector<16x128xbf16>
    tpu.vector_store %arg12[%c0_12, %c128], %11 {strides = array<i32>} : memref<16x1152xbf16, #tpu.memory_space<vmem>>, vector<16x128xbf16>,
    %c2 = arith.constant 2 : index
    %c0_13 = arith.constant 0 : index
    %13 = vector.load %arg11[%c2, %c0_13] : memref<24x128xf32, #tpu.memory_space<vmem>>, vector<16x128xf32>
    %14 = arith.truncf %13 : vector<16x128xf32> to vector<16x128xbf16>
    %c0_14 = arith.constant 0 : index
    %c256 = arith.constant 256 : index
    %15 = vector.load %arg12[%c0_14, %c256] : memref<16x1152xbf16, #tpu.memory_space<vmem>>, vector<16x128xbf16>
    tpu.vector_store %arg12[%c0_14, %c256], %14 {strides = array<i32>} : memref<16x1152xbf16, #tpu.memory_space<vmem>>, vector<16x128xbf16>,
    %c3 = arith.constant 3 : index
    %c0_15 = arith.constant 0 : index
    %16 = vector.load %arg11[%c3, %c0_15] : memref<24x128xf32, #tpu.memory_space<vmem>>, vector<16x128xf32>
    %17 = arith.truncf %16 : vector<16x128xf32> to vector<16x128xbf16>
    %c0_16 = arith.constant 0 : index
    %c384 = arith.constant 384 : index
    %18 = vector.load %arg12[%c0_16, %c384] : memref<16x1152xbf16, #tpu.memory_space<vmem>>, vector<16x128xbf16>
    tpu.vector_store %arg12[%c0_16, %c384], %17 {strides = array<i32>} : memref<16x1152xbf16, #tpu.memory_space<vmem>>, vector<16x128xbf16>,
    %c4_17 = arith.constant 4 : index
    %c0_18 = arith.constant 0 : index
    %19 = vector.load %arg11[%c4_17, %c0_18] : memref<24x128xf32, #tpu.memory_space<vmem>>, vector<16x128xf32>
    %20 = arith.truncf %19 : vector<16x128xf32> to vector<16x128xbf16>
    %c0_19 = arith.constant 0 : index
    %c512 = arith.constant 512 : index
    %21 = vector.load %arg12[%c0_19, %c512] : memref<16x1152xbf16, #tpu.memory_space<vmem>>, vector<16x128xbf16>
    tpu.vector_store %arg12[%c0_19, %c512], %20 {strides = array<i32>} : memref<16x1152xbf16, #tpu.memory_space<vmem>>, vector<16x128xbf16>,
    %c5 = arith.constant 5 : index
    %c0_20 = arith.constant 0 : index
    %22 = vector.load %arg11[%c5, %c0_20] : memref<24x128xf32, #tpu.memory_space<vmem>>, vector<16x128xf32>
    %23 = arith.truncf %22 : vector<16x128xf32> to vector<16x128xbf16>
    %c0_21 = arith.constant 0 : index
    %c640 = arith.constant 640 : index
    %24 = vector.load %arg12[%c0_21, %c640] : memref<16x1152xbf16, #tpu.memory_space<vmem>>, vector<16x128xbf16>
    tpu.vector_store %arg12[%c0_21, %c640], %23 {strides = array<i32>} : memref<16x1152xbf16, #tpu.memory_space<vmem>>, vector<16x128xbf16>,
    %c6 = arith.constant 6 : index
    %c0_22 = arith.constant 0 : index
    %25 = vector.load %arg11[%c6, %c0_22] : memref<24x128xf32, #tpu.memory_space<vmem>>, vector<16x128xf32>
    %26 = arith.truncf %25 : vector<16x128xf32> to vector<16x128xbf16>
    %c0_23 = arith.constant 0 : index
    %c768 = arith.constant 768 : index
    %27 = vector.load %arg12[%c0_23, %c768] : memref<16x1152xbf16, #tpu.memory_space<vmem>>, vector<16x128xbf16>
    tpu.vector_store %arg12[%c0_23, %c768], %26 {strides = array<i32>} : memref<16x1152xbf16, #tpu.memory_space<vmem>>, vector<16x128xbf16>,
    %c7 = arith.constant 7 : index
    %c0_24 = arith.constant 0 : index
    %28 = vector.load %arg11[%c7, %c0_24] : memref<24x128xf32, #tpu.memory_space<vmem>>, vector<16x128xf32>
    %29 = arith.truncf %28 : vector<16x128xf32> to vector<16x128xbf16>
    %c0_25 = arith.constant 0 : index
    %c896 = arith.constant 896 : index
    %30 = vector.load %arg12[%c0_25, %c896] : memref<16x1152xbf16, #tpu.memory_space<vmem>>, vector<16x128xbf16>
    tpu.vector_store %arg12[%c0_25, %c896], %29 {strides = array<i32>} : memref<16x1152xbf16, #tpu.memory_space<vmem>>, vector<16x128xbf16>,
    %c8 = arith.constant 8 : index
    %c0_26 = arith.constant 0 : index
    %31 = vector.load %arg11[%c8, %c0_26] : memref<24x128xf32, #tpu.memory_space<vmem>>, vector<16x128xf32>
    %32 = arith.truncf %31 : vector<16x128xf32> to vector<16x128xbf16>
    %c0_27 = arith.constant 0 : index
    %c1024 = arith.constant 1024 : index
    %33 = vector.load %arg12[%c0_27, %c1024] : memref<16x1152xbf16, #tpu.memory_space<vmem>>, vector<16x128xbf16>
    tpu.vector_store %arg12[%c0_27, %c1024], %32 {strides = array<i32>} : memref<16x1152xbf16, #tpu.memory_space<vmem>>, vector<16x128xbf16>,
    %c0_28 = arith.constant 0 : index
    %c0_29 = arith.constant 0 : index
    %34 = vector.load %arg12[%c0_28, %c0_29] : memref<16x1152xbf16, #tpu.memory_space<vmem>>, vector<16x1152xbf16>
    %c0_30 = arith.constant 0 : index
    %c0_31 = arith.constant 0 : index
    %35 = vector.load %arg2[%c0_30, %c0_31] : memref<1152x128xbf16, #tpu.memory_space<vmem>>, vector<1152x128xbf16>
    %cst_32 = arith.constant dense<0.000000e+00> : vector<16x128xf32>
    %36 = tpu.matmul %34, %35, %cst_32 {dimension_numbers = #tpu.dot_dimension_numbers<[1], [0], [0], [1], [0, 0, 1, 1], [], []>} : vector<16x1152xbf16>, vector<1152x128xbf16>, vector<16x128xf32> -> vector<16x128xf32>
    %c0_33 = arith.constant 0 : index
    %c0_34 = arith.constant 0 : index
    %37 = vector.load %arg3[%c0_33, %c0_34] : memref<1x128xf32, #tpu.memory_space<vmem>>, vector<1x128xf32>
    %38 = vector.broadcast %37 : vector<1x128xf32> to vector<16x128xf32>
    %39 = arith.addf %36, %38 : vector<16x128xf32>
    %cst_35 = arith.constant 5.000000e-01 : f32
    %40 = vector.broadcast %cst_35 : f32 to vector<16x128xf32>
    %41 = arith.mulf %40, %39 : vector<16x128xf32>
    %cst_36 = arith.constant 0.707106769 : f32
    %42 = vector.broadcast %cst_36 : f32 to vector<16x128xf32>
    %43 = arith.mulf %39, %42 : vector<16x128xf32>
    %cst_37 = arith.constant 0.000000e+00 : f32
    %44 = vector.broadcast %cst_37 : f32 to vector<16x128xf32>
    %45 = arith.cmpf oge, %43, %44 : vector<16x128xf32>
    %cst_38 = arith.constant 1.000000e+00 : f32
    %cst_39 = arith.constant -1.000000e+00 : f32
    %46 = vector.broadcast %cst_38 : f32 to vector<16x128xf32>
    %47 = vector.broadcast %cst_39 : f32 to vector<16x128xf32>
    %48 = arith.select %45, %46, %47 : vector<16x128xi1>, vector<16x128xf32>
    %49 = math.absf %43 : vector<16x128xf32>
    %cst_40 = arith.constant 0.327591091 : f32
    %50 = vector.broadcast %cst_40 : f32 to vector<16x128xf32>
    %51 = arith.mulf %50, %49 : vector<16x128xf32>
    %cst_41 = arith.constant 1.000000e+00 : f32
    %52 = vector.broadcast %cst_41 : f32 to vector<16x128xf32>
    %53 = arith.addf %52, %51 : vector<16x128xf32>
    %54 = tpu.reciprocal %53 {approx = true} : vector<16x128xf32> -> vector<16x128xf32>
    %cst_42 = arith.constant 1.06140542 : f32
    %55 = vector.broadcast %cst_42 : f32 to vector<16x128xf32>
    %56 = arith.mulf %55, %54 : vector<16x128xf32>
    %cst_43 = arith.constant -1.45315206 : f32
    %57 = vector.broadcast %cst_43 : f32 to vector<16x128xf32>
    %58 = arith.addf %56, %57 : vector<16x128xf32>
    %59 = arith.mulf %58, %54 : vector<16x128xf32>
    %cst_44 = arith.constant 1.42141378 : f32
    %60 = vector.broadcast %cst_44 : f32 to vector<16x128xf32>
    %61 = arith.addf %59, %60 : vector<16x128xf32>
    %62 = arith.mulf %61, %54 : vector<16x128xf32>
    %cst_45 = arith.constant -0.284496725 : f32
    %63 = vector.broadcast %cst_45 : f32 to vector<16x128xf32>
    %64 = arith.addf %62, %63 : vector<16x128xf32>
    %65 = arith.mulf %64, %54 : vector<16x128xf32>
    %cst_46 = arith.constant 0.254829586 : f32
    %66 = vector.broadcast %cst_46 : f32 to vector<16x128xf32>
    %67 = arith.addf %65, %66 : vector<16x128xf32>
    %68 = arith.mulf %67, %54 : vector<16x128xf32>
    %cst_47 = arith.constant 0.000000e+00 : f32
    %69 = vector.broadcast %cst_47 : f32 to vector<16x128xf32>
    %70 = arith.subf %69, %49 : vector<16x128xf32>
    %71 = arith.mulf %70, %49 : vector<16x128xf32>
    %72 = math.exp %71 : vector<16x128xf32>
    %73 = arith.mulf %68, %72 : vector<16x128xf32>
    %cst_48 = arith.constant 1.000000e+00 : f32
    %74 = vector.broadcast %cst_48 : f32 to vector<16x128xf32>
    %75 = arith.subf %74, %73 : vector<16x128xf32>
    %76 = arith.mulf %48, %75 : vector<16x128xf32>
    %cst_49 = arith.constant 1.000000e+00 : f32
    %77 = vector.broadcast %cst_49 : f32 to vector<16x128xf32>
    %78 = arith.addf %77, %76 : vector<16x128xf32>
    %79 = arith.mulf %41, %78 : vector<16x128xf32>
    %c0_50 = arith.constant 0 : index
    %c0_51 = arith.constant 0 : index
    %80 = vector.load %arg4[%c0_50, %c0_51] : memref<1x128xf32, #tpu.memory_space<vmem>>, vector<1x128xf32>
    %c0_52 = arith.constant 0 : index
    %c0_53 = arith.constant 0 : index
    %81 = vector.load %arg5[%c0_52, %c0_53] : memref<1x128xf32, #tpu.memory_space<vmem>>, vector<1x128xf32>
    %cst_54 = arith.constant dense<0.000000e+00> : vector<16xf32>
    %82 = vector.multi_reduction <add>, %79, %cst_54 [1] : vector<16x128xf32> to vector<16xf32>
    %83 = vector.shape_cast %82 : vector<16xf32> to vector<16x1xf32>
    %cst_55 = arith.constant 1.280000e+02 : f32
    %84 = vector.broadcast %cst_55 : f32 to vector<16x1xf32>
    %85 = arith.divf %83, %84 : vector<16x1xf32>
    %86 = arith.mulf %79, %79 : vector<16x128xf32>
    %cst_56 = arith.constant dense<0.000000e+00> : vector<16xf32>
    %87 = vector.multi_reduction <add>, %86, %cst_56 [1] : vector<16x128xf32> to vector<16xf32>
    %88 = vector.shape_cast %87 : vector<16xf32> to vector<16x1xf32>
    %cst_57 = arith.constant 1.280000e+02 : f32
    %89 = vector.broadcast %cst_57 : f32 to vector<16x1xf32>
    %90 = arith.divf %88, %89 : vector<16x1xf32>
    %91 = arith.mulf %85, %85 : vector<16x1xf32>
    %92 = arith.subf %90, %91 : vector<16x1xf32>
    %cst_58 = arith.constant 0.000000e+00 : f32
    %93 = vector.broadcast %cst_58 : f32 to vector<16x1xf32>
    %94 = arith.maximumf %92, %93 : vector<16x1xf32>
    %95 = vector.broadcast %85 : vector<16x1xf32> to vector<16x128xf32>
    %96 = arith.subf %79, %95 : vector<16x128xf32>
    %cst_59 = arith.constant 9.99999974E-6 : f32
    %97 = vector.broadcast %cst_59 : f32 to vector<16x1xf32>
    %98 = arith.addf %94, %97 : vector<16x1xf32>
    %99 = math.rsqrt %98 : vector<16x1xf32>
    %100 = vector.broadcast %99 : vector<16x1xf32> to vector<16x128xf32>
    %101 = arith.mulf %96, %100 : vector<16x128xf32>
    %102 = vector.broadcast %80 : vector<1x128xf32> to vector<16x128xf32>
    %103 = arith.mulf %101, %102 : vector<16x128xf32>
    %104 = vector.broadcast %81 : vector<1x128xf32> to vector<16x128xf32>
    %105 = arith.addf %103, %104 : vector<16x128xf32>
    %106 = arith.addf %1, %105 : vector<16x128xf32>
    %107 = arith.truncf %106 : vector<16x128xf32> to vector<16x128xbf16>
    %c0_60 = arith.constant 0 : index
    %c0_61 = arith.constant 0 : index
    %108 = vector.load %arg6[%c0_60, %c0_61] : memref<128x128xbf16, #tpu.memory_space<vmem>>, vector<128x128xbf16>
    %cst_62 = arith.constant dense<0.000000e+00> : vector<16x128xf32>
    %109 = tpu.matmul %107, %108, %cst_62 {dimension_numbers = #tpu.dot_dimension_numbers<[1], [0], [0], [1], [0, 0, 1, 1], [], []>} : vector<16x128xbf16>, vector<128x128xbf16>, vector<16x128xf32> -> vector<16x128xf32>
    %c0_63 = arith.constant 0 : index
    %c0_64 = arith.constant 0 : index
    %110 = vector.load %arg7[%c0_63, %c0_64] : memref<1x128xf32, #tpu.memory_space<vmem>>, vector<1x128xf32>
    %111 = vector.broadcast %110 : vector<1x128xf32> to vector<16x128xf32>
    %112 = arith.addf %109, %111 : vector<16x128xf32>
    %cst_65 = arith.constant 5.000000e-01 : f32
    %113 = vector.broadcast %cst_65 : f32 to vector<16x128xf32>
    %114 = arith.mulf %113, %112 : vector<16x128xf32>
    %cst_66 = arith.constant 0.707106769 : f32
    %115 = vector.broadcast %cst_66 : f32 to vector<16x128xf32>
    %116 = arith.mulf %112, %115 : vector<16x128xf32>
    %cst_67 = arith.constant 0.000000e+00 : f32
    %117 = vector.broadcast %cst_67 : f32 to vector<16x128xf32>
    %118 = arith.cmpf oge, %116, %117 : vector<16x128xf32>
    %cst_68 = arith.constant 1.000000e+00 : f32
    %cst_69 = arith.constant -1.000000e+00 : f32
    %119 = vector.broadcast %cst_68 : f32 to vector<16x128xf32>
    %120 = vector.broadcast %cst_69 : f32 to vector<16x128xf32>
    %121 = arith.select %118, %119, %120 : vector<16x128xi1>, vector<16x128xf32>
    %122 = math.absf %116 : vector<16x128xf32>
    %cst_70 = arith.constant 0.327591091 : f32
    %123 = vector.broadcast %cst_70 : f32 to vector<16x128xf32>
    %124 = arith.mulf %123, %122 : vector<16x128xf32>
    %cst_71 = arith.constant 1.000000e+00 : f32
    %125 = vector.broadcast %cst_71 : f32 to vector<16x128xf32>
    %126 = arith.addf %125, %124 : vector<16x128xf32>
    %127 = tpu.reciprocal %126 {approx = true} : vector<16x128xf32> -> vector<16x128xf32>
    %cst_72 = arith.constant 1.06140542 : f32
    %128 = vector.broadcast %cst_72 : f32 to vector<16x128xf32>
    %129 = arith.mulf %128, %127 : vector<16x128xf32>
    %cst_73 = arith.constant -1.45315206 : f32
    %130 = vector.broadcast %cst_73 : f32 to vector<16x128xf32>
    %131 = arith.addf %129, %130 : vector<16x128xf32>
    %132 = arith.mulf %131, %127 : vector<16x128xf32>
    %cst_74 = arith.constant 1.42141378 : f32
    %133 = vector.broadcast %cst_74 : f32 to vector<16x128xf32>
    %134 = arith.addf %132, %133 : vector<16x128xf32>
    %135 = arith.mulf %134, %127 : vector<16x128xf32>
    %cst_75 = arith.constant -0.284496725 : f32
    %136 = vector.broadcast %cst_75 : f32 to vector<16x128xf32>
    %137 = arith.addf %135, %136 : vector<16x128xf32>
    %138 = arith.mulf %137, %127 : vector<16x128xf32>
    %cst_76 = arith.constant 0.254829586 : f32
    %139 = vector.broadcast %cst_76 : f32 to vector<16x128xf32>
    %140 = arith.addf %138, %139 : vector<16x128xf32>
    %141 = arith.mulf %140, %127 : vector<16x128xf32>
    %cst_77 = arith.constant 0.000000e+00 : f32
    %142 = vector.broadcast %cst_77 : f32 to vector<16x128xf32>
    %143 = arith.subf %142, %122 : vector<16x128xf32>
    %144 = arith.mulf %143, %122 : vector<16x128xf32>
    %145 = math.exp %144 : vector<16x128xf32>
    %146 = arith.mulf %141, %145 : vector<16x128xf32>
    %cst_78 = arith.constant 1.000000e+00 : f32
    %147 = vector.broadcast %cst_78 : f32 to vector<16x128xf32>
    %148 = arith.subf %147, %146 : vector<16x128xf32>
    %149 = arith.mulf %121, %148 : vector<16x128xf32>
    %cst_79 = arith.constant 1.000000e+00 : f32
    %150 = vector.broadcast %cst_79 : f32 to vector<16x128xf32>
    %151 = arith.addf %150, %149 : vector<16x128xf32>
    %152 = arith.mulf %114, %151 : vector<16x128xf32>
    %c0_80 = arith.constant 0 : index
    %c0_81 = arith.constant 0 : index
    %153 = vector.load %arg8[%c0_80, %c0_81] : memref<1x128xf32, #tpu.memory_space<vmem>>, vector<1x128xf32>
    %c0_82 = arith.constant 0 : index
    %c0_83 = arith.constant 0 : index
    %154 = vector.load %arg9[%c0_82, %c0_83] : memref<1x128xf32, #tpu.memory_space<vmem>>, vector<1x128xf32>
    %cst_84 = arith.constant dense<0.000000e+00> : vector<16xf32>
    %155 = vector.multi_reduction <add>, %152, %cst_84 [1] : vector<16x128xf32> to vector<16xf32>
    %156 = vector.shape_cast %155 : vector<16xf32> to vector<16x1xf32>
    %cst_85 = arith.constant 1.280000e+02 : f32
    %157 = vector.broadcast %cst_85 : f32 to vector<16x1xf32>
    %158 = arith.divf %156, %157 : vector<16x1xf32>
    %159 = arith.mulf %152, %152 : vector<16x128xf32>
    %cst_86 = arith.constant dense<0.000000e+00> : vector<16xf32>
    %160 = vector.multi_reduction <add>, %159, %cst_86 [1] : vector<16x128xf32> to vector<16xf32>
    %161 = vector.shape_cast %160 : vector<16xf32> to vector<16x1xf32>
    %cst_87 = arith.constant 1.280000e+02 : f32
    %162 = vector.broadcast %cst_87 : f32 to vector<16x1xf32>
    %163 = arith.divf %161, %162 : vector<16x1xf32>
    %164 = arith.mulf %158, %158 : vector<16x1xf32>
    %165 = arith.subf %163, %164 : vector<16x1xf32>
    %cst_88 = arith.constant 0.000000e+00 : f32
    %166 = vector.broadcast %cst_88 : f32 to vector<16x1xf32>
    %167 = arith.maximumf %165, %166 : vector<16x1xf32>
    %168 = vector.broadcast %158 : vector<16x1xf32> to vector<16x128xf32>
    %169 = arith.subf %152, %168 : vector<16x128xf32>
    %cst_89 = arith.constant 9.99999974E-6 : f32
    %170 = vector.broadcast %cst_89 : f32 to vector<16x1xf32>
    %171 = arith.addf %167, %170 : vector<16x1xf32>
    %172 = math.rsqrt %171 : vector<16x1xf32>
    %173 = vector.broadcast %172 : vector<16x1xf32> to vector<16x128xf32>
    %174 = arith.mulf %169, %173 : vector<16x128xf32>
    %175 = vector.broadcast %153 : vector<1x128xf32> to vector<16x128xf32>
    %176 = arith.mulf %174, %175 : vector<16x128xf32>
    %177 = vector.broadcast %154 : vector<1x128xf32> to vector<16x128xf32>
    %178 = arith.addf %176, %177 : vector<16x128xf32>
    %179 = arith.addf %106, %178 : vector<16x128xf32>
    %c0_90 = arith.constant 0 : index
    %c0_91 = arith.constant 0 : index
    %c0_92 = arith.constant 0 : index
    %180 = vector.load %arg10[%c0_90, %c0_91, %c0_92] : memref<1x16x128xf32, #tpu.memory_space<vmem>>, vector<1x16x128xf32>
    %181 = vector.shape_cast %180 : vector<1x16x128xf32> to vector<16x128xf32>
    %182 = vector.shape_cast %179 : vector<16x128xf32> to vector<1x16x128xf32>
    tpu.vector_store %arg10[%c0_90, %c0_91, %c0_92], %182 {strides = array<i32>} : memref<1x16x128xf32, #tpu.memory_space<vmem>>, vector<1x16x128xf32>,
    return
  }
  func.func @transform_0(%arg0: i32) -> (i32, i32, i32) {
    %c0_i32 = arith.constant 0 : i32
    %c0_i32_0 = arith.constant 0 : i32
    %c0_i32_1 = arith.constant 0 : i32
    return %arg0, %c0_i32, %c0_i32_0 : i32, i32, i32
  }
  func.func @transform_1(%arg0: i32) -> (i32, i32) {
    %c0_i32 = arith.constant 0 : i32
    %c0_i32_0 = arith.constant 0 : i32
    %c0_i32_1 = arith.constant 0 : i32
    return %c0_i32, %c0_i32_0 : i32, i32
  }
  func.func @transform_2(%arg0: i32) -> (i32, i32) {
    %c0_i32 = arith.constant 0 : i32
    %c0_i32_0 = arith.constant 0 : i32
    %c0_i32_1 = arith.constant 0 : i32
    return %c0_i32, %c0_i32_0 : i32, i32
  }
  func.func @transform_3(%arg0: i32) -> (i32, i32) {
    %c0_i32 = arith.constant 0 : i32
    %c0_i32_0 = arith.constant 0 : i32
    %c0_i32_1 = arith.constant 0 : i32
    return %c0_i32, %c0_i32_0 : i32, i32
  }
  func.func @transform_4(%arg0: i32) -> (i32, i32) {
    %c0_i32 = arith.constant 0 : i32
    %c0_i32_0 = arith.constant 0 : i32
    %c0_i32_1 = arith.constant 0 : i32
    return %c0_i32, %c0_i32_0 : i32, i32
  }
  func.func @transform_5(%arg0: i32) -> (i32, i32) {
    %c0_i32 = arith.constant 0 : i32
    %c0_i32_0 = arith.constant 0 : i32
    %c0_i32_1 = arith.constant 0 : i32
    return %c0_i32, %c0_i32_0 : i32, i32
  }
  func.func @transform_6(%arg0: i32) -> (i32, i32) {
    %c0_i32 = arith.constant 0 : i32
    %c0_i32_0 = arith.constant 0 : i32
    %c0_i32_1 = arith.constant 0 : i32
    return %c0_i32, %c0_i32_0 : i32, i32
  }
  func.func @transform_7(%arg0: i32) -> (i32, i32) {
    %c0_i32 = arith.constant 0 : i32
    %c0_i32_0 = arith.constant 0 : i32
    %c0_i32_1 = arith.constant 0 : i32
    return %c0_i32, %c0_i32_0 : i32, i32
  }
  func.func @transform_8(%arg0: i32) -> (i32, i32) {
    %c0_i32 = arith.constant 0 : i32
    %c0_i32_0 = arith.constant 0 : i32
    %c0_i32_1 = arith.constant 0 : i32
    return %c0_i32, %c0_i32_0 : i32, i32
  }
  func.func @transform_9(%arg0: i32) -> (i32, i32, i32) {
    %c0_i32 = arith.constant 0 : i32
    %c0_i32_0 = arith.constant 0 : i32
    %c0_i32_1 = arith.constant 0 : i32
    return %arg0, %c0_i32, %c0_i32_0 : i32, i32, i32
  }
}

module attributes {stable_mosaic.version = 11 : i64} {
  func.func @_conv_layer_kernel(%arg0: i32, %arg1: memref<1x16x128xf32, #tpu.memory_space<vmem>>, %arg2: memref<1152x128xbf16, #tpu.memory_space<vmem>>, %arg3: memref<1x128xf32, #tpu.memory_space<vmem>>, %arg4: memref<1x128xf32, #tpu.memory_space<vmem>>, %arg5: memref<1x128xf32, #tpu.memory_space<vmem>>, %arg6: memref<128x128xbf16, #tpu.memory_space<vmem>>, %arg7: memref<1x128xf32, #tpu.memory_space<vmem>>, %arg8: memref<1x128xf32, #tpu.memory_space<vmem>>, %arg9: memref<1x128xf32, #tpu.memory_space<vmem>>, %arg10: memref<1x16x128xf32, #tpu.memory_space<vmem>>, %arg11: memref<48x128xf32, #tpu.memory_space<vmem>>, %arg12: memref<16x1152xbf16, #tpu.memory_space<vmem>>) attributes {dimension_semantics = [#tpu.dimension_semantics<parallel>], iteration_bounds = array<i64: 2>, scalar_prefetch = 0 : i64, scratch_operands = 2 : i64, tpu.core_type = #tpu.core_type<tc>, window_params = [{transform_indices = @transform_0, window_bounds = array<i64: 1, 16, 128>}, {pipeline_mode = #tpu.pipeline_mode<synchronous>, transform_indices = @transform_1, window_bounds = array<i64: 1152, 128>}, {pipeline_mode = #tpu.pipeline_mode<synchronous>, transform_indices = @transform_2, window_bounds = array<i64: 1, 128>}, {pipeline_mode = #tpu.pipeline_mode<synchronous>, transform_indices = @transform_3, window_bounds = array<i64: 1, 128>}, {pipeline_mode = #tpu.pipeline_mode<synchronous>, transform_indices = @transform_4, window_bounds = array<i64: 1, 128>}, {pipeline_mode = #tpu.pipeline_mode<synchronous>, transform_indices = @transform_5, window_bounds = array<i64: 128, 128>}, {pipeline_mode = #tpu.pipeline_mode<synchronous>, transform_indices = @transform_6, window_bounds = array<i64: 1, 128>}, {pipeline_mode = #tpu.pipeline_mode<synchronous>, transform_indices = @transform_7, window_bounds = array<i64: 1, 128>}, {pipeline_mode = #tpu.pipeline_mode<synchronous>, transform_indices = @transform_8, window_bounds = array<i64: 1, 128>}, {transform_indices = @transform_9, window_bounds = array<i64: 1, 16, 128>}]} {
    %c0 = arith.constant 0 : index
    %c0_0 = arith.constant 0 : index
    %c0_1 = arith.constant 0 : index
    %0 = vector.load %arg1[%c0, %c0_0, %c0_1] : memref<1x16x128xf32, #tpu.memory_space<vmem>>, vector<1x16x128xf32>
    %1 = vector.shape_cast %0 : vector<1x16x128xf32> to vector<16x128xf32>
    %cst = arith.constant 0.000000e+00 : f32
    %2 = vector.broadcast %cst : f32 to vector<16x128xf32>
    %c0_2 = arith.constant 0 : index
    %c0_3 = arith.constant 0 : index
    %3 = vector.load %arg11[%c0_2, %c0_3] : memref<48x128xf32, #tpu.memory_space<vmem>>, vector<16x128xf32>
    tpu.vector_store %arg11[%c0_2, %c0_3], %2 {strides = array<i32>} : memref<48x128xf32, #tpu.memory_space<vmem>>, vector<16x128xf32>,
    %cst_4 = arith.constant 0.000000e+00 : f32
    %4 = vector.broadcast %cst_4 : f32 to vector<16x128xf32>
    %c32 = arith.constant 32 : index
    %c0_5 = arith.constant 0 : index
    %5 = vector.load %arg11[%c32, %c0_5] : memref<48x128xf32, #tpu.memory_space<vmem>>, vector<16x128xf32>
    tpu.vector_store %arg11[%c32, %c0_5], %4 {strides = array<i32>} : memref<48x128xf32, #tpu.memory_space<vmem>>, vector<16x128xf32>,
    %c16 = arith.constant 16 : index
    %c0_6 = arith.constant 0 : index
    %6 = vector.load %arg11[%c16, %c0_6] : memref<48x128xf32, #tpu.memory_space<vmem>>, vector<16x128xf32>
    tpu.vector_store %arg11[%c16, %c0_6], %1 {strides = array<i32>} : memref<48x128xf32, #tpu.memory_space<vmem>>, vector<16x128xf32>,
    %c0_7 = arith.constant 0 : index
    %c0_8 = arith.constant 0 : index
    %7 = vector.load %arg11[%c0_7, %c0_8] : memref<48x128xf32, #tpu.memory_space<vmem>>, vector<16x128xf32>
    %8 = arith.truncf %7 : vector<16x128xf32> to vector<16x128xbf16>
    %c0_9 = arith.constant 0 : index
    %c0_10 = arith.constant 0 : index
    %9 = vector.load %arg12[%c0_9, %c0_10] : memref<16x1152xbf16, #tpu.memory_space<vmem>>, vector<16x128xbf16>
    tpu.vector_store %arg12[%c0_9, %c0_10], %8 {strides = array<i32>} : memref<16x1152xbf16, #tpu.memory_space<vmem>>, vector<16x128xbf16>,
    %c4 = arith.constant 4 : index
    %c0_11 = arith.constant 0 : index
    %10 = vector.load %arg11[%c4, %c0_11] : memref<48x128xf32, #tpu.memory_space<vmem>>, vector<16x128xf32>
    %11 = arith.truncf %10 : vector<16x128xf32> to vector<16x128xbf16>
    %c0_12 = arith.constant 0 : index
    %c128 = arith.constant 128 : index
    %12 = vector.load %arg12[%c0_12, %c128] : memref<16x1152xbf16, #tpu.memory_space<vmem>>, vector<16x128xbf16>
    tpu.vector_store %arg12[%c0_12, %c128], %11 {strides = array<i32>} : memref<16x1152xbf16, #tpu.memory_space<vmem>>, vector<16x128xbf16>,
    %c8 = arith.constant 8 : index
    %c0_13 = arith.constant 0 : index
    %13 = vector.load %arg11[%c8, %c0_13] : memref<48x128xf32, #tpu.memory_space<vmem>>, vector<16x128xf32>
    %14 = arith.truncf %13 : vector<16x128xf32> to vector<16x128xbf16>
    %c0_14 = arith.constant 0 : index
    %c256 = arith.constant 256 : index
    %15 = vector.load %arg12[%c0_14, %c256] : memref<16x1152xbf16, #tpu.memory_space<vmem>>, vector<16x128xbf16>
    tpu.vector_store %arg12[%c0_14, %c256], %14 {strides = array<i32>} : memref<16x1152xbf16, #tpu.memory_space<vmem>>, vector<16x128xbf16>,
    %c12 = arith.constant 12 : index
    %c0_15 = arith.constant 0 : index
    %16 = vector.load %arg11[%c12, %c0_15] : memref<48x128xf32, #tpu.memory_space<vmem>>, vector<16x128xf32>
    %17 = arith.truncf %16 : vector<16x128xf32> to vector<16x128xbf16>
    %c0_16 = arith.constant 0 : index
    %c384 = arith.constant 384 : index
    %18 = vector.load %arg12[%c0_16, %c384] : memref<16x1152xbf16, #tpu.memory_space<vmem>>, vector<16x128xbf16>
    tpu.vector_store %arg12[%c0_16, %c384], %17 {strides = array<i32>} : memref<16x1152xbf16, #tpu.memory_space<vmem>>, vector<16x128xbf16>,
    %c16_17 = arith.constant 16 : index
    %c0_18 = arith.constant 0 : index
    %19 = vector.load %arg11[%c16_17, %c0_18] : memref<48x128xf32, #tpu.memory_space<vmem>>, vector<16x128xf32>
    %20 = arith.truncf %19 : vector<16x128xf32> to vector<16x128xbf16>
    %c0_19 = arith.constant 0 : index
    %c512 = arith.constant 512 : index
    %21 = vector.load %arg12[%c0_19, %c512] : memref<16x1152xbf16, #tpu.memory_space<vmem>>, vector<16x128xbf16>
    tpu.vector_store %arg12[%c0_19, %c512], %20 {strides = array<i32>} : memref<16x1152xbf16, #tpu.memory_space<vmem>>, vector<16x128xbf16>,
    %c20 = arith.constant 20 : index
    %c0_20 = arith.constant 0 : index
    %22 = vector.load %arg11[%c20, %c0_20] : memref<48x128xf32, #tpu.memory_space<vmem>>, vector<16x128xf32>
    %23 = arith.truncf %22 : vector<16x128xf32> to vector<16x128xbf16>
    %c0_21 = arith.constant 0 : index
    %c640 = arith.constant 640 : index
    %24 = vector.load %arg12[%c0_21, %c640] : memref<16x1152xbf16, #tpu.memory_space<vmem>>, vector<16x128xbf16>
    tpu.vector_store %arg12[%c0_21, %c640], %23 {strides = array<i32>} : memref<16x1152xbf16, #tpu.memory_space<vmem>>, vector<16x128xbf16>,
    %c24 = arith.constant 24 : index
    %c0_22 = arith.constant 0 : index
    %25 = vector.load %arg11[%c24, %c0_22] : memref<48x128xf32, #tpu.memory_space<vmem>>, vector<16x128xf32>
    %26 = arith.truncf %25 : vector<16x128xf32> to vector<16x128xbf16>
    %c0_23 = arith.constant 0 : index
    %c768 = arith.constant 768 : index
    %27 = vector.load %arg12[%c0_23, %c768] : memref<16x1152xbf16, #tpu.memory_space<vmem>>, vector<16x128xbf16>
    tpu.vector_store %arg12[%c0_23, %c768], %26 {strides = array<i32>} : memref<16x1152xbf16, #tpu.memory_space<vmem>>, vector<16x128xbf16>,
    %c28 = arith.constant 28 : index
    %c0_24 = arith.constant 0 : index
    %28 = vector.load %arg11[%c28, %c0_24] : memref<48x128xf32, #tpu.memory_space<vmem>>, vector<16x128xf32>
    %29 = arith.truncf %28 : vector<16x128xf32> to vector<16x128xbf16>
    %c0_25 = arith.constant 0 : index
    %c896 = arith.constant 896 : index
    %30 = vector.load %arg12[%c0_25, %c896] : memref<16x1152xbf16, #tpu.memory_space<vmem>>, vector<16x128xbf16>
    tpu.vector_store %arg12[%c0_25, %c896], %29 {strides = array<i32>} : memref<16x1152xbf16, #tpu.memory_space<vmem>>, vector<16x128xbf16>,
    %c32_26 = arith.constant 32 : index
    %c0_27 = arith.constant 0 : index
    %31 = vector.load %arg11[%c32_26, %c0_27] : memref<48x128xf32, #tpu.memory_space<vmem>>, vector<16x128xf32>
    %32 = arith.truncf %31 : vector<16x128xf32> to vector<16x128xbf16>
    %c0_28 = arith.constant 0 : index
    %c1024 = arith.constant 1024 : index
    %33 = vector.load %arg12[%c0_28, %c1024] : memref<16x1152xbf16, #tpu.memory_space<vmem>>, vector<16x128xbf16>
    tpu.vector_store %arg12[%c0_28, %c1024], %32 {strides = array<i32>} : memref<16x1152xbf16, #tpu.memory_space<vmem>>, vector<16x128xbf16>,
    %c0_29 = arith.constant 0 : index
    %c0_30 = arith.constant 0 : index
    %34 = vector.load %arg12[%c0_29, %c0_30] : memref<16x1152xbf16, #tpu.memory_space<vmem>>, vector<16x1152xbf16>
    %c0_31 = arith.constant 0 : index
    %c0_32 = arith.constant 0 : index
    %35 = vector.load %arg2[%c0_31, %c0_32] : memref<1152x128xbf16, #tpu.memory_space<vmem>>, vector<1152x128xbf16>
    %cst_33 = arith.constant dense<0.000000e+00> : vector<16x128xf32>
    %36 = tpu.matmul %34, %35, %cst_33 {dimension_numbers = #tpu.dot_dimension_numbers<[1], [0], [0], [1], [0, 0, 1, 1], [], []>} : vector<16x1152xbf16>, vector<1152x128xbf16>, vector<16x128xf32> -> vector<16x128xf32>
    %c0_34 = arith.constant 0 : index
    %c0_35 = arith.constant 0 : index
    %37 = vector.load %arg3[%c0_34, %c0_35] : memref<1x128xf32, #tpu.memory_space<vmem>>, vector<1x128xf32>
    %38 = vector.broadcast %37 : vector<1x128xf32> to vector<16x128xf32>
    %39 = arith.addf %36, %38 : vector<16x128xf32>
    %cst_36 = arith.constant 5.000000e-01 : f32
    %40 = vector.broadcast %cst_36 : f32 to vector<16x128xf32>
    %41 = arith.mulf %40, %39 : vector<16x128xf32>
    %cst_37 = arith.constant 0.707106769 : f32
    %42 = vector.broadcast %cst_37 : f32 to vector<16x128xf32>
    %43 = arith.mulf %39, %42 : vector<16x128xf32>
    %cst_38 = arith.constant 0.000000e+00 : f32
    %44 = vector.broadcast %cst_38 : f32 to vector<16x128xf32>
    %45 = arith.cmpf oge, %43, %44 : vector<16x128xf32>
    %cst_39 = arith.constant 1.000000e+00 : f32
    %cst_40 = arith.constant -1.000000e+00 : f32
    %46 = vector.broadcast %cst_39 : f32 to vector<16x128xf32>
    %47 = vector.broadcast %cst_40 : f32 to vector<16x128xf32>
    %48 = arith.select %45, %46, %47 : vector<16x128xi1>, vector<16x128xf32>
    %49 = math.absf %43 : vector<16x128xf32>
    %cst_41 = arith.constant 0.327591091 : f32
    %50 = vector.broadcast %cst_41 : f32 to vector<16x128xf32>
    %51 = arith.mulf %50, %49 : vector<16x128xf32>
    %cst_42 = arith.constant 1.000000e+00 : f32
    %52 = vector.broadcast %cst_42 : f32 to vector<16x128xf32>
    %53 = arith.addf %52, %51 : vector<16x128xf32>
    %54 = tpu.reciprocal %53 {approx = true} : vector<16x128xf32> -> vector<16x128xf32>
    %cst_43 = arith.constant 1.06140542 : f32
    %55 = vector.broadcast %cst_43 : f32 to vector<16x128xf32>
    %56 = arith.mulf %55, %54 : vector<16x128xf32>
    %cst_44 = arith.constant -1.45315206 : f32
    %57 = vector.broadcast %cst_44 : f32 to vector<16x128xf32>
    %58 = arith.addf %56, %57 : vector<16x128xf32>
    %59 = arith.mulf %58, %54 : vector<16x128xf32>
    %cst_45 = arith.constant 1.42141378 : f32
    %60 = vector.broadcast %cst_45 : f32 to vector<16x128xf32>
    %61 = arith.addf %59, %60 : vector<16x128xf32>
    %62 = arith.mulf %61, %54 : vector<16x128xf32>
    %cst_46 = arith.constant -0.284496725 : f32
    %63 = vector.broadcast %cst_46 : f32 to vector<16x128xf32>
    %64 = arith.addf %62, %63 : vector<16x128xf32>
    %65 = arith.mulf %64, %54 : vector<16x128xf32>
    %cst_47 = arith.constant 0.254829586 : f32
    %66 = vector.broadcast %cst_47 : f32 to vector<16x128xf32>
    %67 = arith.addf %65, %66 : vector<16x128xf32>
    %68 = arith.mulf %67, %54 : vector<16x128xf32>
    %cst_48 = arith.constant 0.000000e+00 : f32
    %69 = vector.broadcast %cst_48 : f32 to vector<16x128xf32>
    %70 = arith.subf %69, %49 : vector<16x128xf32>
    %71 = arith.mulf %70, %49 : vector<16x128xf32>
    %72 = math.exp %71 : vector<16x128xf32>
    %73 = arith.mulf %68, %72 : vector<16x128xf32>
    %cst_49 = arith.constant 1.000000e+00 : f32
    %74 = vector.broadcast %cst_49 : f32 to vector<16x128xf32>
    %75 = arith.subf %74, %73 : vector<16x128xf32>
    %76 = arith.mulf %48, %75 : vector<16x128xf32>
    %cst_50 = arith.constant 1.000000e+00 : f32
    %77 = vector.broadcast %cst_50 : f32 to vector<16x128xf32>
    %78 = arith.addf %77, %76 : vector<16x128xf32>
    %79 = arith.mulf %41, %78 : vector<16x128xf32>
    %c0_51 = arith.constant 0 : index
    %c0_52 = arith.constant 0 : index
    %80 = vector.load %arg4[%c0_51, %c0_52] : memref<1x128xf32, #tpu.memory_space<vmem>>, vector<1x128xf32>
    %c0_53 = arith.constant 0 : index
    %c0_54 = arith.constant 0 : index
    %81 = vector.load %arg5[%c0_53, %c0_54] : memref<1x128xf32, #tpu.memory_space<vmem>>, vector<1x128xf32>
    %cst_55 = arith.constant dense<0.000000e+00> : vector<16xf32>
    %82 = vector.multi_reduction <add>, %79, %cst_55 [1] : vector<16x128xf32> to vector<16xf32>
    %83 = vector.shape_cast %82 : vector<16xf32> to vector<16x1xf32>
    %cst_56 = arith.constant 1.280000e+02 : f32
    %84 = vector.broadcast %cst_56 : f32 to vector<16x1xf32>
    %85 = arith.divf %83, %84 : vector<16x1xf32>
    %86 = arith.mulf %79, %79 : vector<16x128xf32>
    %cst_57 = arith.constant dense<0.000000e+00> : vector<16xf32>
    %87 = vector.multi_reduction <add>, %86, %cst_57 [1] : vector<16x128xf32> to vector<16xf32>
    %88 = vector.shape_cast %87 : vector<16xf32> to vector<16x1xf32>
    %cst_58 = arith.constant 1.280000e+02 : f32
    %89 = vector.broadcast %cst_58 : f32 to vector<16x1xf32>
    %90 = arith.divf %88, %89 : vector<16x1xf32>
    %91 = arith.mulf %85, %85 : vector<16x1xf32>
    %92 = arith.subf %90, %91 : vector<16x1xf32>
    %cst_59 = arith.constant 0.000000e+00 : f32
    %93 = vector.broadcast %cst_59 : f32 to vector<16x1xf32>
    %94 = arith.maximumf %92, %93 : vector<16x1xf32>
    %95 = vector.broadcast %85 : vector<16x1xf32> to vector<16x128xf32>
    %96 = arith.subf %79, %95 : vector<16x128xf32>
    %cst_60 = arith.constant 9.99999974E-6 : f32
    %97 = vector.broadcast %cst_60 : f32 to vector<16x1xf32>
    %98 = arith.addf %94, %97 : vector<16x1xf32>
    %99 = math.rsqrt %98 : vector<16x1xf32>
    %100 = vector.broadcast %99 : vector<16x1xf32> to vector<16x128xf32>
    %101 = arith.mulf %96, %100 : vector<16x128xf32>
    %102 = vector.broadcast %80 : vector<1x128xf32> to vector<16x128xf32>
    %103 = arith.mulf %101, %102 : vector<16x128xf32>
    %104 = vector.broadcast %81 : vector<1x128xf32> to vector<16x128xf32>
    %105 = arith.addf %103, %104 : vector<16x128xf32>
    %106 = arith.addf %1, %105 : vector<16x128xf32>
    %107 = arith.truncf %106 : vector<16x128xf32> to vector<16x128xbf16>
    %c0_61 = arith.constant 0 : index
    %c0_62 = arith.constant 0 : index
    %108 = vector.load %arg6[%c0_61, %c0_62] : memref<128x128xbf16, #tpu.memory_space<vmem>>, vector<128x128xbf16>
    %cst_63 = arith.constant dense<0.000000e+00> : vector<16x128xf32>
    %109 = tpu.matmul %107, %108, %cst_63 {dimension_numbers = #tpu.dot_dimension_numbers<[1], [0], [0], [1], [0, 0, 1, 1], [], []>} : vector<16x128xbf16>, vector<128x128xbf16>, vector<16x128xf32> -> vector<16x128xf32>
    %c0_64 = arith.constant 0 : index
    %c0_65 = arith.constant 0 : index
    %110 = vector.load %arg7[%c0_64, %c0_65] : memref<1x128xf32, #tpu.memory_space<vmem>>, vector<1x128xf32>
    %111 = vector.broadcast %110 : vector<1x128xf32> to vector<16x128xf32>
    %112 = arith.addf %109, %111 : vector<16x128xf32>
    %cst_66 = arith.constant 5.000000e-01 : f32
    %113 = vector.broadcast %cst_66 : f32 to vector<16x128xf32>
    %114 = arith.mulf %113, %112 : vector<16x128xf32>
    %cst_67 = arith.constant 0.707106769 : f32
    %115 = vector.broadcast %cst_67 : f32 to vector<16x128xf32>
    %116 = arith.mulf %112, %115 : vector<16x128xf32>
    %cst_68 = arith.constant 0.000000e+00 : f32
    %117 = vector.broadcast %cst_68 : f32 to vector<16x128xf32>
    %118 = arith.cmpf oge, %116, %117 : vector<16x128xf32>
    %cst_69 = arith.constant 1.000000e+00 : f32
    %cst_70 = arith.constant -1.000000e+00 : f32
    %119 = vector.broadcast %cst_69 : f32 to vector<16x128xf32>
    %120 = vector.broadcast %cst_70 : f32 to vector<16x128xf32>
    %121 = arith.select %118, %119, %120 : vector<16x128xi1>, vector<16x128xf32>
    %122 = math.absf %116 : vector<16x128xf32>
    %cst_71 = arith.constant 0.327591091 : f32
    %123 = vector.broadcast %cst_71 : f32 to vector<16x128xf32>
    %124 = arith.mulf %123, %122 : vector<16x128xf32>
    %cst_72 = arith.constant 1.000000e+00 : f32
    %125 = vector.broadcast %cst_72 : f32 to vector<16x128xf32>
    %126 = arith.addf %125, %124 : vector<16x128xf32>
    %127 = tpu.reciprocal %126 {approx = true} : vector<16x128xf32> -> vector<16x128xf32>
    %cst_73 = arith.constant 1.06140542 : f32
    %128 = vector.broadcast %cst_73 : f32 to vector<16x128xf32>
    %129 = arith.mulf %128, %127 : vector<16x128xf32>
    %cst_74 = arith.constant -1.45315206 : f32
    %130 = vector.broadcast %cst_74 : f32 to vector<16x128xf32>
    %131 = arith.addf %129, %130 : vector<16x128xf32>
    %132 = arith.mulf %131, %127 : vector<16x128xf32>
    %cst_75 = arith.constant 1.42141378 : f32
    %133 = vector.broadcast %cst_75 : f32 to vector<16x128xf32>
    %134 = arith.addf %132, %133 : vector<16x128xf32>
    %135 = arith.mulf %134, %127 : vector<16x128xf32>
    %cst_76 = arith.constant -0.284496725 : f32
    %136 = vector.broadcast %cst_76 : f32 to vector<16x128xf32>
    %137 = arith.addf %135, %136 : vector<16x128xf32>
    %138 = arith.mulf %137, %127 : vector<16x128xf32>
    %cst_77 = arith.constant 0.254829586 : f32
    %139 = vector.broadcast %cst_77 : f32 to vector<16x128xf32>
    %140 = arith.addf %138, %139 : vector<16x128xf32>
    %141 = arith.mulf %140, %127 : vector<16x128xf32>
    %cst_78 = arith.constant 0.000000e+00 : f32
    %142 = vector.broadcast %cst_78 : f32 to vector<16x128xf32>
    %143 = arith.subf %142, %122 : vector<16x128xf32>
    %144 = arith.mulf %143, %122 : vector<16x128xf32>
    %145 = math.exp %144 : vector<16x128xf32>
    %146 = arith.mulf %141, %145 : vector<16x128xf32>
    %cst_79 = arith.constant 1.000000e+00 : f32
    %147 = vector.broadcast %cst_79 : f32 to vector<16x128xf32>
    %148 = arith.subf %147, %146 : vector<16x128xf32>
    %149 = arith.mulf %121, %148 : vector<16x128xf32>
    %cst_80 = arith.constant 1.000000e+00 : f32
    %150 = vector.broadcast %cst_80 : f32 to vector<16x128xf32>
    %151 = arith.addf %150, %149 : vector<16x128xf32>
    %152 = arith.mulf %114, %151 : vector<16x128xf32>
    %c0_81 = arith.constant 0 : index
    %c0_82 = arith.constant 0 : index
    %153 = vector.load %arg8[%c0_81, %c0_82] : memref<1x128xf32, #tpu.memory_space<vmem>>, vector<1x128xf32>
    %c0_83 = arith.constant 0 : index
    %c0_84 = arith.constant 0 : index
    %154 = vector.load %arg9[%c0_83, %c0_84] : memref<1x128xf32, #tpu.memory_space<vmem>>, vector<1x128xf32>
    %cst_85 = arith.constant dense<0.000000e+00> : vector<16xf32>
    %155 = vector.multi_reduction <add>, %152, %cst_85 [1] : vector<16x128xf32> to vector<16xf32>
    %156 = vector.shape_cast %155 : vector<16xf32> to vector<16x1xf32>
    %cst_86 = arith.constant 1.280000e+02 : f32
    %157 = vector.broadcast %cst_86 : f32 to vector<16x1xf32>
    %158 = arith.divf %156, %157 : vector<16x1xf32>
    %159 = arith.mulf %152, %152 : vector<16x128xf32>
    %cst_87 = arith.constant dense<0.000000e+00> : vector<16xf32>
    %160 = vector.multi_reduction <add>, %159, %cst_87 [1] : vector<16x128xf32> to vector<16xf32>
    %161 = vector.shape_cast %160 : vector<16xf32> to vector<16x1xf32>
    %cst_88 = arith.constant 1.280000e+02 : f32
    %162 = vector.broadcast %cst_88 : f32 to vector<16x1xf32>
    %163 = arith.divf %161, %162 : vector<16x1xf32>
    %164 = arith.mulf %158, %158 : vector<16x1xf32>
    %165 = arith.subf %163, %164 : vector<16x1xf32>
    %cst_89 = arith.constant 0.000000e+00 : f32
    %166 = vector.broadcast %cst_89 : f32 to vector<16x1xf32>
    %167 = arith.maximumf %165, %166 : vector<16x1xf32>
    %168 = vector.broadcast %158 : vector<16x1xf32> to vector<16x128xf32>
    %169 = arith.subf %152, %168 : vector<16x128xf32>
    %cst_90 = arith.constant 9.99999974E-6 : f32
    %170 = vector.broadcast %cst_90 : f32 to vector<16x1xf32>
    %171 = arith.addf %167, %170 : vector<16x1xf32>
    %172 = math.rsqrt %171 : vector<16x1xf32>
    %173 = vector.broadcast %172 : vector<16x1xf32> to vector<16x128xf32>
    %174 = arith.mulf %169, %173 : vector<16x128xf32>
    %175 = vector.broadcast %153 : vector<1x128xf32> to vector<16x128xf32>
    %176 = arith.mulf %174, %175 : vector<16x128xf32>
    %177 = vector.broadcast %154 : vector<1x128xf32> to vector<16x128xf32>
    %178 = arith.addf %176, %177 : vector<16x128xf32>
    %179 = arith.addf %106, %178 : vector<16x128xf32>
    %c0_91 = arith.constant 0 : index
    %c0_92 = arith.constant 0 : index
    %c0_93 = arith.constant 0 : index
    %180 = vector.load %arg10[%c0_91, %c0_92, %c0_93] : memref<1x16x128xf32, #tpu.memory_space<vmem>>, vector<1x16x128xf32>
    %181 = vector.shape_cast %180 : vector<1x16x128xf32> to vector<16x128xf32>
    %182 = vector.shape_cast %179 : vector<16x128xf32> to vector<1x16x128xf32>
    tpu.vector_store %arg10[%c0_91, %c0_92, %c0_93], %182 {strides = array<i32>} : memref<1x16x128xf32, #tpu.memory_space<vmem>>, vector<1x16x128xf32>,
    return
  }
  func.func @transform_0(%arg0: i32) -> (i32, i32, i32) {
    %c0_i32 = arith.constant 0 : i32
    %c0_i32_0 = arith.constant 0 : i32
    %c0_i32_1 = arith.constant 0 : i32
    return %arg0, %c0_i32, %c0_i32_0 : i32, i32, i32
  }
  func.func @transform_1(%arg0: i32) -> (i32, i32) {
    %c0_i32 = arith.constant 0 : i32
    %c0_i32_0 = arith.constant 0 : i32
    %c0_i32_1 = arith.constant 0 : i32
    return %c0_i32, %c0_i32_0 : i32, i32
  }
  func.func @transform_2(%arg0: i32) -> (i32, i32) {
    %c0_i32 = arith.constant 0 : i32
    %c0_i32_0 = arith.constant 0 : i32
    %c0_i32_1 = arith.constant 0 : i32
    return %c0_i32, %c0_i32_0 : i32, i32
  }
  func.func @transform_3(%arg0: i32) -> (i32, i32) {
    %c0_i32 = arith.constant 0 : i32
    %c0_i32_0 = arith.constant 0 : i32
    %c0_i32_1 = arith.constant 0 : i32
    return %c0_i32, %c0_i32_0 : i32, i32
  }
  func.func @transform_4(%arg0: i32) -> (i32, i32) {
    %c0_i32 = arith.constant 0 : i32
    %c0_i32_0 = arith.constant 0 : i32
    %c0_i32_1 = arith.constant 0 : i32
    return %c0_i32, %c0_i32_0 : i32, i32
  }
  func.func @transform_5(%arg0: i32) -> (i32, i32) {
    %c0_i32 = arith.constant 0 : i32
    %c0_i32_0 = arith.constant 0 : i32
    %c0_i32_1 = arith.constant 0 : i32
    return %c0_i32, %c0_i32_0 : i32, i32
  }
  func.func @transform_6(%arg0: i32) -> (i32, i32) {
    %c0_i32 = arith.constant 0 : i32
    %c0_i32_0 = arith.constant 0 : i32
    %c0_i32_1 = arith.constant 0 : i32
    return %c0_i32, %c0_i32_0 : i32, i32
  }
  func.func @transform_7(%arg0: i32) -> (i32, i32) {
    %c0_i32 = arith.constant 0 : i32
    %c0_i32_0 = arith.constant 0 : i32
    %c0_i32_1 = arith.constant 0 : i32
    return %c0_i32, %c0_i32_0 : i32, i32
  }
  func.func @transform_8(%arg0: i32) -> (i32, i32) {
    %c0_i32 = arith.constant 0 : i32
    %c0_i32_0 = arith.constant 0 : i32
    %c0_i32_1 = arith.constant 0 : i32
    return %c0_i32, %c0_i32_0 : i32, i32
  }
  func.func @transform_9(%arg0: i32) -> (i32, i32, i32) {
    %c0_i32 = arith.constant 0 : i32
    %c0_i32_0 = arith.constant 0 : i32
    %c0_i32_1 = arith.constant 0 : i32
    return %arg0, %c0_i32, %c0_i32_0 : i32, i32, i32
  }
}

module attributes {stable_mosaic.version = 11 : i64} {
  func.func @_head_kernel(%arg0: i32, %arg1: memref<2x16x128xf32, #tpu.memory_space<vmem>>, %arg2: memref<128x128xf32, #tpu.memory_space<vmem>>, %arg3: memref<1x128xf32, #tpu.memory_space<vmem>>, %arg4: memref<2x16x5xf32, #tpu.memory_space<vmem>>) attributes {dimension_semantics = [#tpu.dimension_semantics<parallel>], iteration_bounds = array<i64: 1>, scalar_prefetch = 0 : i64, scratch_operands = 0 : i64, tpu.core_type = #tpu.core_type<tc>, window_params = [{transform_indices = @transform_0, window_bounds = array<i64: 2, 16, 128>}, {pipeline_mode = #tpu.pipeline_mode<synchronous>, transform_indices = @transform_1, window_bounds = array<i64: 128, 128>}, {pipeline_mode = #tpu.pipeline_mode<synchronous>, transform_indices = @transform_2, window_bounds = array<i64: 1, 128>}, {transform_indices = @transform_3, window_bounds = array<i64: 2, 16, 5>}]} {
    %c0 = arith.constant 0 : index
    %c0_0 = arith.constant 0 : index
    %c0_1 = arith.constant 0 : index
    %0 = vector.load %arg1[%c0, %c0_0, %c0_1] : memref<2x16x128xf32, #tpu.memory_space<vmem>>, vector<2x16x128xf32>
    %1 = vector.shape_cast %0 : vector<2x16x128xf32> to vector<32x128xf32>
    %c0_2 = arith.constant 0 : index
    %c0_3 = arith.constant 0 : index
    %2 = vector.load %arg2[%c0_2, %c0_3] : memref<128x128xf32, #tpu.memory_space<vmem>>, vector<128x128xf32>
    %cst = arith.constant dense<0.000000e+00> : vector<32x128xf32>
    %3 = tpu.matmul %1, %2, %cst {dimension_numbers = #tpu.dot_dimension_numbers<[1], [0], [0], [1], [0, 0, 1, 1], [], []>} : vector<32x128xf32>, vector<128x128xf32>, vector<32x128xf32> -> vector<32x128xf32>
    %c0_4 = arith.constant 0 : index
    %c0_5 = arith.constant 0 : index
    %4 = vector.load %arg3[%c0_4, %c0_5] : memref<1x128xf32, #tpu.memory_space<vmem>>, vector<1x128xf32>
    %5 = vector.broadcast %4 : vector<1x128xf32> to vector<32x128xf32>
    %6 = arith.addf %3, %5 : vector<32x128xf32>
    %7 = vector.shape_cast %6 : vector<32x128xf32> to vector<2x16x128xf32>
    %cst_6 = arith.constant dense<0xFF800000> : vector<16x128xf32>
    %8 = vector.multi_reduction <maximumf>, %7, %cst_6 [0] : vector<2x16x128xf32> to vector<16x128xf32>
    %9 = vector.shape_cast %8 : vector<16x128xf32> to vector<1x16x128xf32>
    %10 = vector.broadcast %9 : vector<1x16x128xf32> to vector<2x16x128xf32>
    %11 = arith.subf %7, %10 : vector<2x16x128xf32>
    %12 = math.exp %11 : vector<2x16x128xf32>
    %cst_7 = arith.constant dense<0.000000e+00> : vector<16x128xf32>
    %13 = vector.multi_reduction <add>, %12, %cst_7 [0] : vector<2x16x128xf32> to vector<16x128xf32>
    %14 = vector.shape_cast %13 : vector<16x128xf32> to vector<1x16x128xf32>
    %15 = tpu.reciprocal %14 {approx = true} : vector<1x16x128xf32> -> vector<1x16x128xf32>
    %16 = vector.broadcast %15 : vector<1x16x128xf32> to vector<2x16x128xf32>
    %17 = arith.mulf %12, %16 : vector<2x16x128xf32>
    %18 = vector.extract_strided_slice %17 {offsets = [0, 0, 0], sizes = [2, 16, 5], strides = [1, 1, 1]} : vector<2x16x128xf32> to vector<2x16x5xf32>
    %c0_8 = arith.constant 0 : index
    %c0_9 = arith.constant 0 : index
    %c0_10 = arith.constant 0 : index
    %19 = vector.load %arg4[%c0_8, %c0_9, %c0_10] : memref<2x16x5xf32, #tpu.memory_space<vmem>>, vector<2x16x5xf32>
    tpu.vector_store %arg4[%c0_8, %c0_9, %c0_10], %18 {strides = array<i32>} : memref<2x16x5xf32, #tpu.memory_space<vmem>>, vector<2x16x5xf32>,
    return
  }
  func.func @transform_0(%arg0: i32) -> (i32, i32, i32) {
    %c0_i32 = arith.constant 0 : i32
    %c0_i32_0 = arith.constant 0 : i32
    %c0_i32_1 = arith.constant 0 : i32
    return %c0_i32, %arg0, %c0_i32_0 : i32, i32, i32
  }
  func.func @transform_1(%arg0: i32) -> (i32, i32) {
    %c0_i32 = arith.constant 0 : i32
    %c0_i32_0 = arith.constant 0 : i32
    %c0_i32_1 = arith.constant 0 : i32
    return %c0_i32, %c0_i32_0 : i32, i32
  }
  func.func @transform_2(%arg0: i32) -> (i32, i32) {
    %c0_i32 = arith.constant 0 : i32
    %c0_i32_0 = arith.constant 0 : i32
    %c0_i32_1 = arith.constant 0 : i32
    return %c0_i32, %c0_i32_0 : i32, i32
  }
  func.func @transform_3(%arg0: i32) -> (i32, i32, i32) {
    %c0_i32 = arith.constant 0 : i32
    %c0_i32_0 = arith.constant 0 : i32
    %c0_i32_1 = arith.constant 0 : i32
    return %c0_i32, %arg0, %c0_i32_0 : i32, i32, i32
  }
}

</mosaic_0001>

<bundles_post_ra>
// kernel: gpn_forward.7
= control target key start
LH: loop header
LB: loop body
LE: loop exit
PB: predicated region body
PF: predicated region fallthrough
CT: control target
= control target key end

     0   :  { %vm148_vm0 = vcmask 39936   ;;  %s371_s1 = inlined_call_operand.vmem [shape: f32[128,128], index: 1, kind: input, shape index: {}]   ;;  %s372_s0 = inlined_call_operand.vmem [shape: f32[2,16,128], index: 0, kind: input, shape index: {}]   ;;  %s373_s2 = inlined_call_operand.vmem [shape: f32[1,128], index: 2, kind: input, shape index: {}]   ;;  %s374_s3 = inlined_call_operand.vmem [shape: f32[2,16,5], index: 3, kind: output, shape index: {}]  }
   0x1   :  { %v18_v0 = vld [vmem:[%s371_s1] sm:$0xff]  ;;  %v19_v1 = vld [vmem:[%s371_s1 + $0x8] sm:$0xff]  ;;  %v20_v2 = vld [vmem:[%s371_s1 + $0x10] sm:$0xff] }
   0x2   :  { %v216_v3 = vpack.c.bf16 %v19_v1, %v18_v0  ;;  %v21_v4 = vld [vmem:[%s371_s1 + $0x18] sm:$0xff]  ;;  %v22_v6 = vld [vmem:[%s371_s1 + $0x20] sm:$0xff]  ;;  %v23_v7 = vld [vmem:[%s371_s1 + $0x28] sm:$0xff] }
   0x3   :  { %v220_v5 = vpack.c.bf16 %v21_v4, %v20_v2  ;;  %v224_v8 = vpack.c.bf16 %v23_v7, %v22_v6  ;;  %v14_v9 = vld [vmem:[%s372_s0] sm:$0xff]  ;;  %v16_v10 = vld [vmem:[%s372_s0 + $0x10] sm:$0xff]  ;;  %v25_v12 = vld [vmem:[%s371_s1 + $0x38] sm:$0xff] }
   0x4   :  { %217 = vmatprep.subr.bf16.mxu0 %v216_v3  ;;  %248 = vmatprep.subr.bf16.mxu1 %v216_v3  ;;  %v24_v11 = vld [vmem:[%s371_s1 + $0x30] sm:$0xff]  ;;  %v26_v14 = vld [vmem:[%s371_s1 + $0x40] sm:$0xff]  ;;  %v27_v15 = vld [vmem:[%s371_s1 + $0x48] sm:$0xff] }
   0x5   :  { %219 = vmatpush3.bf16.msra.mxu0 %v216_v3  ;;  %256 = vmatpush3.bf16.msra.mxu1 %v216_v3  ;;  %v228_v13 = vpack.c.bf16 %v25_v12, %v24_v11  ;;  %v232_v16 = vpack.c.bf16 %v27_v15, %v26_v14  ;;  %v28_v17 = vld [vmem:[%s371_s1 + $0x50] sm:$0xff]  ;;  %v29_v18 = vld [vmem:[%s371_s1 + $0x58] sm:$0xff]  ;;  %v30_v20 = vld [vmem:[%s371_s1 + $0x60] sm:$0xff] }
   0x6   :  { %221 = vmatprep.subr.bf16.mxu0 %v220_v5  ;;  %249 = vmatprep.subr.bf16.mxu1 %v220_v5  ;;  %v236_v19 = vpack.c.bf16 %v29_v18, %v28_v17  ;;  %v31_v21 = vld [vmem:[%s371_s1 + $0x68] sm:$0xff]  ;;  %v32_v23 = vld [vmem:[%s371_s1 + $0x70] sm:$0xff]  ;;  %v33_v24 = vld [vmem:[%s371_s1 + $0x78] sm:$0xff] }
   0x7   :  { %210 = vmatprep.mubr.f32.mxu0 %v14_v9  ;;  %213 = vmatprep.mubr.f32.mxu1 %v16_v10  ;;  %v240_v22 = vpack.c.bf16 %v31_v21, %v30_v20  ;;  %v244_v25 = vpack.c.bf16 %v33_v24, %v32_v23  ;;  %v15_v26 = vld [vmem:[%s372_s0 + $0x8] sm:$0xff]  ;;  %v17_v27 = vld [vmem:[%s372_s0 + $0x18] sm:$0xff]  ;;  %v157_v28 = vld [vmem:[%s373_s2] ss:$0 sm:$0xff] }
   0x9   :  { %223 = vmatpush3.bf16.msra.mxu0 %v220_v5  ;;  %257 = vmatpush3.bf16.msra.mxu1 %v220_v5 }
   0xa   :  { %225 = vmatprep.subr.bf16.mxu0 %v224_v8  ;;  %250 = vmatprep.subr.bf16.mxu1 %v224_v8 }
   0xd   :  { %227 = vmatpush3.bf16.msra.mxu0 %v224_v8  ;;  %258 = vmatpush3.bf16.msra.mxu1 %v224_v8 }
   0xe   :  { %229 = vmatprep.subr.bf16.mxu0 %v228_v13  ;;  %251 = vmatprep.subr.bf16.mxu1 %v228_v13 }
  0x11   :  { %231 = vmatpush3.bf16.msra.mxu0 %v228_v13  ;;  %259 = vmatpush3.bf16.msra.mxu1 %v228_v13 }
  0x12   :  { %233 = vmatprep.subr.bf16.mxu0 %v232_v16  ;;  %252 = vmatprep.subr.bf16.mxu1 %v232_v16 }
  0x15   :  { %235 = vmatpush3.bf16.msra.mxu0 %v232_v16  ;;  %260 = vmatpush3.bf16.msra.mxu1 %v232_v16 }
  0x16   :  { %237 = vmatprep.subr.bf16.mxu0 %v236_v19  ;;  %253 = vmatprep.subr.bf16.mxu1 %v236_v19 }
  0x19   :  { %239 = vmatpush3.bf16.msra.mxu0 %v236_v19  ;;  %261 = vmatpush3.bf16.msra.mxu1 %v236_v19 }
  0x1a   :  { %241 = vmatprep.subr.bf16.mxu0 %v240_v22  ;;  %254 = vmatprep.subr.bf16.mxu1 %v240_v22 }
  0x1d   :  { %243 = vmatpush3.bf16.msra.mxu0 %v240_v22  ;;  %262 = vmatpush3.bf16.msra.mxu1 %v240_v22 }
  0x1e   :  { %245 = vmatprep.subr.bf16.mxu0 %v244_v25  ;;  %255 = vmatprep.subr.bf16.mxu1 %v244_v25 }
  0x21   :  { %247 = vmatpush3.bf16.msra.mxu0 %v244_v25  ;;  %263 = vmatpush3.bf16.msra.mxu1 %v244_v25 }
  0x24   :  { %211 = vmatmul.mubr.f32.vlgmr.msra.gmra.mrb[0].mxu0 %v15_v26  ;;  %214 = vmatmul.mubr.f32.vlgmr.msra.gmra.mrb[0].mxu1 %v17_v27 }
  0xf7   :  { %v212_v29 = vpop.f32.mrb[0].mxu0  ;;  %v215_v30 = vpop.f32.mrb[0].mxu1 }
  0xf8   :  { %v113_v31 = vadd.f32 %v212_v29, %v157_v28  ;;  %v123_v32 = vadd.f32 %v215_v30, %v157_v28  ;;  %v107_v33 = vpop.f32.mrb[1].mxu0  ;;  %v117_v34 = vpop.f32.mrb[1].mxu1 }
  0xf9   :  { %v108_v35 = vadd.f32 %v157_v28, %v107_v33  ;;  %v118_v36 = vadd.f32 %v157_v28, %v117_v34 }
  0xfa   :  { %v127_v37 = vmax.f32 %v113_v31, %v123_v32 }
  0xfb   :  { %v126_v38 = vmax.f32 %v108_v35, %v118_v36 }
  0xfc   :  { %v129_v39 = vsub.f32 %v113_v31, %v127_v37  ;;  %v131_v40 = vsub.f32 %v123_v32, %v127_v37 }
  0xfd   :  { %v128_v41 = vsub.f32 %v108_v35, %v126_v38  ;;  %v130_v42 = vsub.f32 %v118_v36, %v126_v38 }
  0xfe   :  { %v134_v43 = vmul.f32 1.442695, %v129_v39  ;;  %v138_v44 = vmul.f32 1.442695, %v131_v40 }
  0xff   :  { %v132_v45 = vmul.f32 1.442695, %v128_v41  ;;  %v136_v46 = vmul.f32 1.442695, %v130_v42 }
 0x100   :  { %264 = vpow2.f32 %v134_v43 }
 0x101   :  { %266 = vpow2.f32 %v138_v44 }
 0x102   :  { %268 = vpow2.f32 %v132_v45 }
 0x103   :  { %270 = vpow2.f32 %v136_v46 }
 0x10a   :  { %v265_v47 = vpop.eup %264 }
 0x10b   :  { %v267_v48 = vpop.eup %266 }
 0x10c   :  { %v269_v49 = vpop.eup %268  ;;  %v141_v50 = vadd.f32 %v267_v48, %v265_v47 }
 0x10d   :  { %v271_v51 = vpop.eup %270 }
 0x10e   :  { %272 = vrcp.f32 %v141_v50  ;;  %v140_v52 = vadd.f32 %v271_v51, %v269_v49 }
 0x110   :  { %274 = vrcp.f32 %v140_v52 }
 0x118   :  { %v273_v53 = vpop.eup %272 }
 0x119   :  { %v145_v54 = vmul.f32 %v273_v53, %v265_v47  ;;  %v147_v55 = vmul.f32 %v273_v53, %v267_v48 }
 0x11a   :  { %v275_v56 = vpop.eup %274 }
 0x11b   :  { %150 = vst.msk [vmem:[%s374_s3 + $0x8] sm:$0xff] %vm148_vm0, %v145_v54  ;;  %152 = vst.msk [vmem:[%s374_s3 + $0x18] sm:$0xff] %vm148_vm0, %v147_v55  ;;  %v144_v57 = vmul.f32 %v275_v56, %v269_v49  ;;  %v146_v58 = vmul.f32 %v275_v56, %v271_v51 }
 0x11d   :  { %149 = vst.msk [vmem:[%s374_s3] sm:$0xff] %vm148_vm0, %v144_v57  ;;  %151 = vst.msk [vmem:[%s374_s3 + $0x10] sm:$0xff] %vm148_vm0, %v146_v58 }

// kernel: gpn_forward.6
= control target key start
LH: loop header
LB: loop body
LE: loop exit
PB: predicated region body
PF: predicated region fallthrough
CT: control target
= control target key end

     0   :  { %s3118_s0 = inlined_call_operand.hbm [shape: f32[2,16,128], index: 0, kind: input, shape index: {}, may-alias: {0,9}]   ;;  %s3119_s1 = inlined_call_operand.hbm [shape: bf16[1152,128], index: 1, kind: input, shape index: {}]   ;;  %s3120_s2 = inlined_call_operand.hbm [shape: f32[1,128], index: 2, kind: input, shape index: {}]   ;;  %s3121_s3 = inlined_call_operand.hbm [shape: f32[1,128], index: 3, kind: input, shape index: {}]   ;;  %s3122_s4 = inlined_call_operand.hbm [shape: f32[1,128], index: 4, kind: input, shape index: {}]   ;;  %s3123_s5 = inlined_call_operand.hbm [shape: bf16[128,128], index: 5, kind: input, shape index: {}]   ;;  %s3124_s6 = inlined_call_operand.hbm [shape: f32[1,128], index: 6, kind: input, shape index: {}]   ;;  %s3125_s7 = inlined_call_operand.hbm [shape: f32[1,128], index: 7, kind: input, shape index: {}]   ;;  %s3126_s8 = inlined_call_operand.hbm [shape: f32[1,128], index: 8, kind: input, shape index: {}]   ;;  %s3127_s9 = inlined_call_operand.hbm [shape: f32[2,16,128], index: 9, kind: output, shape index: {}, may-alias: {0,9}]  }
   0x1   :  { %3132 = sst [smem:[#allocation26_spill]] %s3119_s1 }
   0x2   :  { %3133 = sst [smem:[#allocation27_spill]] %s3127_s9 }
   0x3   :  { %14 = vsyncpa [#allocation5], 0 }
   0x4   :  { %16 = vsyncpa [#allocation5 + $0x1], 0 }
   0x5   :  { %17 = vsyncpa [#allocation8], 0 }
   0x6   :  { %18 = vsyncpa [#allocation11], 0 }
   0x7   :  { %19 = vsyncpa [#allocation14], 0 }
   0x8   :  { %20 = vsyncpa [#allocation17], 0 }
   0x9   :  { %21 = vsyncpa [#allocation6], 0 }
   0xa   :  { %23 = vsyncpa [#allocation6 + $0x1], 0  ;;  %s2688_s30 = smov 0   ;;  %s2690_s10 = smov 0  }
   0xb   :  { %s2692_s11 = smov 0   ;;  %s2694_s12 = smov 0  }
   0xc LB: > { %s2618_s13 = smov [#allocation7]   ;;  %s2709_s15 = sadd.s32 4294967295, %s2616_s12   ;;  %s2616_s12 = sphi %s2694_s12, %s3160_s12   ;;  %s2612_s11 = sphi %s2692_s11, %s3159_s11   ;;  %s2608_s10 = sphi %s2690_s10, %s3158_s10   ;;  %s2604_s30 = sphi %s2688_s30, %s3157_s30  }
   0xd   : > { %s266_s14 = sshll.u32 %s2618_s13, 4  ;;  %p1777_p0 = scmp.ge.s32.totalorder %s2616_s12, 1  ;;  %s2714_s14 = int_to_ptr.vmem [resolvable:$true] %s266_s14 }
   0xe   : > { %p3129_p1 = scmp.eq.s32.totalorder %s2709_s15, 0  ;;  %p254_p2 = scmp.lt.s32.totalorder %s2616_s12, 3 }
   0xf   : > { %s2619_s17 = smov [#allocation10]   ;;  %s2620_s20 = smov [#allocation13]  }
  0x10   : > { %p2716_p3 = pnand %p1777_p0, %p254_p2  ;;  %s291_s18 = sshll.u32 %s2619_s17, 4  ;;  %s2729_s18 = int_to_ptr.vmem [resolvable:$true] %s291_s18 }
  0x11   : > { %s312_s21 = sshll.u32 %s2620_s20, 4  ;;  %s3136_s1 = sld [smem:[#allocation26_spill]]  ;;  %s2731_s21 = int_to_ptr.vmem [resolvable:$true] %s312_s21 }
  0x12   : > { %s3134_s16 = scalar_select %p2716_p3, 1, 0 }
  0x13   : > { %p2076_p5 = pneg %p2716_p3 }
  0x15   : > { %p2725_p6 = pnand %p2076_p5, %p3129_p1 }
  0x17   : > { %s2280_s24 = scalar_lea.hbm %s3136_s1, 9216  ;;  %p2741_p8 = pneg %p2725_p6 }
  0x18   : > { %p2281_p7 = scmp.ne.s32.totalorder %s3136_s1, %s2280_s24  ;;  %p2287_p11 = scmp.lt.u32.totalorder %s2280_s24, %s3136_s1 }
  0x1a   : > { %p2283_p9 = pnand %p2741_p8, %p2281_p7 }
  0x1c   : > { %p2284_p10 = pneg %p2283_p9 }
  0x1e   : > { %p2289_p12 = pnand %p2287_p11, %p2284_p10 }
  0x20   : > { %2292 = shalt.err (!%p2289_p12)
}
  0x21   : > { %s2293_s13 = scalar_lea.vmem %s2714_s14, 9216  ;;  %p2301_p5 = scmp.lt.s32.totalorder %s2714_s14, %s2714_s14 }
  0x22   : > { %p2294_p13 = scmp.ne.s32.totalorder %s2714_s14, %s2293_s13  ;;  %p2302_p4 = scmp.lt.s32.totalorder %s2293_s13, %s2293_s13 }
  0x24   : > { %p2296_p0 = pnand %p2294_p13, %p2741_p8  ;;  %p2303_p7 = por %p2302_p4, %p2301_p5 }
  0x26   : > { %p2297_p2 = pneg %p2296_p0 }
  0x28   : > { %p2304_p9 = pnand %p2303_p7, %p2297_p2 }
  0x2a   : > { %2307 = shalt.err (!%p2304_p9)
}
  0x2b   : > { %s2621_s17 = smov 64   ;;  %s2622_s20 = smov 4  }
  0x2c   : > { %2079 = dma.hbm_to_vmem [thread:$0]  (!%p2725_p6), %s3136_s1, 9216, %s2714_s14, [#allocation8], %s2621_s17, %s2621_s17, %s2622_s20  }
  0x2d   : > { %s2308_s26 = scalar_lea.hbm %s3121_s3, 16 }
  0x2e   : > { %p2309_p4 = scmp.ne.s32.totalorder %s3121_s3, %s2308_s26  ;;  %p2315_p12 = scmp.lt.u32.totalorder %s2308_s26, %s3121_s3 }
  0x30   : > { %p2311_p10 = pnand %p2309_p4, %p2741_p8 }
  0x32   : > { %p2312_p11 = pneg %p2311_p10 }
  0x34   : > { %p2317_p13 = pnand %p2315_p12, %p2312_p11 }
  0x36   : > { %2320 = shalt.err (!%p2317_p13)
}
  0x37   : > { %s2321_s14 = scalar_lea.vmem %s2729_s18, 16  ;;  %s2328_s22 = scalar_lea.vmem %s2729_s18, 32 }
  0x38   : > { %p2322_p0 = scmp.ne.s32.totalorder %s2729_s18, %s2321_s14  ;;  %p2329_p7 = scmp.lt.s32.totalorder %s2729_s18, %s2729_s18 }
  0x39   : > { %p2330_p9 = scmp.lt.s32.totalorder %s2328_s22, %s2321_s14 }
  0x3a   : > { %p2324_p2 = pnand %p2322_p0, %p2741_p8 }
  0x3b   : > { %p2331_p4 = por %p2330_p9, %p2329_p7 }
  0x3c   : > { %p2325_p5 = pneg %p2324_p2 }
  0x3e   : > { %p2332_p10 = pnand %p2331_p4, %p2325_p5 }
  0x40   : > { %2335 = shalt.err (!%p2332_p10)
}
  0x41   : > { %2085 = dma.hbm_to_vmem [thread:$0]  (!%p2725_p6), %s3121_s3, 16, %s2729_s18, [#allocation11]  }
  0x42   : > { %s2336_s26 = scalar_lea.hbm %s3123_s5, 1024 }
  0x43   : > { %p2337_p11 = scmp.ne.s32.totalorder %s3123_s5, %s2336_s26  ;;  %p2343_p0 = scmp.lt.u32.totalorder %s2336_s26, %s3123_s5 }
  0x45   : > { %p2339_p12 = pnand %p2337_p11, %p2741_p8 }
  0x47   : > { %p2340_p13 = pneg %p2339_p12 }
  0x49   : > { %p2345_p2 = pnand %p2343_p0, %p2340_p13 }
  0x4b   : > { %2348 = shalt.err (!%p2345_p2)
}
  0x4c   : > { %s2349_s18 = scalar_lea.vmem %s2731_s21, 1024  ;;  %p2357_p4 = scmp.lt.s32.totalorder %s2731_s21, %s2731_s21 }
  0x4d   : > { %p2350_p5 = scmp.ne.s32.totalorder %s2731_s21, %s2349_s18  ;;  %p2358_p10 = scmp.lt.s32.totalorder %s2349_s18, %s2349_s18 }
  0x4f   : > { %p2352_p7 = pnand %p2350_p5, %p2741_p8  ;;  %p2359_p11 = por %p2358_p10, %p2357_p4 }
  0x51   : > { %p2353_p9 = pneg %p2352_p7 }
  0x53   : > { %p2360_p12 = pnand %p2359_p11, %p2353_p9 }
  0x55   : > { %2363 = shalt.err (!%p2360_p12)
}
  0x56   : > { %2091 = dma.hbm_to_vmem [thread:$0]  (!%p2725_p6), %s3123_s5, 1024, %s2731_s21, [#allocation14], %s2621_s17, %s2621_s17, %s2622_s20  }
  0x57   : > { %s2623_s23 = smov [#allocation16]   ;;  %s2624_s25 = smov [#allocation9]  }
  0x58   : > { %s337_s24 = sshll.u32 %s2623_s23, 4  ;;  %s280_s26 = sshll.u32 %s2624_s25, 4  ;;  %s338_s24 = int_to_ptr.vmem [resolvable:$true] %s337_s24  ;;  %s281_s26 = int_to_ptr.vmem [resolvable:$true] %s280_s26 }
  0x59   : > { %s2364_s13 = scalar_lea.hbm %s3125_s7, 16 }
  0x5a   : > { %p2365_p13 = scmp.ne.s32.totalorder %s3125_s7, %s2364_s13  ;;  %p2371_p5 = scmp.lt.u32.totalorder %s2364_s13, %s3125_s7 }
  0x5c   : > { %p2367_p0 = pnand %p2365_p13, %p2741_p8 }
  0x5e   : > { %p2368_p2 = pneg %p2367_p0 }
  0x60   : > { %p2373_p7 = pnand %p2371_p5, %p2368_p2 }
  0x62   : > { %2376 = shalt.err (!%p2373_p7)
}
  0x63   : > { %s2377_s21 = scalar_lea.vmem %s338_s24, 16  ;;  %s2384_s17 = scalar_lea.vmem %s338_s24, 32 }
  0x64   : > { %p2378_p9 = scmp.ne.s32.totalorder %s338_s24, %s2377_s21  ;;  %p2385_p11 = scmp.lt.s32.totalorder %s338_s24, %s338_s24 }
  0x65   : > { %p2386_p12 = scmp.lt.s32.totalorder %s2384_s17, %s2377_s21 }
  0x66   : > { %p2380_p4 = pnand %p2378_p9, %p2741_p8 }
  0x67   : > { %p2387_p1 = por %p2386_p12, %p2385_p11 }
  0x68   : > { %p2381_p10 = pneg %p2380_p4 }
  0x6a   : > { %p2388_p3 = pnand %p2387_p1, %p2381_p10 }
  0x6c   : > { %2391 = shalt.err (!%p2388_p3)
}
  0x6d   : > { %2097 = dma.hbm_to_vmem [thread:$0]  (!%p2725_p6), %s3125_s7, 16, %s338_s24, [#allocation17]  }
  0x6e   : > { %s2392_s25 = scalar_lea.hbm %s3120_s2, 16 }
  0x6f   : > { %p2393_p13 = scmp.ne.s32.totalorder %s3120_s2, %s2392_s25  ;;  %p2399_p3 = scmp.lt.u32.totalorder %s2392_s25, %s3120_s2 }
  0x71   : > { %p2395_p0 = pnand %p2393_p13, %p2741_p8 }
  0x73   : > { %p2396_p1 = pneg %p2395_p0 }
  0x75   : > { %p2401_p2 = pnand %p2399_p3, %p2396_p1 }
  0x77   : > { %2404 = shalt.err (!%p2401_p2)
}
  0x78   : > { %s2405_s18 = scalar_lea.vmem %s281_s26, 16  ;;  %s2412_s24 = scalar_lea.vmem %s281_s26, 32 }
  0x79   : > { %p2406_p5 = scmp.ne.s32.totalorder %s281_s26, %s2405_s18  ;;  %p2413_p4 = scmp.lt.s32.totalorder %s281_s26, %s281_s26 }
  0x7a   : > { %p2414_p10 = scmp.lt.s32.totalorder %s2412_s24, %s2405_s18 }
  0x7b   : > { %p2408_p7 = pnand %p2406_p5, %p2741_p8 }
  0x7c   : > { %p2415_p11 = por %p2414_p10, %p2413_p4 }
  0x7d   : > { %p2409_p9 = pneg %p2408_p7 }
  0x7f   : > { %p2416_p12 = pnand %p2415_p11, %p2409_p9 }
  0x81   : > { %2419 = shalt.err (!%p2416_p12)
}
  0x82   : > { %2082 = dma.hbm_to_vmem [thread:$0]  (!%p2725_p6), %s3120_s2, 16, %s281_s26, [#allocation8]  }
  0x83   : > { %s2625_s17 = smov [#allocation12]   ;;  %s2626_s9 = smov [#allocation15]  }
  0x84   : > { %s302_s20 = sshll.u32 %s2625_s17, 4  ;;  %s326_s1 = sshll.u32 %s2626_s9, 4  ;;  %s303_s20 = int_to_ptr.vmem [resolvable:$true] %s302_s20  ;;  %s327_s1 = int_to_ptr.vmem [resolvable:$true] %s326_s1 }
  0x85   : > { %s2420_s28 = scalar_lea.hbm %s3122_s4, 16 }
  0x86   : > { %p2421_p13 = scmp.ne.s32.totalorder %s3122_s4, %s2420_s28  ;;  %p2427_p3 = scmp.lt.u32.totalorder %s2420_s28, %s3122_s4 }
  0x88   : > { %p2423_p0 = pnand %p2421_p13, %p2741_p8 }
  0x8a   : > { %p2424_p1 = pneg %p2423_p0 }
  0x8c   : > { %p2429_p2 = pnand %p2427_p3, %p2424_p1 }
  0x8e   : > { %2432 = shalt.err (!%p2429_p2)
}
  0x8f   : > { %s2433_s26 = scalar_lea.vmem %s303_s20, 16  ;;  %s2440_s24 = scalar_lea.vmem %s303_s20, 32 }
  0x90   : > { %p2434_p5 = scmp.ne.s32.totalorder %s303_s20, %s2433_s26  ;;  %p2441_p4 = scmp.lt.s32.totalorder %s303_s20, %s303_s20 }
  0x91   : > { %p2442_p10 = scmp.lt.s32.totalorder %s2440_s24, %s2433_s26 }
  0x92   : > { %p2436_p7 = pnand %p2434_p5, %p2741_p8 }
  0x93   : > { %p2443_p11 = por %p2442_p10, %p2441_p4 }
  0x94   : > { %p2437_p9 = pneg %p2436_p7 }
  0x96   : > { %p2444_p12 = pnand %p2443_p11, %p2437_p9 }
  0x98   : > { %2447 = shalt.err (!%p2444_p12)
}
  0x99   : > { %2088 = dma.hbm_to_vmem [thread:$0]  (!%p2725_p6), %s3122_s4, 16, %s303_s20, [#allocation11]  }
  0x9a   : > { %s2448_s23 = scalar_lea.hbm %s3124_s6, 16 }
  0x9b   : > { %p2449_p13 = scmp.ne.s32.totalorder %s3124_s6, %s2448_s23  ;;  %p2455_p3 = scmp.lt.u32.totalorder %s2448_s23, %s3124_s6 }
  0x9d   : > { %p2451_p0 = pnand %p2449_p13, %p2741_p8 }
  0x9f   : > { %p2452_p1 = pneg %p2451_p0 }
  0xa1   : > { %p2457_p2 = pnand %p2455_p3, %p2452_p1 }
  0xa3   : > { %2460 = shalt.err (!%p2457_p2)
}
  0xa4   : > { %s2461_s14 = scalar_lea.vmem %s327_s1, 16  ;;  %s2468_s20 = scalar_lea.vmem %s327_s1, 32 }
  0xa5   : > { %p2462_p5 = scmp.ne.s32.totalorder %s327_s1, %s2461_s14  ;;  %p2469_p4 = scmp.lt.s32.totalorder %s327_s1, %s327_s1 }
  0xa6   : > { %p2470_p10 = scmp.lt.s32.totalorder %s2468_s20, %s2461_s14 }
  0xa7   : > { %p2464_p7 = pnand %p2462_p5, %p2741_p8 }
  0xa8   : > { %p2471_p11 = por %p2470_p10, %p2469_p4 }
  0xa9   : > { %p2465_p9 = pneg %p2464_p7 }
  0xab   : > { %p2472_p12 = pnand %p2471_p11, %p2465_p9 }
  0xad   : > { %2475 = shalt.err (!%p2472_p12)
}
  0xae   : > { %2094 = dma.hbm_to_vmem [thread:$0]  (!%p2725_p6), %s3124_s6, 16, %s327_s1, [#allocation14]  }
  0xaf   : > { %s2627_s24 = smov [#allocation18]   ;;  %s2476_s9 = scalar_lea.hbm %s3126_s8, 16 }
  0xb0   : > { %s348_s22 = sshll.u32 %s2627_s24, 4  ;;  %p2477_p13 = scmp.ne.s32.totalorder %s3126_s8, %s2476_s9  ;;  %s349_s22 = int_to_ptr.vmem [resolvable:$true] %s348_s22 }
  0xb1   : > { %p2483_p3 = scmp.lt.u32.totalorder %s2476_s9, %s3126_s8 }
  0xb2   : > { %p2479_p0 = pnand %p2477_p13, %p2741_p8 }
  0xb4   : > { %p2480_p1 = pneg %p2479_p0 }
  0xb6   : > { %p2485_p2 = pnand %p2483_p3, %p2480_p1 }
  0xb8   : > { %2488 = shalt.err (!%p2485_p2)
}
  0xb9   : > { %s2489_s1 = scalar_lea.vmem %s349_s22, 16  ;;  %s2496_s13 = scalar_lea.vmem %s349_s22, 32 }
  0xba   : > { %p2490_p5 = scmp.ne.s32.totalorder %s349_s22, %s2489_s1  ;;  %p2497_p4 = scmp.lt.s32.totalorder %s349_s22, %s349_s22 }
  0xbb   : > { %p2498_p10 = scmp.lt.s32.totalorder %s2496_s13, %s2489_s1 }
  0xbc   : > { %p2492_p7 = pnand %p2490_p5, %p2741_p8 }
  0xbd   : > { %p2499_p11 = por %p2498_p10, %p2497_p4 }
  0xbe   : > { %p2493_p9 = pneg %p2492_p7 }
  0xc0   : > { %p2500_p12 = pnand %p2499_p11, %p2493_p9 }
  0xc2   : > { %2503 = shalt.err (!%p2500_p12)
}
  0xc3   : > { %2100 = dma.hbm_to_vmem [thread:$0]  (!%p2725_p6), %s3126_s8, 16, %s349_s22, [#allocation17]  }
  0xc4   : > { %s1776_s27 = sadd.s32 4294967294, %s2616_s12   ;;  %s2907_s19 = sadd.s32 1, %s2616_s12  }
  0xc5   : > { %s33_s18 = ssub.s32 %s2616_s12, %s2907_s19  ;;  %s36_s26 = sadd.s32 1, %s2612_s11 }
  0xc6   : > { %p34_p8 = scmp.eq.s32.totalorder %s33_s18, 0  ;;  %p43_p13 = scmp.ne.s32.totalorder %s2612_s11, %s2608_s10 }
  0xc7   : > { %p44_p0 = scmp.eq.s32.totalorder %s2616_s12, 0  ;;  %p49_p1 = scmp.ne.s32.totalorder %s2608_s10, %s2604_s30 }
  0xc8   : > { %s2918_s24 = scalar_select %p34_p8, %s2612_s11, %s36_s26  }
  0xc9   : > { %p2920_p3 = por %p44_p0, %p43_p13  ;;  %p3139_p2 = scmp.eq.s32.totalorder %s2709_s15, 0 }
  0xca   : > { %p241_p5 = scmp.eq.s32.totalorder %s2709_s15, 1  ;;  %p247_p7 = scmp.eq.s32.totalorder %s1776_s27, 1 }
  0xcb   : > { %p2926_p6 = por %p3139_p2, %p49_p1  ;;  %p2117_p9 = scmp.lt.s32.totalorder %s2616_s12, 2 }
  0xcc   : > { %s359_s17 = sand.u32 1, %s2612_s11   ;;  %p2933_p4 = por %p241_p5, %p43_p13 }
  0xcd   : > { %p2937_p10 = por %p247_p7, %p49_p1  ;;  %s1787_s25 = sshll.u32 %s359_s17, 4 }
  0xce   : > { %s3141_s9 = scalar_select %p2933_p4, 1, 0 }
  0xcf   : > { %s3142_s23 = scalar_select %p2937_p10, 1, 0 }
  0xd0   : > { %s1892_s28 = sshll.u32 %s2616_s12, 8  ;;  %s363_s14 = scalar_lea.vmem [#allocation4], %s1787_s25 }
  0xd1   : > { %s2945_s13 = scalar_lea.hbm %s3118_s0, %s1892_s28  ;;  %s370_s20 = sshll.u32 %s363_s14, 4  ;;  %s2947_s20 = int_to_ptr.vmem [resolvable:$true] %s370_s20 }
  0xd2   : > { %p2951_p11 = pnand %p2117_p9, %p2920_p3  ;;  %s2955_s18 = scalar_lea.sflag [#allocation5], %s359_s17 }
  0xd3   : > { %s2504_s26 = scalar_lea.hbm %s2945_s13, 256  ;;  %s2509_s21 = scalar_lea.hbm %s3118_s0, 512 }
  0xd4   : > { %p2505_p12 = scmp.ne.s32.totalorder %s2945_s13, %s2504_s26  ;;  %p2506_p8 = pneg %p2951_p11 }
  0xd5   : > { %p2510_p1 = scmp.lt.u32.totalorder %s2945_s13, %s3118_s0  ;;  %p2511_p3 = scmp.lt.u32.totalorder %s2509_s21, %s2504_s26 }
  0xd6   : > { %p2507_p13 = pnand %p2506_p8, %p2505_p12  ;;  %p2513_p5 = scmp.lt.u32.totalorder %s2504_s26, %s2945_s13 }
  0xd7   : > { %p2512_p2 = por %p2511_p3, %p2510_p1 }
  0xd8   : > { %p2508_p0 = pneg %p2507_p13 }
  0xd9   : > { %p2514_p7 = por %p2513_p5, %p2512_p2 }
  0xdb   : > { %p2515_p9 = pnand %p2514_p7, %p2508_p0 }
  0xdd   : > { %2518 = shalt.err (!%p2515_p9)
}
  0xde   : > { %s2519_s17 = scalar_lea.vmem %s2947_s20, 256  ;;  %s2628_s14 = smov [#allocation4]  }
  0xdf   : > { %p2520_p12 = scmp.ne.s32.totalorder %s2947_s20, %s2519_s17  ;;  %s2524_s25 = sshll.u32 %s2628_s14, 4  ;;  %s2525_s25 = int_to_ptr.vmem [resolvable:$false] %s2524_s25 }
  0xe0   : > { %s2526_s28 = scalar_lea.vmem %s2525_s25, 512  ;;  %p2527_p4 = scmp.lt.s32.totalorder %s2947_s20, %s2525_s25 }
  0xe1   : > { %p2522_p13 = pnand %p2520_p12, %p2506_p8  ;;  %p2528_p1 = scmp.lt.s32.totalorder %s2526_s28, %s2519_s17 }
  0xe3   : > { %p2523_p10 = pneg %p2522_p13  ;;  %p2529_p3 = por %p2528_p1, %p2527_p4 }
  0xe5   : > { %p2530_p2 = pnand %p2529_p3, %p2523_p10 }
  0xe7   : > { %2533 = shalt.err (!%p2530_p2)
}
  0xe8   : > { %s2629_s26 = smov 128   ;;  %s2630_s21 = smov 8  }
  0xe9   : > { %2104 = dma.hbm_to_vmem [thread:$0]  (!%p2951_p11), %s2945_s13, 256, %s2947_s20, %s2955_s18, %s2629_s26, %s2629_s26, %s2630_s21  }
  0xea   : > { %p3144_p8 = scmp.ne.s32.totalorder %s3134_s16, 0 }
  0xeb   : > { %s2986_s29 = sand.u32 (!%p3144_p8), 1, %s2608_s10  }
  0xec   : > { %382 = sbr.rel (%p3144_p8) target bundleno = 1243 (0x4db), region = 56  ;;  %s1791_s1 = sshll.u32 (!%p3144_p8), %s2986_s29, 4 }
  0xed   : > { %s385_s17 = scalar_lea.sflag (!%p3144_p8), [#allocation5], %s2986_s29  ;;  %s2992_s14 = scalar_lea.vmem (!%p3144_p8), [#allocation4], %s1791_s1 }
  0xf3   : > { %2579 = dma.done.wait (%p2926_p6), %s385_s17, 256  }
  0xf4   : > { %2581 = vsyncadd (%p2926_p6), %s385_s17, 4294967040  ;;  %p3145_p4 = scmp.eq.s32.totalorder %s2709_s15, 0 }
  0xf6   : > { %2583 = dma.done.wait (%p3145_p4), [#allocation8], 9232   ;;  %p3146_p10 = pmov %p3145_p4 }
  0xf7   : > { %p3147_p11 = pmov %p3145_p4 }
  0xf8   : > { %2585 = vsyncadd (%p3146_p10), [#allocation8], 4294958064 }
  0xf9   : > { %2587 = dma.done.wait (%p3147_p11), [#allocation11], 32   ;;  %p3148_p0 = pmov %p3145_p4 }
  0xfb   : > { %2589 = vsyncadd (%p3148_p0), [#allocation11], 4294967264  ;;  %p3149_p5 = pmov %p3148_p0 }
  0xfc   : > { %p3150_p7 = pmov %p3148_p0 }
  0xfd   : > { %2591 = dma.done.wait (%p3149_p5), [#allocation14], 1040  }
  0xfe   : > { %2593 = vsyncadd (%p3150_p7), [#allocation14], 4294966256  ;;  %p3151_p6 = pmov %p3148_p0 }
  0xff   : > { %p3152_p9 = pmov %p3148_p0 }
 0x100   : > { %2595 = dma.done.wait (%p3151_p6), [#allocation17], 32  }
 0x101   : > { %2597 = vsyncadd (%p3152_p9), [#allocation17], 4294967264  ;;  %v2631_v0 = vmov 0.0   ;;  %v2176_v1 = vld [vmem:[#allocation7 + $0x40] sm:$0xff]   ;;  %v2180_v5 = vld [vmem:[#allocation7 + $0x48] sm:$0xff]   ;;  %v2632_v47 = vmov 0.0|0.0  }
 0x102   : > { %458 = vst [vmem:[#allocation2] sm:$0xff] %v2631_v0  ;;  %459 = vst [vmem:[#allocation2 + $0x8] sm:$0xff] %v2631_v0  ;;  %v2177_v2 = vld [vmem:[#allocation7] sm:$0xff]   ;;  %1894 = vmatprep.subr.bf16.mxu0 %v2176_v1  ;;  %v2181_v6 = vld [vmem:[#allocation7 + $0x8] sm:$0xff]   ;;  %vm2633_vm0 = vmmov 0   ;;  %s1893_s16 = sshll.u32 %s2709_s15, 8 }
 0x103   : > { %460 = vst [vmem:[#allocation2 + $0x20] sm:$0xff] %v2631_v0  ;;  %461 = vst [vmem:[#allocation2 + $0x28] sm:$0xff] %v2631_v0  ;;  %v2178_v3 = vld [vmem:[#allocation7 + $0xc0] sm:$0xff]   ;;  %1895 = vmatpush3.bf16.msra.mxu0 %v2177_v2  ;;  %v2182_v7 = vld [vmem:[#allocation7 + $0xc8] sm:$0xff]   ;;  %s454_s22 = scalar_lea.vmem [#allocation19], %s1791_s1  ;;  %s3153_s18 = sld [smem:[#allocation27_spill]] }
 0x104   : > { %v2179_v4 = vld [vmem:[#allocation7 + $0x80] sm:$0xff]   ;;  %1916 = vmatprep.subr.bf16.mxu1 %v2178_v3  ;;  %1896 = vmatprep.subr.bf16.mxu0 %v2180_v5  ;;  %v2183_v8 = vld [vmem:[#allocation7 + $0x88] sm:$0xff]   ;;  %v2184_v9 = vld [vmem:[#allocation7 + $0x50] sm:$0xff]   ;;  %s1627_s13 = sshll.u32 %s454_s22, 4  ;;  %s1614_s15 = scalar_lea.sflag [#allocation6], %s2986_s29  ;;  %s3073_s13 = int_to_ptr.vmem [resolvable:$true] %s1627_s13 }
 0x105   : > { %1917 = vmatpush3.bf16.msra.mxu1 %v2179_v4  ;;  %v2185_v10 = vld [vmem:[#allocation7 + $0x10] sm:$0xff]   ;;  %v2188_v13 = vld [vmem:[#allocation7 + $0x58] sm:$0xff]   ;;  %v2192_v17 = vld [vmem:[#allocation7 + $0x60] sm:$0xff]   ;;  %s2534_s28 = scalar_lea.vmem %s3073_s13, 256  ;;  %p3154_p13 = scmp.ne.s32.totalorder %s3141_s9, 0 }
 0x106   : > { %1918 = vmatprep.subr.bf16.mxu1 %v2182_v7  ;;  %v2186_v11 = vld [vmem:[#allocation7 + $0xd0] sm:$0xff]   ;;  %v2189_v14 = vld [vmem:[#allocation7 + $0x18] sm:$0xff]   ;;  %v2193_v18 = vld [vmem:[#allocation7 + $0x20] sm:$0xff]   ;;  %p2535_p12 = scmp.ne.s32.totalorder %s3073_s13, %s2534_s28  ;;  %s2635_s26 = smov [#allocation19]  }
 0x107   : > { %1897 = vmatpush3.bf16.msra.mxu0 %v2181_v6  ;;  %v2187_v12 = vld [vmem:[#allocation7 + $0x90] sm:$0xff]   ;;  %v2190_v15 = vld [vmem:[#allocation7 + $0xd8] sm:$0xff]   ;;  %v2194_v19 = vld [vmem:[#allocation7 + $0xe0] sm:$0xff]   ;;  %s2538_s21 = sshll.u32 %s2635_s26, 4  ;;  %s2539_s21 = int_to_ptr.vmem [resolvable:$false] %s2538_s21 }
 0x108   : > { %1898 = vmatprep.subr.bf16.mxu0 %v2184_v9  ;;  %v2191_v16 = vld [vmem:[#allocation7 + $0x98] sm:$0xff]   ;;  %v2195_v20 = vld [vmem:[#allocation7 + $0xa0] sm:$0xff]   ;;  %v2196_v21 = vld [vmem:[#allocation7 + $0x68] sm:$0xff]   ;;  %p2536_p1 = pnand %p2535_p12, %p3154_p13  ;;  %s2540_s1 = scalar_lea.vmem %s2539_s21, 512 }
 0x109   : > { %1919 = vmatpush3.bf16.msra.mxu1 %v2183_v8  ;;  %v2197_v22 = vld [vmem:[#allocation7 + $0x28] sm:$0xff]   ;;  %v2200_v25 = vld [vmem:[#allocation7 + $0x70] sm:$0xff]   ;;  %v2204_v29 = vld [vmem:[#allocation7 + $0x78] sm:$0xff]   ;;  %s3071_s25 = scalar_lea.hbm %s3153_s18, %s1893_s16  ;;  %p2541_p2 = scmp.lt.s32.totalorder %s3073_s13, %s2539_s21 }
 0x10a   : > { %1920 = vmatprep.subr.bf16.mxu1 %v2186_v11  ;;  %v2198_v23 = vld [vmem:[#allocation7 + $0xe8] sm:$0xff]   ;;  %v2201_v26 = vld [vmem:[#allocation7 + $0x30] sm:$0xff]   ;;  %v2205_v30 = vld [vmem:[#allocation7 + $0x38] sm:$0xff]   ;;  %p2537_p3 = pneg %p2536_p1  ;;  %p2542_p8 = scmp.lt.s32.totalorder %s2540_s1, %s2534_s28 }
 0x10b   : > { %1899 = vmatpush3.bf16.msra.mxu0 %v2185_v10  ;;  %v2199_v24 = vld [vmem:[#allocation7 + $0xa8] sm:$0xff]   ;;  %v2202_v27 = vld [vmem:[#allocation7 + $0xf0] sm:$0xff]   ;;  %v2206_v31 = vld [vmem:[#allocation7 + $0xf8] sm:$0xff]  }
 0x10c   : > { %1900 = vmatprep.subr.bf16.mxu0 %v2188_v13  ;;  %v2203_v28 = vld [vmem:[#allocation7 + $0xb0] sm:$0xff]   ;;  %v2207_v33 = vld [vmem:[#allocation7 + $0xb8] sm:$0xff]   ;;  %v2208_v34 = vld [vmem:[#allocation7 + $0x140] sm:$0xff]   ;;  %p2543_p4 = por %p2542_p8, %p2541_p2 }
 0x10d   : > { %1921 = vmatpush3.bf16.msra.mxu1 %v2187_v12  ;;  %v3019_v32 = vld [vmem:[%s2992_s14] sm:$0xff]  ;;  %v3023_v35 = vld [vmem:[%s2992_s14 + $0x8] sm:$0xff] }
 0x10e   : > { %1922 = vmatprep.subr.bf16.mxu1 %v2190_v15  ;;  %462 = vst [vmem:[#allocation2 + $0x10] sm:$0xff] %v3019_v32  ;;  %463 = vst [vmem:[#allocation2 + $0x18] sm:$0xff] %v3023_v35  ;;  %v2210_v36 = vld [vmem:[#allocation7 + $0x1c0] sm:$0xff]   ;;  %v468_v37 = vld [vmem:[#allocation2 + $0x4] sm:$0xff]  ;;  %v474_v43 = vpack.c.bf16 %v3019_v32, %v2631_v0  ;;  %v482_v15 = vpack.c.bf16 %v3023_v35, %v3019_v32  ;;  %p2544_p10 = pnand %p2543_p4, %p2537_p3 }
 0x10f   : > { %1901 = vmatpush3.bf16.msra.mxu0 %v2189_v14  ;;  %v2209_v38 = vld [vmem:[#allocation7 + $0x100] sm:$0xff]   ;;  %v2212_v44 = vld [vmem:[#allocation7 + $0x148] sm:$0xff]   ;;  %v2216_v50 = vld [vmem:[#allocation7 + $0x150] sm:$0xff]  }
 0x110   : > { %1902 = vmatprep.subr.bf16.mxu0 %v2192_v17  ;;  %v2211_v41 = vld [vmem:[#allocation7 + $0x180] sm:$0xff]   ;;  %v2213_v46 = vld [vmem:[#allocation7 + $0x108] sm:$0xff]   ;;  %v2217_v51 = vld [vmem:[#allocation7 + $0x110] sm:$0xff]   ;;  %v490_v17 = vpack.c.bf16 %v2631_v0, %v3023_v35 }
 0x111   : > { %1923 = vmatpush3.bf16.msra.mxu1 %v2191_v16  ;;  %v2214_v48 = vld [vmem:[#allocation7 + $0x1c8] sm:$0xff]   ;;  %v2218_v52 = vld [vmem:[#allocation7 + $0x1d0] sm:$0xff]   ;;  %v2220_v54 = vld [vmem:[#allocation7 + $0x158] sm:$0xff]  }
 0x112   : > { %1924 = vmatprep.subr.bf16.mxu1 %v2194_v19  ;;  %v2215_v49 = vld [vmem:[#allocation7 + $0x188] sm:$0xff]   ;;  %v2219_v53 = vld [vmem:[#allocation7 + $0x190] sm:$0xff]   ;;  %v2221_v55 = vld [vmem:[#allocation7 + $0x118] sm:$0xff]  }
 0x113   : > { %1903 = vmatpush3.bf16.msra.mxu0 %v2193_v18  ;;  %v2222_v56 = vld [vmem:[#allocation7 + $0x1d8] sm:$0xff]   ;;  %v2224_v58 = vld [vmem:[#allocation7 + $0x160] sm:$0xff]   ;;  %v2228_v62 = vld [vmem:[#allocation7 + $0x168] sm:$0xff]  }
 0x114   : > { %1904 = vmatprep.subr.bf16.mxu0 %v2196_v21  ;;  %v2223_v57 = vld [vmem:[#allocation7 + $0x198] sm:$0xff]   ;;  %v2225_v59 = vld [vmem:[#allocation7 + $0x120] sm:$0xff]   ;;  %v2229_v63 = vld [vmem:[#allocation7 + $0x128] sm:$0xff]  }
 0x115   : > { %1925 = vmatpush3.bf16.msra.mxu1 %v2195_v20  ;;  %v469_v39 = vld [vmem:[#allocation2 + $0xc] sm:$0xff]  ;;  %v477_v42 = vld [vmem:[#allocation2 + $0x14] sm:$0xff]  ;;  %v2232_v3 = vld [vmem:[#allocation7 + $0x170] sm:$0xff]  }
 0x116   : > { %1926 = vmatprep.subr.bf16.mxu1 %v2198_v23  ;;  %v470_v40 = vpack.c.bf16 %v469_v39, %v468_v37  ;;  %v478_v45 = vpack.c.bf16 %v477_v42, %v469_v39  ;;  %v2226_v60 = vld [vmem:[#allocation7 + $0x1e0] sm:$0xff]   ;;  %v2230_v1 = vld [vmem:[#allocation7 + $0x1e8] sm:$0xff]   ;;  %v2233_v4 = vld [vmem:[#allocation7 + $0x130] sm:$0xff]  }
 0x117   : > { %1905 = vmatpush3.bf16.msra.mxu0 %v2197_v22  ;;  %v2227_v61 = vld [vmem:[#allocation7 + $0x1a0] sm:$0xff]   ;;  %v2231_v2 = vld [vmem:[#allocation7 + $0x1a8] sm:$0xff]   ;;  %v2234_v5 = vld [vmem:[#allocation7 + $0x1f0] sm:$0xff]  }
 0x118   : > { %1906 = vmatprep.subr.bf16.mxu0 %v2200_v25  ;;  %1124 = vmatprep.mubr.bf16.mxu0 %v470_v40  ;;  %v2235_v6 = vld [vmem:[#allocation7 + $0x1b0] sm:$0xff]   ;;  %v2236_v8 = vld [vmem:[#allocation7 + $0x178] sm:$0xff]   ;;  %v2240_v16 = vld [vmem:[#allocation7 + $0x200] sm:$0xff]  }
 0x119   : > { %1927 = vmatpush3.bf16.msra.mxu1 %v2199_v24  ;;  %1165 = vmatprep.mubr.bf16.mxu1 %v478_v45  ;;  %v485_v7 = vld [vmem:[#allocation2 + $0x1c] sm:$0xff]  ;;  %v493_v10 = vld [vmem:[#allocation2 + $0x24] sm:$0xff]  ;;  %v2244_v21 = vld [vmem:[#allocation7 + $0x220] sm:$0xff]  }
 0x11a   : > { %1928 = vmatprep.subr.bf16.mxu1 %v2202_v27  ;;  %v486_v9 = vpack.c.bf16 %v485_v7, %v477_v42  ;;  %v2238_v11 = vld [vmem:[#allocation7 + $0x1f8] sm:$0xff]   ;;  %v494_v12 = vpack.c.bf16 %v493_v10, %v485_v7  ;;  %v2241_v18 = vld [vmem:[#allocation7 + $0x208] sm:$0xff]   ;;  %v2242_v19 = vld [vmem:[#allocation7 + $0x210] sm:$0xff]  }
 0x11b   : > { %1907 = vmatpush3.bf16.msra.mxu0 %v2201_v26  ;;  %v2237_v13 = vld [vmem:[#allocation7 + $0x138] sm:$0xff]   ;;  %v2245_v22 = vld [vmem:[#allocation7 + $0x228] sm:$0xff]   ;;  %v2246_v23 = vld [vmem:[#allocation7 + $0x230] sm:$0xff]  }
 0x11c   : > { %1908 = vmatprep.subr.bf16.mxu0 %v2204_v29  ;;  %v2239_v14 = vld [vmem:[#allocation7 + $0x1b8] sm:$0xff]   ;;  %v1801_v26 = vld [vmem:[#allocation9] ss:$0 sm:$0xff] }
 0x11d   : > { %1929 = vmatpush3.bf16.msra.mxu1 %v2203_v28  ;;  %v2243_v20 = vld [vmem:[#allocation7 + $0x218] sm:$0xff]  }
 0x11e   : > { %1930 = vmatprep.subr.bf16.mxu1 %v2206_v31  ;;  %v2247_v24 = vld [vmem:[#allocation7 + $0x238] sm:$0xff]  }
 0x11f   : > { %1909 = vmatpush3.bf16.msra.mxu0 %v2205_v30 }
 0x120   : > { %1938 = vmatprep.subr.bf16.mxu0 %v2208_v34 }
 0x121   : > { %1931 = vmatpush3.bf16.msra.mxu1 %v2207_v33 }
 0x122   : > { %1960 = vmatprep.subr.bf16.mxu1 %v2210_v36  ;;  %1125 = vmatmul.mubr.bf16.vlgmr.msra.gmra.mrb[0].mxu0 %v2632_v47 }
 0x123   : > { %1939 = vmatpush3.bf16.msra.mxu0 %v2209_v38  ;;  %1206 = vmatprep.mubr.bf16.mxu0 %v486_v9 }
 0x124   : > { %1166 = vmatmul.mubr.bf16.vlgmr.msra.gmra.mrb[0].mxu1 %v474_v43  ;;  %1940 = vmatprep.subr.bf16.mxu0 %v2212_v44 }
 0x125   : > { %1961 = vmatpush3.bf16.msra.mxu1 %v2211_v41  ;;  %1247 = vmatprep.mubr.bf16.mxu1 %v494_v12 }
 0x126   : > { %1962 = vmatprep.subr.bf16.mxu1 %v2214_v48 }
 0x127   : > { %1941 = vmatpush3.bf16.msra.mxu0 %v2213_v46 }
 0x128   : > { %1942 = vmatprep.subr.bf16.mxu0 %v2216_v50 }
 0x129   : > { %1963 = vmatpush3.bf16.msra.mxu1 %v2215_v49 }
 0x12a   : > { %1964 = vmatprep.subr.bf16.mxu1 %v2218_v52 }
 0x12b   : > { %1943 = vmatpush3.bf16.msra.mxu0 %v2217_v51 }
 0x12c   : > { %1944 = vmatprep.subr.bf16.mxu0 %v2220_v54 }
 0x12d   : > { %1965 = vmatpush3.bf16.msra.mxu1 %v2219_v53 }
 0x12e   : > { %1966 = vmatprep.subr.bf16.mxu1 %v2222_v56 }
 0x12f   : > { %1945 = vmatpush3.bf16.msra.mxu0 %v2221_v55 }
 0x130   : > { %1946 = vmatprep.subr.bf16.mxu0 %v2224_v58 }
 0x131   : > { %1967 = vmatpush3.bf16.msra.mxu1 %v2223_v57 }
 0x132   : > { %1968 = vmatprep.subr.bf16.mxu1 %v2226_v60 }
 0x133   : > { %1947 = vmatpush3.bf16.msra.mxu0 %v2225_v59 }
 0x134   : > { %1948 = vmatprep.subr.bf16.mxu0 %v2228_v62 }
 0x135   : > { %1969 = vmatpush3.bf16.msra.mxu1 %v2227_v61 }
 0x136   : > { %1970 = vmatprep.subr.bf16.mxu1 %v2230_v1 }
 0x137   : > { %1949 = vmatpush3.bf16.msra.mxu0 %v2229_v63 }
 0x138   : > { %1950 = vmatprep.subr.bf16.mxu0 %v2232_v3 }
 0x139   : > { %1971 = vmatpush3.bf16.msra.mxu1 %v2231_v2 }
 0x13a   : > { %1972 = vmatprep.subr.bf16.mxu1 %v2234_v5 }
 0x13b   : > { %1951 = vmatpush3.bf16.msra.mxu0 %v2233_v4 }
 0x13c   : > { %1952 = vmatprep.subr.bf16.mxu0 %v2236_v8 }
 0x13d   : > { %1973 = vmatpush3.bf16.msra.mxu1 %v2235_v6 }
 0x13e   : > { %1974 = vmatprep.subr.bf16.mxu1 %v2238_v11 }
 0x13f   : > { %1953 = vmatpush3.bf16.msra.mxu0 %v2237_v13 }
 0x140   : > { %2000 = vmatprep.subr.bf16.mxu0 %v2631_v0 }
 0x141   : > { %1975 = vmatpush3.bf16.msra.mxu1 %v2239_v14 }
 0x142   : > { %1207 = vmatmul.mubr.bf16.vlgmr.msra.gmra.mrb[4].mxu0 %v482_v15  ;;  %2020 = vmatprep.subr.bf16.mxu1 %v2631_v0 }
 0x143   : > { %2001 = vmatpush3.bf16.msra.mxu0 %v2240_v16  ;;  %2016 = vmatprep.mubr.msk.bf16.mxu0 %vm2633_vm0, %v2631_v0 }
 0x144   : > { %1248 = vmatmul.mubr.bf16.vlgmr.msra.gmra.mrb[4].mxu1 %v490_v17  ;;  %2002 = vmatprep.subr.bf16.mxu0 %v2631_v0 }
 0x145   : > { %2036 = vmatprep.mubr.msk.bf16.mxu1 %vm2633_vm0, %v2631_v0 }
 0x147   : > { %2003 = vmatpush3.bf16.msra.mxu0 %v2241_v18 }
 0x148   : > { %2004 = vmatprep.subr.bf16.mxu0 %v2631_v0 }
 0x14b   : > { %2005 = vmatpush3.bf16.msra.mxu0 %v2242_v19 }
 0x14c   : > { %2006 = vmatprep.subr.bf16.mxu0 %v2631_v0 }
 0x14f   : > { %2007 = vmatpush3.bf16.msra.mxu0 %v2243_v20 }
 0x150   : > { %2008 = vmatprep.subr.bf16.mxu0 %v2631_v0 }
 0x153   : > { %2009 = vmatpush3.bf16.msra.mxu0 %v2244_v21 }
 0x154   : > { %2010 = vmatprep.subr.bf16.mxu0 %v2631_v0 }
 0x157   : > { %2011 = vmatpush3.bf16.msra.mxu0 %v2245_v22 }
 0x158   : > { %2012 = vmatprep.subr.bf16.mxu0 %v2631_v0 }
 0x15b   : > { %2013 = vmatpush3.bf16.msra.mxu0 %v2246_v23 }
 0x15c   : > { %2014 = vmatprep.subr.bf16.mxu0 %v2631_v0 }
 0x15f   : > { %2015 = vmatpush3.bf16.msra.mxu0 %v2247_v24 }
 0x162   : > { %2017 = vmatmul.mubr.bf16.vlgmr.msra.gmra.mrb[8].mxu0 %v2632_v47 }
 0x1f5   : > { %v1910_v25 = vpop.f32.mrb[0].mxu0 }
 0x1f6   : > { %v1911_v27 = vpop.f32.mrb[1].mxu0 }
 0x1f7   : > { %v1912_v28 = vadd.f32 %v1911_v27, %v1910_v25  ;;  %v1913_v29 = vpop.f32.mrb[2].mxu0  ;;  %v1932_v30 = vpop.f32.mrb[0].mxu1 }
 0x1f8   : > { %v1914_v31 = vpop.f32.mrb[3].mxu0  ;;  %v1933_v33 = vpop.f32.mrb[1].mxu1 }
 0x1f9   : > { %v1127_v34 = vadd.f32 %v1912_v28, %v1801_v26  ;;  %v1915_v36 = vadd.f32 %v1914_v31, %v1913_v29  ;;  %v1934_v37 = vadd.f32 %v1933_v33, %v1932_v30  ;;  %v1935_v38 = vpop.f32.mrb[2].mxu1 }
 0x1fa   : > { %v1936_v39 = vpop.f32.mrb[3].mxu1 }
 0x1fb   : > { %v1130_v40 = vadd.f32 %v1915_v36, %v1801_v26  ;;  %v1168_v41 = vadd.f32 %v1934_v37, %v1127_v34  ;;  %v1937_v42 = vadd.f32 %v1936_v39, %v1935_v38 }
 0x1fd   : > { %v1171_v43 = vadd.f32 %v1937_v42, %v1130_v40 }
 0x215   : > { %v1954_v44 = vpop.f32.mrb[4].mxu0 }
 0x216   : > { %v1955_v45 = vpop.f32.mrb[5].mxu0 }
 0x217   : > { %v1956_v46 = vadd.f32 %v1955_v45, %v1954_v44  ;;  %v1957_v47 = vpop.f32.mrb[6].mxu0  ;;  %v1976_v48 = vpop.f32.mrb[4].mxu1 }
 0x218   : > { %v1958_v49 = vpop.f32.mrb[7].mxu0  ;;  %v1977_v50 = vpop.f32.mrb[5].mxu1 }
 0x219   : > { %v1209_v51 = vadd.f32 %v1956_v46, %v1168_v41  ;;  %v1959_v52 = vadd.f32 %v1958_v49, %v1957_v47  ;;  %v1978_v53 = vadd.f32 %v1977_v50, %v1976_v48  ;;  %v1979_v54 = vpop.f32.mrb[6].mxu1 }
 0x21a   : > { %v1980_v55 = vpop.f32.mrb[7].mxu1 }
 0x21b   : > { %v1212_v56 = vadd.f32 %v1959_v52, %v1171_v43  ;;  %v1981_v57 = vadd.f32 %v1980_v55, %v1979_v54  ;;  %v1250_v58 = vadd.f32 %v1978_v53, %v1209_v51  ;;  %v2634_v43 = vmov -1.0  }
 0x21d   : > { %v1253_v59 = vadd.f32 %v1981_v57, %v1212_v56 }
 0x235   : > { %v1290_v60 = vpop.f32.mrb[8].mxu0 }
 0x236   : > { %v1291_v61 = vadd.f32 %v1290_v60, %v1250_v58  ;;  %v2018_v62 = vpop.f32.mrb[9].mxu0  ;;  %v2248_v58 = vld [vmem:[#allocation13] sm:$0xff]   ;;  %v2250_v60 = vld [vmem:[#allocation13 + $0x10] sm:$0xff]  }
 0x237   : > { %v1293_v63 = vpop.f32.mrb[10].mxu0  ;;  %2021 = vmatpush3.bf16.msra.mxu1 %v2248_v58  ;;  %v2252_v62 = vld [vmem:[#allocation13 + $0x20] sm:$0xff]  }
 0x238   : > { %v1299_v1 = vmul.f32 0.70710677, %v1291_v61  ;;  %v1294_v2 = vadd.f32 %v1293_v63, %v1253_v59  ;;  %v2019_v3 = vpop.f32.mrb[11].mxu0  ;;  %v1297_v48 = vmul.f32 0.5, %v1291_v61  ;;  %2022 = vmatprep.subr.bf16.mxu1 %v2631_v0  ;;  %v2249_v59 = vld [vmem:[#allocation13 + $0x8] sm:$0xff]   ;;  %v2251_v61 = vld [vmem:[#allocation13 + $0x18] sm:$0xff]  }
 0x239   : > { %v2253_v63 = vld [vmem:[#allocation13 + $0x28] sm:$0xff]  }
 0x23a   : > { %v1305_v4 = vand.u32 2147483647, %v1299_v1  ;;  %v1300_v5 = vmul.f32 0.70710677, %v1294_v2  ;;  %vm1301_vm1 = vcmp.ge.f32.partialorder %v1299_v1, 0.0  ;;  %v1298_v53 = vmul.f32 0.5, %v1294_v2 }
 0x23b   : > { %v1303_v44 = vsel %vm1301_vm1, 1.0, %v2634_v43  ;;  %2023 = vmatpush3.bf16.msra.mxu1 %v2249_v59  ;;  %v2254_v1 = vld [vmem:[#allocation13 + $0x30] sm:$0xff]   ;;  %v2255_v2 = vld [vmem:[#allocation13 + $0x38] sm:$0xff]  }
 0x23c   : > { %v1307_v6 = vmul.f32 0.3275911, %v1305_v4  ;;  %v1306_v7 = vand.u32 2147483647, %v1300_v5  ;;  %v1331_v11 = vsub.f32 0.0, %v1305_v4  ;;  %vm1302_vm2 = vcmp.ge.f32.partialorder %v1300_v5, 0.0  ;;  %2024 = vmatprep.subr.bf16.mxu1 %v2631_v0 }
 0x23d   : > { %v1304_v49 = vsel %vm1302_vm2, 1.0, %v2634_v43 }
 0x23e   : > { %v1309_v8 = vadd.f32 1.0, %v1307_v6  ;;  %v1308_v9 = vmul.f32 0.3275911, %v1306_v7  ;;  %v1332_v12 = vsub.f32 0.0, %v1306_v7  ;;  %v1333_v14 = vmul.f32 %v1331_v11, %v1305_v4 }
 0x23f   : > { %2025 = vmatpush3.bf16.msra.mxu1 %v2250_v60 }
 0x240   : > { %2256 = vrcp.f32 %v1309_v8  ;;  %v1310_v10 = vadd.f32 1.0, %v1308_v9  ;;  %v1334_v17 = vmul.f32 %v1332_v12, %v1306_v7  ;;  %v1335_v19 = vmul.f32 1.442695, %v1333_v14  ;;  %2026 = vmatprep.subr.bf16.mxu1 %v2631_v0 }
 0x242   : > { %2258 = vrcp.f32 %v1310_v10  ;;  %v1337_v23 = vmul.f32 1.442695, %v1334_v17 }
 0x243   : > { %2260 = vpow2.f32 %v1335_v19  ;;  %2027 = vmatpush3.bf16.msra.mxu1 %v2251_v61 }
 0x244   : > { %2262 = vpow2.f32 %v1337_v23  ;;  %2028 = vmatprep.subr.bf16.mxu1 %v2631_v0 }
 0x247   : > { %2029 = vmatpush3.bf16.msra.mxu1 %v2252_v62 }
 0x248   : > { %2030 = vmatprep.subr.bf16.mxu1 %v2631_v0 }
 0x24a   : > { %v2257_v13 = vpop.eup %2256 }
 0x24b   : > { %v1313_v15 = vmul.f32 1.0614054, %v2257_v13  ;;  %2031 = vmatpush3.bf16.msra.mxu1 %v2253_v63 }
 0x24c   : > { %v2259_v16 = vpop.eup %2258  ;;  %2032 = vmatprep.subr.bf16.mxu1 %v2631_v0 }
 0x24d   : > { %v1315_v18 = vadd.f32 -1.4531521, %v1313_v15  ;;  %v1314_v20 = vmul.f32 1.0614054, %v2259_v16  ;;  %v2261_v37 = vpop.eup %2260 }
 0x24e   : > { %v2263_v41 = vpop.eup %2262 }
 0x24f   : > { %v1317_v21 = vmul.f32 %v2257_v13, %v1315_v18  ;;  %v1316_v22 = vadd.f32 -1.4531521, %v1314_v20  ;;  %2033 = vmatpush3.bf16.msra.mxu1 %v2254_v1  ;;  %v1874_v20 = vld [vmem:[#allocation10] ss:$0 sm:$0xff] }
 0x250   : > { %2034 = vmatprep.subr.bf16.mxu1 %v2631_v0 }
 0x251   : > { %v1319_v24 = vadd.f32 1.4214138, %v1317_v21  ;;  %v1318_v25 = vmul.f32 %v2259_v16, %v1316_v22 }
 0x253   : > { %v1321_v26 = vmul.f32 %v2257_v13, %v1319_v24  ;;  %v1320_v27 = vadd.f32 1.4214138, %v1318_v25  ;;  %2035 = vmatpush3.bf16.msra.mxu1 %v2255_v2  ;;  %v1875_v25 = vld [vmem:[#allocation12] ss:$0 sm:$0xff] }
 0x255   : > { %v1323_v28 = vadd.f32 -0.28449672, %v1321_v26  ;;  %v1322_v29 = vmul.f32 %v2259_v16, %v1320_v27 }
 0x257   : > { %v1325_v30 = vmul.f32 %v2257_v13, %v1323_v28  ;;  %v1324_v31 = vadd.f32 -0.28449672, %v1322_v29 }
 0x259   : > { %v1327_v33 = vadd.f32 0.2548296, %v1325_v30  ;;  %v1326_v34 = vmul.f32 %v2259_v16, %v1324_v31 }
 0x25b   : > { %v1329_v36 = vmul.f32 %v2257_v13, %v1327_v33  ;;  %v1328_v38 = vadd.f32 0.2548296, %v1326_v34  ;;  %v1876_v34 = vld [vmem:[#allocation15] ss:$0 sm:$0xff] }
 0x25d   : > { %v1339_v39 = vmul.f32 %v2261_v37, %v1329_v36  ;;  %v1330_v40 = vmul.f32 %v2259_v16, %v1328_v38 }
 0x25f   : > { %v1341_v42 = vsub.f32 1.0, %v1339_v39  ;;  %v1340_v45 = vmul.f32 %v2263_v41, %v1330_v40 }
 0x261   : > { %v1343_v46 = vmul.f32 %v1341_v42, %v1303_v44  ;;  %v1342_v47 = vsub.f32 1.0, %v1340_v45 }
 0x263   : > { %v1345_v50 = vadd.f32 1.0, %v1343_v46  ;;  %v1344_v51 = vmul.f32 %v1342_v47, %v1304_v49 }
 0x265   : > { %v1347_v52 = vmul.f32 %v1345_v50, %v1297_v48  ;;  %v1346_v54 = vadd.f32 1.0, %v1344_v51 }
 0x267   : > { %1351 = vadd.xlane.f32.xlu0 %v1347_v52  ;;  %v1358_v55 = vmul.f32 %v1347_v52, %v1347_v52  ;;  %v1348_v56 = vmul.f32 %v1346_v54, %v1298_v53 }
 0x269   : > { %1360 = vadd.xlane.f32.xlu1 %v1358_v55  ;;  %v1359_v57 = vmul.f32 %v1348_v56, %v1348_v56 }
 0x26b   : > { %1353 = vadd.xlane.f32.xlu0 %v1348_v56 }
 0x26d   : > { %1362 = vadd.xlane.f32.xlu1 %v1359_v57 }
 0x2f4   : > { %v1352_v3 = vpop.xlane.xlu0 %1351 }
 0x2f5   : > { %v1356_v4 = vmul.f32 0.0078125, %v1352_v3 }
 0x2f6   : > { %v1361_v5 = vpop.xlane.xlu1 %1360 }
 0x2f7   : > { %v1366_v6 = vmul.f32 %v1356_v4, %v1356_v4  ;;  %v1364_v7 = vmul.f32 0.0078125, %v1361_v5  ;;  %v1372_v0 = vsub.f32 %v1347_v52, %v1356_v4 }
 0x2f8   : > { %v1354_v8 = vpop.xlane.xlu0 %1353 }
 0x2f9   : > { %v1368_v9 = vsub.f32 %v1364_v7, %v1366_v6  ;;  %v1357_v10 = vmul.f32 0.0078125, %v1354_v8 }
 0x2fa   : > { %v1363_v11 = vpop.xlane.xlu1 %1362 }
 0x2fb   : > { %v1370_v12 = vmax.f32 %v1368_v9, 0.0  ;;  %v1367_v13 = vmul.f32 %v1357_v10, %v1357_v10  ;;  %v1365_v14 = vmul.f32 0.0078125, %v1363_v11  ;;  %v1373_v22 = vsub.f32 %v1348_v56, %v1357_v10 }
 0x2fd   : > { %v1374_v15 = vadd.f32 1e-05, %v1370_v12  ;;  %v1369_v16 = vsub.f32 %v1365_v14, %v1367_v13 }
 0x2ff   : > { %2264 = vrsqrt.f32 %v1374_v15  ;;  %v1371_v17 = vmax.f32 %v1369_v16, 0.0 }
 0x301   : > { %v1375_v18 = vadd.f32 1e-05, %v1371_v17 }
 0x303   : > { %2266 = vrsqrt.f32 %v1375_v18 }
 0x309   : > { %v2265_v19 = vpop.eup %2264 }
 0x30a   : > { %v1378_v21 = vmul.f32 %v2265_v19, %v1372_v0 }
 0x30c   : > { %v1386_v23 = vmul.f32 %v1874_v20, %v1378_v21 }
 0x30d   : > { %v2267_v24 = vpop.eup %2266 }
 0x30e   : > { %v1379_v26 = vmul.f32 %v2267_v24, %v1373_v22  ;;  %v1394_v28 = vadd.f32 %v1875_v25, %v1386_v23 }
 0x310   : > { %v1387_v27 = vmul.f32 %v1874_v20, %v1379_v26  ;;  %v3055_v30 = vadd.f32 %v1394_v28, %v3019_v32 }
 0x312   : > { %v1395_v29 = vadd.f32 %v1875_v25, %v1387_v27 }
 0x314   : > { %v3058_v31 = vadd.f32 %v1395_v29, %v3023_v35 }
 0x316   : > { %v1398_v33 = vpack.c.bf16 %v3058_v31, %v3055_v30 }
 0x318   : > { %2037 = vmatmul.mubr.bf16.vlgmr.msra.gmra.mrb[8].mxu1 %v1398_v33 }
 0x3eb   : > { %v1504_v36 = vpop.f32.mrb[8].mxu1 }
 0x3ec   : > { %v1505_v37 = vadd.f32 %v1876_v34, %v1504_v36  ;;  %v2038_v38 = vpop.f32.mrb[9].mxu1 }
 0x3ed   : > { %v1507_v39 = vpop.f32.mrb[10].mxu1 }
 0x3ee   : > { %v1513_v40 = vmul.f32 0.70710677, %v1505_v37  ;;  %v1508_v41 = vadd.f32 %v1876_v34, %v1507_v39  ;;  %v2039_v42 = vpop.f32.mrb[11].mxu1  ;;  %v1511_v19 = vmul.f32 0.5, %v1505_v37 }
 0x3f0   : > { %v1519_v44 = vand.u32 2147483647, %v1513_v40  ;;  %v1514_v45 = vmul.f32 0.70710677, %v1508_v41  ;;  %vm1515_vm3 = vcmp.ge.f32.partialorder %v1513_v40, 0.0  ;;  %v1512_v24 = vmul.f32 0.5, %v1508_v41 }
 0x3f1   : > { %v1517_v16 = vsel %vm1515_vm3, 1.0, %v2634_v43 }
 0x3f2   : > { %v1521_v46 = vmul.f32 0.3275911, %v1519_v44  ;;  %v1520_v32 = vand.u32 2147483647, %v1514_v45  ;;  %v1545_v49 = vsub.f32 0.0, %v1519_v44  ;;  %vm1516_vm4 = vcmp.ge.f32.partialorder %v1514_v45, 0.0 }
 0x3f3   : > { %v1518_v20 = vsel %vm1516_vm4, 1.0, %v2634_v43 }
 0x3f4   : > { %v1523_v47 = vadd.f32 1.0, %v1521_v46  ;;  %v1522_v48 = vmul.f32 0.3275911, %v1520_v32  ;;  %v1546_v50 = vsub.f32 0.0, %v1520_v32  ;;  %v1547_v52 = vmul.f32 %v1545_v49, %v1519_v44  ;;  %v1885_v49 = vld [vmem:[#allocation16] ss:$0 sm:$0xff] }
 0x3f6   : > { %2268 = vrcp.f32 %v1523_v47  ;;  %v1524_v35 = vadd.f32 1.0, %v1522_v48  ;;  %v1548_v55 = vmul.f32 %v1546_v50, %v1520_v32  ;;  %v1549_v57 = vmul.f32 1.442695, %v1547_v52  ;;  %v1886_v52 = vld [vmem:[#allocation18] ss:$0 sm:$0xff] }
 0x3f8   : > { %2270 = vrcp.f32 %v1524_v35  ;;  %v1551_v61 = vmul.f32 1.442695, %v1548_v55 }
 0x3f9   : > { %2272 = vpow2.f32 %v1549_v57 }
 0x3fa   : > { %2274 = vpow2.f32 %v1551_v61 }
 0x400   : > { %v2269_v51 = vpop.eup %2268 }
 0x401   : > { %v1527_v53 = vmul.f32 1.0614054, %v2269_v51 }
 0x402   : > { %v2271_v54 = vpop.eup %2270 }
 0x403   : > { %v1529_v56 = vadd.f32 -1.4531521, %v1527_v53  ;;  %v1528_v58 = vmul.f32 1.0614054, %v2271_v54  ;;  %v2273_v10 = vpop.eup %2272 }
 0x404   : > { %v2275_v14 = vpop.eup %2274 }
 0x405   : > { %v1531_v59 = vmul.f32 %v2269_v51, %v1529_v56  ;;  %v1530_v60 = vadd.f32 -1.4531521, %v1528_v58 }
 0x407   : > { %v1533_v62 = vadd.f32 1.4214138, %v1531_v59  ;;  %v1532_v63 = vmul.f32 %v2271_v54, %v1530_v60 }
 0x409   : > { %v1535_v1 = vmul.f32 %v2269_v51, %v1533_v62  ;;  %v1534_v2 = vadd.f32 1.4214138, %v1532_v63 }
 0x40b   : > { %v1537_v3 = vadd.f32 -0.28449672, %v1535_v1  ;;  %v1536_v4 = vmul.f32 %v2271_v54, %v1534_v2 }
 0x40d   : > { %v1539_v5 = vmul.f32 %v2269_v51, %v1537_v3  ;;  %v1538_v6 = vadd.f32 -0.28449672, %v1536_v4 }
 0x40f   : > { %v1541_v7 = vadd.f32 0.2548296, %v1539_v5  ;;  %v1540_v8 = vmul.f32 %v2271_v54, %v1538_v6 }
 0x411   : > { %v1543_v9 = vmul.f32 %v2269_v51, %v1541_v7  ;;  %v1542_v11 = vadd.f32 0.2548296, %v1540_v8 }
 0x413   : > { %v1553_v12 = vmul.f32 %v2273_v10, %v1543_v9  ;;  %v1544_v13 = vmul.f32 %v2271_v54, %v1542_v11 }
 0x415   : > { %v1555_v15 = vsub.f32 1.0, %v1553_v12  ;;  %v1554_v17 = vmul.f32 %v2275_v14, %v1544_v13 }
 0x417   : > { %v1557_v18 = vmul.f32 %v1555_v15, %v1517_v16  ;;  %v1556_v0 = vsub.f32 1.0, %v1554_v17 }
 0x419   : > { %v1559_v21 = vadd.f32 1.0, %v1557_v18  ;;  %v1558_v22 = vmul.f32 %v1556_v0, %v1518_v20 }
 0x41b   : > { %v1561_v23 = vmul.f32 %v1559_v21, %v1511_v19  ;;  %v1560_v25 = vadd.f32 1.0, %v1558_v22 }
 0x41d   : > { %1565 = vadd.xlane.f32.xlu0 %v1561_v23  ;;  %v1562_v26 = vmul.f32 %v1560_v25, %v1512_v24  ;;  %v1571_v27 = vmul.f32 %v1561_v23, %v1561_v23 }
 0x41f   : > { %1567 = vadd.xlane.f32.xlu1 %v1562_v26  ;;  %v1572_v28 = vmul.f32 %v1562_v26, %v1562_v26 }
 0x421   : > { %1573 = vadd.xlane.f32.xlu0 %v1571_v27 }
 0x423   : > { %1575 = vadd.xlane.f32.xlu1 %v1572_v28 }
 0x4aa   : > { %v1566_v29 = vpop.xlane.xlu0 %1565 }
 0x4ab   : > { %v1569_v33 = vmul.f32 0.0078125, %v1566_v29 }
 0x4ac   : > { %v1568_v34 = vpop.xlane.xlu1 %1567 }
 0x4ad   : > { %v1570_v36 = vmul.f32 0.0078125, %v1568_v34  ;;  %v1579_v37 = vmul.f32 %v1569_v33, %v1569_v33  ;;  %v1585_v48 = vsub.f32 %v1561_v23, %v1569_v33 }
 0x4ae   : > { %v1574_v38 = vpop.xlane.xlu0 %1573 }
 0x4af   : > { %v1577_v39 = vmul.f32 0.0078125, %v1574_v38  ;;  %v1580_v42 = vmul.f32 %v1570_v36, %v1570_v36  ;;  %v1586_v51 = vsub.f32 %v1562_v26, %v1570_v36 }
 0x4b0   : > { %v1576_v40 = vpop.xlane.xlu1 %1575 }
 0x4b1   : > { %v1581_v43 = vsub.f32 %v1577_v39, %v1579_v37  ;;  %v1578_v44 = vmul.f32 0.0078125, %v1576_v40 }
 0x4b3   : > { %v1583_v41 = vmax.f32 %v1581_v43, 0.0  ;;  %v1582_v45 = vsub.f32 %v1578_v44, %v1580_v42 }
 0x4b5   : > { %v1587_v46 = vadd.f32 1e-05, %v1583_v41  ;;  %v1584_v32 = vmax.f32 %v1582_v45, 0.0 }
 0x4b7   : > { %2276 = vrsqrt.f32 %v1587_v46  ;;  %v1588_v47 = vadd.f32 1e-05, %v1584_v32 }
 0x4b9   : > { %2278 = vrsqrt.f32 %v1588_v47 }
 0x4c1   : > { %v2277_v35 = vpop.eup %2276 }
 0x4c2   : > { %v1591_v50 = vmul.f32 %v2277_v35, %v1585_v48 }
 0x4c3   : > { %v2279_v53 = vpop.eup %2278 }
 0x4c4   : > { %v1599_v54 = vmul.f32 %v1885_v49, %v1591_v50  ;;  %v1592_v55 = vmul.f32 %v2279_v53, %v1586_v51 }
 0x4c6   : > { %v1607_v56 = vadd.f32 %v1886_v52, %v1599_v54  ;;  %v1600_v57 = vmul.f32 %v1885_v49, %v1592_v55 }
 0x4c8   : > { %v1609_v58 = vadd.f32 %v1607_v56, %v3055_v30  ;;  %v1608_v59 = vadd.f32 %v1886_v52, %v1600_v57 }
 0x4ca   : > { %1611 = vst [vmem:[%s454_s22] sm:$0xff] %v1609_v58  ;;  %v1610_v60 = vadd.f32 %v1608_v59, %v3058_v31 }
 0x4cc   : > { %1612 = vst [vmem:[%s454_s22 + $0x8] sm:$0xff] %v1610_v60 }
 0x4cd   : > { %2547 = shalt.err (!%p2544_p10)
}
 0x4ce   : > { %s2548_s17 = scalar_lea.hbm %s3071_s25, 256  ;;  %s2552_s22 = scalar_lea.hbm %s3153_s18, 512 }
 0x4cf   : > { %p2549_p11 = scmp.ne.s32.totalorder %s3071_s25, %s2548_s17  ;;  %p2553_p7 = scmp.lt.u32.totalorder %s3071_s25, %s3153_s18 }
 0x4d0   : > { %p2554_p6 = scmp.lt.u32.totalorder %s2552_s22, %s2548_s17  ;;  %p2556_p12 = scmp.lt.u32.totalorder %s2548_s17, %s3071_s25 }
 0x4d1   : > { %p2550_p0 = pnand %p2549_p11, %p3154_p13 }
 0x4d2   : > { %p2555_p9 = por %p2554_p6, %p2553_p7 }
 0x4d3   : > { %p2551_p5 = pneg %p2550_p0 }
 0x4d4   : > { %p2557_p1 = por %p2556_p12, %p2555_p9 }
 0x4d6   : > { %p2558_p3 = pnand %p2557_p1, %p2551_p5 }
 0x4d8   : > { %2561 = shalt.err (!%p2558_p3)
}
 0x4d9   : > { %s2636_s28 = smov 128   ;;  %s2637_s26 = smov 8  }
 0x4da   : > { %2074 = dma.vmem_to_hbm [thread:$0]  (%p3154_p13), %s3073_s13, 256, %s3071_s25, %s1614_s15, %s2636_s28, %s2636_s28, %s2637_s26  }
 0x4db PF: > { %s1642_s21 = sand.u32 1, %s2604_s30   ;;  %p3155_p2 = scmp.ne.s32.totalorder %s3142_s23, 0 }
 0x4dc   : > { %p3156_p8 = scmp.ge.s32.totalorder %s2616_s12, 2  ;;  %s1643_s1 = scalar_lea.sflag [#allocation6], %s1642_s21 }
 0x4de   : > { %p2106_p4 = pnand %p3156_p8, %p3155_p2 }
 0x4e0   : > { %2599 = dma.done.wait (!%p2106_p4), %s1643_s1, 256  }
 0x4e1   : > { %2601 = vsyncadd (!%p2106_p4), %s1643_s1, 4294967040  ;;  %p26_p10 = scmp.ge.s32.totalorder %s2907_s19, 4   ;;  %s3157_s30 = smov %s2608_s10 }
 0x4e2   : > { %s3158_s10 = smov %s2612_s11  ;;  %s3159_s11 = smov %s2918_s24 }
 0x4e3   : > { %s3160_s12 = smov %s2907_s19  ;;  %28 = sbr.rel (!%p26_p10) target bundleno = 12 (0xc), region = 133 }
 0x4ea   :  { %1648 = vsyncpa [#allocation5], 1 }
 0x4eb   :  { %1650 = vsyncpa [#allocation5 + $0x1], 1 }
 0x4ec   :  { %1651 = vsyncpa [#allocation8], 1 }
 0x4ed   :  { %1652 = vsyncpa [#allocation11], 1 }
 0x4ee   :  { %1653 = vsyncpa [#allocation14], 1 }
 0x4ef   :  { %1654 = vsyncpa [#allocation17], 1 }
 0x4f0   :  { %1655 = vsyncpa [#allocation6], 1 }
 0x4f1   :  { %1657 = vsyncpa [#allocation6 + $0x1], 1 }

// kernel: gpn_forward.5
= control target key start
LH: loop header
LB: loop body
LE: loop exit
PB: predicated region body
PF: predicated region fallthrough
CT: control target
= control target key end

     0   :  { %s3123_s0 = inlined_call_operand.hbm [shape: f32[2,16,128], index: 0, kind: input, shape index: {}, may-alias: {0,9}]   ;;  %s3124_s1 = inlined_call_operand.hbm [shape: bf16[1152,128], index: 1, kind: input, shape index: {}]   ;;  %s3125_s2 = inlined_call_operand.hbm [shape: f32[1,128], index: 2, kind: input, shape index: {}]   ;;  %s3126_s3 = inlined_call_operand.hbm [shape: f32[1,128], index: 3, kind: input, shape index: {}]   ;;  %s3127_s4 = inlined_call_operand.hbm [shape: f32[1,128], index: 4, kind: input, shape index: {}]   ;;  %s3128_s5 = inlined_call_operand.hbm [shape: bf16[128,128], index: 5, kind: input, shape index: {}]   ;;  %s3129_s6 = inlined_call_operand.hbm [shape: f32[1,128], index: 6, kind: input, shape index: {}]   ;;  %s3130_s7 = inlined_call_operand.hbm [shape: f32[1,128], index: 7, kind: input, shape index: {}]   ;;  %s3131_s8 = inlined_call_operand.hbm [shape: f32[1,128], index: 8, kind: input, shape index: {}]   ;;  %s3132_s9 = inlined_call_operand.hbm [shape: f32[2,16,128], index: 9, kind: output, shape index: {}, may-alias: {0,9}]  }
   0x1   :  { %3137 = sst [smem:[#allocation26_spill]] %s3124_s1 }
   0x2   :  { %3138 = sst [smem:[#allocation27_spill]] %s3132_s9 }
   0x3   :  { %14 = vsyncpa [#allocation5], 0 }
   0x4   :  { %16 = vsyncpa [#allocation5 + $0x1], 0 }
   0x5   :  { %17 = vsyncpa [#allocation8], 0 }
   0x6   :  { %18 = vsyncpa [#allocation11], 0 }
   0x7   :  { %19 = vsyncpa [#allocation14], 0 }
   0x8   :  { %20 = vsyncpa [#allocation17], 0 }
   0x9   :  { %21 = vsyncpa [#allocation6], 0 }
   0xa   :  { %23 = vsyncpa [#allocation6 + $0x1], 0  ;;  %s2685_s30 = smov 0   ;;  %s2687_s10 = smov 0  }
   0xb   :  { %s2689_s11 = smov 0   ;;  %s2691_s12 = smov 0  }
   0xc LB: > { %s2616_s13 = smov [#allocation7]   ;;  %s2706_s15 = sadd.s32 4294967295, %s2614_s12   ;;  %s2614_s12 = sphi %s2691_s12, %s3165_s12   ;;  %s2610_s11 = sphi %s2689_s11, %s3164_s11   ;;  %s2606_s10 = sphi %s2687_s10, %s3163_s10   ;;  %s2602_s30 = sphi %s2685_s30, %s3162_s30  }
   0xd   : > { %s266_s14 = sshll.u32 %s2616_s13, 4  ;;  %p1775_p0 = scmp.ge.s32.totalorder %s2614_s12, 1  ;;  %s2711_s14 = int_to_ptr.vmem [resolvable:$true] %s266_s14 }
   0xe   : > { %p3134_p1 = scmp.eq.s32.totalorder %s2706_s15, 0  ;;  %p254_p2 = scmp.lt.s32.totalorder %s2614_s12, 3 }
   0xf   : > { %s2617_s17 = smov [#allocation10]   ;;  %s2618_s20 = smov [#allocation13]  }
  0x10   : > { %p2713_p3 = pnand %p1775_p0, %p254_p2  ;;  %s291_s18 = sshll.u32 %s2617_s17, 4  ;;  %s2726_s18 = int_to_ptr.vmem [resolvable:$true] %s291_s18 }
  0x11   : > { %s312_s21 = sshll.u32 %s2618_s20, 4  ;;  %s3141_s1 = sld [smem:[#allocation26_spill]]  ;;  %s2728_s21 = int_to_ptr.vmem [resolvable:$true] %s312_s21 }
  0x12   : > { %s3139_s16 = scalar_select %p2713_p3, 1, 0 }
  0x13   : > { %p2074_p5 = pneg %p2713_p3 }
  0x15   : > { %p2722_p6 = pnand %p2074_p5, %p3134_p1 }
  0x17   : > { %s2278_s24 = scalar_lea.hbm %s3141_s1, 9216  ;;  %p2738_p8 = pneg %p2722_p6 }
  0x18   : > { %p2279_p7 = scmp.ne.s32.totalorder %s3141_s1, %s2278_s24  ;;  %p2285_p11 = scmp.lt.u32.totalorder %s2278_s24, %s3141_s1 }
  0x1a   : > { %p2281_p9 = pnand %p2738_p8, %p2279_p7 }
  0x1c   : > { %p2282_p10 = pneg %p2281_p9 }
  0x1e   : > { %p2287_p12 = pnand %p2285_p11, %p2282_p10 }
  0x20   : > { %2290 = shalt.err (!%p2287_p12)
}
  0x21   : > { %s2291_s13 = scalar_lea.vmem %s2711_s14, 9216  ;;  %p2299_p5 = scmp.lt.s32.totalorder %s2711_s14, %s2711_s14 }
  0x22   : > { %p2292_p13 = scmp.ne.s32.totalorder %s2711_s14, %s2291_s13  ;;  %p2300_p4 = scmp.lt.s32.totalorder %s2291_s13, %s2291_s13 }
  0x24   : > { %p2294_p0 = pnand %p2292_p13, %p2738_p8  ;;  %p2301_p7 = por %p2300_p4, %p2299_p5 }
  0x26   : > { %p2295_p2 = pneg %p2294_p0 }
  0x28   : > { %p2302_p9 = pnand %p2301_p7, %p2295_p2 }
  0x2a   : > { %2305 = shalt.err (!%p2302_p9)
}
  0x2b   : > { %s2619_s17 = smov 64   ;;  %s2620_s20 = smov 4  }
  0x2c   : > { %2077 = dma.hbm_to_vmem [thread:$0]  (!%p2722_p6), %s3141_s1, 9216, %s2711_s14, [#allocation8], %s2619_s17, %s2619_s17, %s2620_s20  }
  0x2d   : > { %s2306_s26 = scalar_lea.hbm %s3126_s3, 16 }
  0x2e   : > { %p2307_p4 = scmp.ne.s32.totalorder %s3126_s3, %s2306_s26  ;;  %p2313_p12 = scmp.lt.u32.totalorder %s2306_s26, %s3126_s3 }
  0x30   : > { %p2309_p10 = pnand %p2307_p4, %p2738_p8 }
  0x32   : > { %p2310_p11 = pneg %p2309_p10 }
  0x34   : > { %p2315_p13 = pnand %p2313_p12, %p2310_p11 }
  0x36   : > { %2318 = shalt.err (!%p2315_p13)
}
  0x37   : > { %s2319_s14 = scalar_lea.vmem %s2726_s18, 16  ;;  %s2326_s22 = scalar_lea.vmem %s2726_s18, 32 }
  0x38   : > { %p2320_p0 = scmp.ne.s32.totalorder %s2726_s18, %s2319_s14  ;;  %p2327_p7 = scmp.lt.s32.totalorder %s2726_s18, %s2726_s18 }
  0x39   : > { %p2328_p9 = scmp.lt.s32.totalorder %s2326_s22, %s2319_s14 }
  0x3a   : > { %p2322_p2 = pnand %p2320_p0, %p2738_p8 }
  0x3b   : > { %p2329_p4 = por %p2328_p9, %p2327_p7 }
  0x3c   : > { %p2323_p5 = pneg %p2322_p2 }
  0x3e   : > { %p2330_p10 = pnand %p2329_p4, %p2323_p5 }
  0x40   : > { %2333 = shalt.err (!%p2330_p10)
}
  0x41   : > { %2083 = dma.hbm_to_vmem [thread:$0]  (!%p2722_p6), %s3126_s3, 16, %s2726_s18, [#allocation11]  }
  0x42   : > { %s2334_s26 = scalar_lea.hbm %s3128_s5, 1024 }
  0x43   : > { %p2335_p11 = scmp.ne.s32.totalorder %s3128_s5, %s2334_s26  ;;  %p2341_p0 = scmp.lt.u32.totalorder %s2334_s26, %s3128_s5 }
  0x45   : > { %p2337_p12 = pnand %p2335_p11, %p2738_p8 }
  0x47   : > { %p2338_p13 = pneg %p2337_p12 }
  0x49   : > { %p2343_p2 = pnand %p2341_p0, %p2338_p13 }
  0x4b   : > { %2346 = shalt.err (!%p2343_p2)
}
  0x4c   : > { %s2347_s18 = scalar_lea.vmem %s2728_s21, 1024  ;;  %p2355_p4 = scmp.lt.s32.totalorder %s2728_s21, %s2728_s21 }
  0x4d   : > { %p2348_p5 = scmp.ne.s32.totalorder %s2728_s21, %s2347_s18  ;;  %p2356_p10 = scmp.lt.s32.totalorder %s2347_s18, %s2347_s18 }
  0x4f   : > { %p2350_p7 = pnand %p2348_p5, %p2738_p8  ;;  %p2357_p11 = por %p2356_p10, %p2355_p4 }
  0x51   : > { %p2351_p9 = pneg %p2350_p7 }
  0x53   : > { %p2358_p12 = pnand %p2357_p11, %p2351_p9 }
  0x55   : > { %2361 = shalt.err (!%p2358_p12)
}
  0x56   : > { %2089 = dma.hbm_to_vmem [thread:$0]  (!%p2722_p6), %s3128_s5, 1024, %s2728_s21, [#allocation14], %s2619_s17, %s2619_s17, %s2620_s20  }
  0x57   : > { %s2621_s23 = smov [#allocation16]   ;;  %s2622_s25 = smov [#allocation9]  }
  0x58   : > { %s337_s24 = sshll.u32 %s2621_s23, 4  ;;  %s280_s26 = sshll.u32 %s2622_s25, 4  ;;  %s338_s24 = int_to_ptr.vmem [resolvable:$true] %s337_s24  ;;  %s281_s26 = int_to_ptr.vmem [resolvable:$true] %s280_s26 }
  0x59   : > { %s2362_s13 = scalar_lea.hbm %s3130_s7, 16 }
  0x5a   : > { %p2363_p13 = scmp.ne.s32.totalorder %s3130_s7, %s2362_s13  ;;  %p2369_p5 = scmp.lt.u32.totalorder %s2362_s13, %s3130_s7 }
  0x5c   : > { %p2365_p0 = pnand %p2363_p13, %p2738_p8 }
  0x5e   : > { %p2366_p2 = pneg %p2365_p0 }
  0x60   : > { %p2371_p7 = pnand %p2369_p5, %p2366_p2 }
  0x62   : > { %2374 = shalt.err (!%p2371_p7)
}
  0x63   : > { %s2375_s21 = scalar_lea.vmem %s338_s24, 16  ;;  %s2382_s17 = scalar_lea.vmem %s338_s24, 32 }
  0x64   : > { %p2376_p9 = scmp.ne.s32.totalorder %s338_s24, %s2375_s21  ;;  %p2383_p11 = scmp.lt.s32.totalorder %s338_s24, %s338_s24 }
  0x65   : > { %p2384_p12 = scmp.lt.s32.totalorder %s2382_s17, %s2375_s21 }
  0x66   : > { %p2378_p4 = pnand %p2376_p9, %p2738_p8 }
  0x67   : > { %p2385_p1 = por %p2384_p12, %p2383_p11 }
  0x68   : > { %p2379_p10 = pneg %p2378_p4 }
  0x6a   : > { %p2386_p3 = pnand %p2385_p1, %p2379_p10 }
  0x6c   : > { %2389 = shalt.err (!%p2386_p3)
}
  0x6d   : > { %2095 = dma.hbm_to_vmem [thread:$0]  (!%p2722_p6), %s3130_s7, 16, %s338_s24, [#allocation17]  }
  0x6e   : > { %s2390_s25 = scalar_lea.hbm %s3125_s2, 16 }
  0x6f   : > { %p2391_p13 = scmp.ne.s32.totalorder %s3125_s2, %s2390_s25  ;;  %p2397_p3 = scmp.lt.u32.totalorder %s2390_s25, %s3125_s2 }
  0x71   : > { %p2393_p0 = pnand %p2391_p13, %p2738_p8 }
  0x73   : > { %p2394_p1 = pneg %p2393_p0 }
  0x75   : > { %p2399_p2 = pnand %p2397_p3, %p2394_p1 }
  0x77   : > { %2402 = shalt.err (!%p2399_p2)
}
  0x78   : > { %s2403_s18 = scalar_lea.vmem %s281_s26, 16  ;;  %s2410_s24 = scalar_lea.vmem %s281_s26, 32 }
  0x79   : > { %p2404_p5 = scmp.ne.s32.totalorder %s281_s26, %s2403_s18  ;;  %p2411_p4 = scmp.lt.s32.totalorder %s281_s26, %s281_s26 }
  0x7a   : > { %p2412_p10 = scmp.lt.s32.totalorder %s2410_s24, %s2403_s18 }
  0x7b   : > { %p2406_p7 = pnand %p2404_p5, %p2738_p8 }
  0x7c   : > { %p2413_p11 = por %p2412_p10, %p2411_p4 }
  0x7d   : > { %p2407_p9 = pneg %p2406_p7 }
  0x7f   : > { %p2414_p12 = pnand %p2413_p11, %p2407_p9 }
  0x81   : > { %2417 = shalt.err (!%p2414_p12)
}
  0x82   : > { %2080 = dma.hbm_to_vmem [thread:$0]  (!%p2722_p6), %s3125_s2, 16, %s281_s26, [#allocation8]  }
  0x83   : > { %s2623_s17 = smov [#allocation12]   ;;  %s2624_s9 = smov [#allocation15]  }
  0x84   : > { %s302_s20 = sshll.u32 %s2623_s17, 4  ;;  %s326_s1 = sshll.u32 %s2624_s9, 4  ;;  %s303_s20 = int_to_ptr.vmem [resolvable:$true] %s302_s20  ;;  %s327_s1 = int_to_ptr.vmem [resolvable:$true] %s326_s1 }
  0x85   : > { %s2418_s28 = scalar_lea.hbm %s3127_s4, 16 }
  0x86   : > { %p2419_p13 = scmp.ne.s32.totalorder %s3127_s4, %s2418_s28  ;;  %p2425_p3 = scmp.lt.u32.totalorder %s2418_s28, %s3127_s4 }
  0x88   : > { %p2421_p0 = pnand %p2419_p13, %p2738_p8 }
  0x8a   : > { %p2422_p1 = pneg %p2421_p0 }
  0x8c   : > { %p2427_p2 = pnand %p2425_p3, %p2422_p1 }
  0x8e   : > { %2430 = shalt.err (!%p2427_p2)
}
  0x8f   : > { %s2431_s26 = scalar_lea.vmem %s303_s20, 16  ;;  %s2438_s24 = scalar_lea.vmem %s303_s20, 32 }
  0x90   : > { %p2432_p5 = scmp.ne.s32.totalorder %s303_s20, %s2431_s26  ;;  %p2439_p4 = scmp.lt.s32.totalorder %s303_s20, %s303_s20 }
  0x91   : > { %p2440_p10 = scmp.lt.s32.totalorder %s2438_s24, %s2431_s26 }
  0x92   : > { %p2434_p7 = pnand %p2432_p5, %p2738_p8 }
  0x93   : > { %p2441_p11 = por %p2440_p10, %p2439_p4 }
  0x94   : > { %p2435_p9 = pneg %p2434_p7 }
  0x96   : > { %p2442_p12 = pnand %p2441_p11, %p2435_p9 }
  0x98   : > { %2445 = shalt.err (!%p2442_p12)
}
  0x99   : > { %2086 = dma.hbm_to_vmem [thread:$0]  (!%p2722_p6), %s3127_s4, 16, %s303_s20, [#allocation11]  }
  0x9a   : > { %s2446_s23 = scalar_lea.hbm %s3129_s6, 16 }
  0x9b   : > { %p2447_p13 = scmp.ne.s32.totalorder %s3129_s6, %s2446_s23  ;;  %p2453_p3 = scmp.lt.u32.totalorder %s2446_s23, %s3129_s6 }
  0x9d   : > { %p2449_p0 = pnand %p2447_p13, %p2738_p8 }
  0x9f   : > { %p2450_p1 = pneg %p2449_p0 }
  0xa1   : > { %p2455_p2 = pnand %p2453_p3, %p2450_p1 }
  0xa3   : > { %2458 = shalt.err (!%p2455_p2)
}
  0xa4   : > { %s2459_s14 = scalar_lea.vmem %s327_s1, 16  ;;  %s2466_s20 = scalar_lea.vmem %s327_s1, 32 }
  0xa5   : > { %p2460_p5 = scmp.ne.s32.totalorder %s327_s1, %s2459_s14  ;;  %p2467_p4 = scmp.lt.s32.totalorder %s327_s1, %s327_s1 }
  0xa6   : > { %p2468_p10 = scmp.lt.s32.totalorder %s2466_s20, %s2459_s14 }
  0xa7   : > { %p2462_p7 = pnand %p2460_p5, %p2738_p8 }
  0xa8   : > { %p2469_p11 = por %p2468_p10, %p2467_p4 }
  0xa9   : > { %p2463_p9 = pneg %p2462_p7 }
  0xab   : > { %p2470_p12 = pnand %p2469_p11, %p2463_p9 }
  0xad   : > { %2473 = shalt.err (!%p2470_p12)
}
  0xae   : > { %2092 = dma.hbm_to_vmem [thread:$0]  (!%p2722_p6), %s3129_s6, 16, %s327_s1, [#allocation14]  }
  0xaf   : > { %s2625_s24 = smov [#allocation18]   ;;  %s2474_s9 = scalar_lea.hbm %s3131_s8, 16 }
  0xb0   : > { %s348_s22 = sshll.u32 %s2625_s24, 4  ;;  %p2475_p13 = scmp.ne.s32.totalorder %s3131_s8, %s2474_s9  ;;  %s349_s22 = int_to_ptr.vmem [resolvable:$true] %s348_s22 }
  0xb1   : > { %p2481_p3 = scmp.lt.u32.totalorder %s2474_s9, %s3131_s8 }
  0xb2   : > { %p2477_p0 = pnand %p2475_p13, %p2738_p8 }
  0xb4   : > { %p2478_p1 = pneg %p2477_p0 }
  0xb6   : > { %p2483_p2 = pnand %p2481_p3, %p2478_p1 }
  0xb8   : > { %2486 = shalt.err (!%p2483_p2)
}
  0xb9   : > { %s2487_s1 = scalar_lea.vmem %s349_s22, 16  ;;  %s2494_s13 = scalar_lea.vmem %s349_s22, 32 }
  0xba   : > { %p2488_p5 = scmp.ne.s32.totalorder %s349_s22, %s2487_s1  ;;  %p2495_p4 = scmp.lt.s32.totalorder %s349_s22, %s349_s22 }
  0xbb   : > { %p2496_p10 = scmp.lt.s32.totalorder %s2494_s13, %s2487_s1 }
  0xbc   : > { %p2490_p7 = pnand %p2488_p5, %p2738_p8 }
  0xbd   : > { %p2497_p11 = por %p2496_p10, %p2495_p4 }
  0xbe   : > { %p2491_p9 = pneg %p2490_p7 }
  0xc0   : > { %p2498_p12 = pnand %p2497_p11, %p2491_p9 }
  0xc2   : > { %2501 = shalt.err (!%p2498_p12)
}
  0xc3   : > { %2098 = dma.hbm_to_vmem [thread:$0]  (!%p2722_p6), %s3131_s8, 16, %s349_s22, [#allocation17]  }
  0xc4   : > { %s1774_s27 = sadd.s32 4294967294, %s2614_s12   ;;  %s2904_s19 = sadd.s32 1, %s2614_s12  }
  0xc5   : > { %s33_s18 = ssub.s32 %s2614_s12, %s2904_s19  ;;  %s36_s26 = sadd.s32 1, %s2610_s11 }
  0xc6   : > { %p34_p8 = scmp.eq.s32.totalorder %s33_s18, 0  ;;  %p43_p13 = scmp.ne.s32.totalorder %s2610_s11, %s2606_s10 }
  0xc7   : > { %p44_p0 = scmp.eq.s32.totalorder %s2614_s12, 0  ;;  %p49_p1 = scmp.ne.s32.totalorder %s2606_s10, %s2602_s30 }
  0xc8   : > { %s2915_s24 = scalar_select %p34_p8, %s2610_s11, %s36_s26  }
  0xc9   : > { %p2917_p3 = por %p44_p0, %p43_p13  ;;  %p3144_p2 = scmp.eq.s32.totalorder %s2706_s15, 0 }
  0xca   : > { %p241_p5 = scmp.eq.s32.totalorder %s2706_s15, 1  ;;  %p247_p7 = scmp.eq.s32.totalorder %s1774_s27, 1 }
  0xcb   : > { %p2923_p6 = por %p3144_p2, %p49_p1  ;;  %p2115_p9 = scmp.lt.s32.totalorder %s2614_s12, 2 }
  0xcc   : > { %s359_s17 = sand.u32 1, %s2610_s11   ;;  %p2930_p4 = por %p241_p5, %p43_p13 }
  0xcd   : > { %p2934_p10 = por %p247_p7, %p49_p1  ;;  %s1785_s25 = sshll.u32 %s359_s17, 4 }
  0xce   : > { %s3146_s9 = scalar_select %p2930_p4, 1, 0 }
  0xcf   : > { %s3147_s23 = scalar_select %p2934_p10, 1, 0 }
  0xd0   : > { %s1890_s28 = sshll.u32 %s2614_s12, 8  ;;  %s363_s14 = scalar_lea.vmem [#allocation4], %s1785_s25 }
  0xd1   : > { %s2942_s13 = scalar_lea.hbm %s3123_s0, %s1890_s28  ;;  %s370_s20 = sshll.u32 %s363_s14, 4  ;;  %s2944_s20 = int_to_ptr.vmem [resolvable:$true] %s370_s20 }
  0xd2   : > { %p2948_p11 = pnand %p2115_p9, %p2917_p3  ;;  %s2952_s18 = scalar_lea.sflag [#allocation5], %s359_s17 }
  0xd3   : > { %s2502_s26 = scalar_lea.hbm %s2942_s13, 256  ;;  %s2507_s21 = scalar_lea.hbm %s3123_s0, 512 }
  0xd4   : > { %p2503_p12 = scmp.ne.s32.totalorder %s2942_s13, %s2502_s26  ;;  %p2504_p8 = pneg %p2948_p11 }
  0xd5   : > { %p2508_p1 = scmp.lt.u32.totalorder %s2942_s13, %s3123_s0  ;;  %p2509_p3 = scmp.lt.u32.totalorder %s2507_s21, %s2502_s26 }
  0xd6   : > { %p2505_p13 = pnand %p2504_p8, %p2503_p12  ;;  %p2511_p5 = scmp.lt.u32.totalorder %s2502_s26, %s2942_s13 }
  0xd7   : > { %p2510_p2 = por %p2509_p3, %p2508_p1 }
  0xd8   : > { %p2506_p0 = pneg %p2505_p13 }
  0xd9   : > { %p2512_p7 = por %p2511_p5, %p2510_p2 }
  0xdb   : > { %p2513_p9 = pnand %p2512_p7, %p2506_p0 }
  0xdd   : > { %2516 = shalt.err (!%p2513_p9)
}
  0xde   : > { %s2517_s17 = scalar_lea.vmem %s2944_s20, 256  ;;  %s2626_s14 = smov [#allocation4]  }
  0xdf   : > { %p2518_p12 = scmp.ne.s32.totalorder %s2944_s20, %s2517_s17  ;;  %s2522_s25 = sshll.u32 %s2626_s14, 4  ;;  %s2523_s25 = int_to_ptr.vmem [resolvable:$false] %s2522_s25 }
  0xe0   : > { %s2524_s28 = scalar_lea.vmem %s2523_s25, 512  ;;  %p2525_p4 = scmp.lt.s32.totalorder %s2944_s20, %s2523_s25 }
  0xe1   : > { %p2520_p13 = pnand %p2518_p12, %p2504_p8  ;;  %p2526_p1 = scmp.lt.s32.totalorder %s2524_s28, %s2517_s17 }
  0xe3   : > { %p2521_p10 = pneg %p2520_p13  ;;  %p2527_p3 = por %p2526_p1, %p2525_p4 }
  0xe5   : > { %p2528_p2 = pnand %p2527_p3, %p2521_p10 }
  0xe7   : > { %2531 = shalt.err (!%p2528_p2)
}
  0xe8   : > { %s2627_s26 = smov 128   ;;  %s2628_s21 = smov 8  }
  0xe9   : > { %2102 = dma.hbm_to_vmem [thread:$0]  (!%p2948_p11), %s2942_s13, 256, %s2944_s20, %s2952_s18, %s2627_s26, %s2627_s26, %s2628_s21  }
  0xea   : > { %p3149_p8 = scmp.ne.s32.totalorder %s3139_s16, 0 }
  0xeb   : > { %s2983_s29 = sand.u32 (!%p3149_p8), 1, %s2606_s10  }
  0xec   : > { %382 = sbr.rel (%p3149_p8) target bundleno = 1243 (0x4db), region = 56  ;;  %s1789_s1 = sshll.u32 (!%p3149_p8), %s2983_s29, 4 }
  0xed   : > { %s385_s17 = scalar_lea.sflag (!%p3149_p8), [#allocation5], %s2983_s29  ;;  %s2989_s14 = scalar_lea.vmem (!%p3149_p8), [#allocation4], %s1789_s1 }
  0xf3   : > { %2577 = dma.done.wait (%p2923_p6), %s385_s17, 256  }
  0xf4   : > { %2579 = vsyncadd (%p2923_p6), %s385_s17, 4294967040  ;;  %p3150_p4 = scmp.eq.s32.totalorder %s2706_s15, 0 }
  0xf6   : > { %2581 = dma.done.wait (%p3150_p4), [#allocation8], 9232   ;;  %p3151_p10 = pmov %p3150_p4 }
  0xf7   : > { %p3152_p11 = pmov %p3150_p4 }
  0xf8   : > { %2583 = vsyncadd (%p3151_p10), [#allocation8], 4294958064 }
  0xf9   : > { %2585 = dma.done.wait (%p3152_p11), [#allocation11], 32   ;;  %p3153_p0 = pmov %p3150_p4 }
  0xfb   : > { %2587 = vsyncadd (%p3153_p0), [#allocation11], 4294967264  ;;  %p3154_p5 = pmov %p3153_p0 }
  0xfc   : > { %p3155_p7 = pmov %p3153_p0 }
  0xfd   : > { %2589 = dma.done.wait (%p3154_p5), [#allocation14], 1040  }
  0xfe   : > { %2591 = vsyncadd (%p3155_p7), [#allocation14], 4294966256  ;;  %p3156_p6 = pmov %p3153_p0 }
  0xff   : > { %p3157_p9 = pmov %p3153_p0 }
 0x100   : > { %2593 = dma.done.wait (%p3156_p6), [#allocation17], 32  }
 0x101   : > { %2595 = vsyncadd (%p3157_p9), [#allocation17], 4294967264  ;;  %v2629_v0 = vmov 0.0   ;;  %v2174_v1 = vld [vmem:[#allocation7 + $0x40] sm:$0xff]   ;;  %v2178_v5 = vld [vmem:[#allocation7 + $0x48] sm:$0xff]   ;;  %vm2630_vm0 = vmmov 0  }
 0x102   : > { %458 = vst [vmem:[#allocation2] sm:$0xff] %v2629_v0  ;;  %459 = vst [vmem:[#allocation2 + $0x18] sm:$0xff] %v2629_v0  ;;  %v2175_v2 = vld [vmem:[#allocation7] sm:$0xff]   ;;  %1892 = vmatprep.subr.bf16.mxu0 %v2174_v1  ;;  %v2179_v6 = vld [vmem:[#allocation7 + $0x8] sm:$0xff]   ;;  %s1891_s16 = sshll.u32 %s2706_s15, 8  ;;  %s454_s22 = scalar_lea.vmem [#allocation19], %s1789_s1 }
 0x103   : > { %v2176_v3 = vld [vmem:[#allocation7 + $0xc0] sm:$0xff]   ;;  %1893 = vmatpush3.bf16.msra.mxu0 %v2175_v2  ;;  %v2180_v7 = vld [vmem:[#allocation7 + $0xc8] sm:$0xff]   ;;  %v2182_v9 = vld [vmem:[#allocation7 + $0x50] sm:$0xff]   ;;  %s1625_s13 = sshll.u32 %s454_s22, 4  ;;  %s3158_s18 = sld [smem:[#allocation27_spill]]  ;;  %s3078_s13 = int_to_ptr.vmem [resolvable:$true] %s1625_s13 }
 0x104   : > { %v2177_v4 = vld [vmem:[#allocation7 + $0x80] sm:$0xff]   ;;  %1914 = vmatprep.subr.bf16.mxu1 %v2176_v3  ;;  %1894 = vmatprep.subr.bf16.mxu0 %v2178_v5  ;;  %v2181_v8 = vld [vmem:[#allocation7 + $0x88] sm:$0xff]   ;;  %v2183_v10 = vld [vmem:[#allocation7 + $0x10] sm:$0xff]   ;;  %s1612_s15 = scalar_lea.sflag [#allocation6], %s2983_s29  ;;  %s2532_s28 = scalar_lea.vmem %s3078_s13, 256 }
 0x105   : > { %1915 = vmatpush3.bf16.msra.mxu1 %v2177_v4  ;;  %v2184_v11 = vld [vmem:[#allocation7 + $0xd0] sm:$0xff]   ;;  %v2186_v13 = vld [vmem:[#allocation7 + $0x58] sm:$0xff]   ;;  %v2190_v17 = vld [vmem:[#allocation7 + $0x60] sm:$0xff]   ;;  %p2533_p12 = scmp.ne.s32.totalorder %s3078_s13, %s2532_s28  ;;  %p3159_p13 = scmp.ne.s32.totalorder %s3146_s9, 0 }
 0x106   : > { %1916 = vmatprep.subr.bf16.mxu1 %v2180_v7  ;;  %v2185_v12 = vld [vmem:[#allocation7 + $0x90] sm:$0xff]   ;;  %v2187_v14 = vld [vmem:[#allocation7 + $0x18] sm:$0xff]   ;;  %v2191_v18 = vld [vmem:[#allocation7 + $0x20] sm:$0xff]   ;;  %s2632_s26 = smov [#allocation19]  }
 0x107   : > { %1895 = vmatpush3.bf16.msra.mxu0 %v2179_v6  ;;  %v2188_v15 = vld [vmem:[#allocation7 + $0xd8] sm:$0xff]   ;;  %v2192_v19 = vld [vmem:[#allocation7 + $0xe0] sm:$0xff]   ;;  %v2194_v21 = vld [vmem:[#allocation7 + $0x68] sm:$0xff]   ;;  %p2534_p1 = pnand %p2533_p12, %p3159_p13  ;;  %s2536_s21 = sshll.u32 %s2632_s26, 4  ;;  %s2537_s21 = int_to_ptr.vmem [resolvable:$false] %s2536_s21 }
 0x108   : > { %1896 = vmatprep.subr.bf16.mxu0 %v2182_v9  ;;  %v2189_v16 = vld [vmem:[#allocation7 + $0x98] sm:$0xff]   ;;  %v2193_v20 = vld [vmem:[#allocation7 + $0xa0] sm:$0xff]   ;;  %v2195_v22 = vld [vmem:[#allocation7 + $0x28] sm:$0xff]   ;;  %s2538_s1 = scalar_lea.vmem %s2537_s21, 512  ;;  %p2539_p2 = scmp.lt.s32.totalorder %s3078_s13, %s2537_s21 }
 0x109   : > { %1917 = vmatpush3.bf16.msra.mxu1 %v2181_v8  ;;  %v2196_v23 = vld [vmem:[#allocation7 + $0xe8] sm:$0xff]   ;;  %v2198_v25 = vld [vmem:[#allocation7 + $0x70] sm:$0xff]   ;;  %v2202_v29 = vld [vmem:[#allocation7 + $0x78] sm:$0xff]   ;;  %s3076_s25 = scalar_lea.hbm %s3158_s18, %s1891_s16  ;;  %p2535_p3 = pneg %p2534_p1 }
 0x10a   : > { %1918 = vmatprep.subr.bf16.mxu1 %v2184_v11  ;;  %v2197_v24 = vld [vmem:[#allocation7 + $0xa8] sm:$0xff]   ;;  %v2199_v26 = vld [vmem:[#allocation7 + $0x30] sm:$0xff]   ;;  %v2203_v30 = vld [vmem:[#allocation7 + $0x38] sm:$0xff]   ;;  %p2540_p8 = scmp.lt.s32.totalorder %s2538_s1, %s2532_s28 }
 0x10b   : > { %1897 = vmatpush3.bf16.msra.mxu0 %v2183_v10  ;;  %v2200_v27 = vld [vmem:[#allocation7 + $0xf0] sm:$0xff]   ;;  %v2204_v31 = vld [vmem:[#allocation7 + $0xf8] sm:$0xff]   ;;  %v2206_v35 = vld [vmem:[#allocation7 + $0x140] sm:$0xff]  }
 0x10c   : > { %1898 = vmatprep.subr.bf16.mxu0 %v2186_v13  ;;  %v2201_v28 = vld [vmem:[#allocation7 + $0xb0] sm:$0xff]   ;;  %v3017_v33 = vld [vmem:[%s2989_s14 + $0x8] sm:$0xff]  ;;  %v2208_v36 = vld [vmem:[#allocation7 + $0x1c0] sm:$0xff]   ;;  %p2541_p4 = por %p2540_p8, %p2539_p2 }
 0x10d   : > { %1919 = vmatpush3.bf16.msra.mxu1 %v2185_v12  ;;  %v3014_v32 = vld [vmem:[%s2989_s14] sm:$0xff]  ;;  %461 = vst [vmem:[#allocation2 + $0x10] sm:$0xff] %v3017_v33  ;;  %v2205_v34 = vld [vmem:[#allocation7 + $0xb8] sm:$0xff]   ;;  %v2210_v49 = vld [vmem:[#allocation7 + $0x148] sm:$0xff]  }
 0x10e   : > { %1920 = vmatprep.subr.bf16.mxu1 %v2188_v15  ;;  %460 = vst [vmem:[#allocation2 + $0x8] sm:$0xff] %v3014_v32  ;;  %v2207_v37 = vld [vmem:[#allocation7 + $0x100] sm:$0xff]   ;;  %v464_v40 = vpack.c.bf16 %v3014_v32, %v2629_v0  ;;  %v2212_v50 = vld [vmem:[#allocation7 + $0x1c8] sm:$0xff]   ;;  %v2214_v53 = vld [vmem:[#allocation7 + $0x150] sm:$0xff]   ;;  %p2542_p10 = pnand %p2541_p4, %p2535_p3 }
 0x10f   : > { %1899 = vmatpush3.bf16.msra.mxu0 %v2187_v14  ;;  %v2209_v42 = vld [vmem:[#allocation7 + $0x180] sm:$0xff]   ;;  %v2211_v51 = vld [vmem:[#allocation7 + $0x108] sm:$0xff]   ;;  %v2216_v54 = vld [vmem:[#allocation7 + $0x1d0] sm:$0xff]  }
 0x110   : > { %1900 = vmatprep.subr.bf16.mxu0 %v2190_v17  ;;  %v2213_v52 = vld [vmem:[#allocation7 + $0x188] sm:$0xff]   ;;  %v2215_v55 = vld [vmem:[#allocation7 + $0x110] sm:$0xff]   ;;  %v2218_v57 = vld [vmem:[#allocation7 + $0x158] sm:$0xff]  }
 0x111   : > { %1921 = vmatpush3.bf16.msra.mxu1 %v2189_v16  ;;  %v2217_v56 = vld [vmem:[#allocation7 + $0x190] sm:$0xff]   ;;  %v2220_v58 = vld [vmem:[#allocation7 + $0x1d8] sm:$0xff]   ;;  %v2222_v61 = vld [vmem:[#allocation7 + $0x160] sm:$0xff]  }
 0x112   : > { %1922 = vmatprep.subr.bf16.mxu1 %v2192_v19  ;;  %v2219_v59 = vld [vmem:[#allocation7 + $0x118] sm:$0xff]   ;;  %v2224_v62 = vld [vmem:[#allocation7 + $0x1e0] sm:$0xff]   ;;  %v2226_v2 = vld [vmem:[#allocation7 + $0x168] sm:$0xff]   ;;  %v480_v19 = vpack.c.bf16 %v3017_v33, %v3014_v32 }
 0x113   : > { %1901 = vmatpush3.bf16.msra.mxu0 %v2191_v18  ;;  %v2221_v60 = vld [vmem:[#allocation7 + $0x198] sm:$0xff]   ;;  %v2223_v63 = vld [vmem:[#allocation7 + $0x120] sm:$0xff]   ;;  %v2228_v3 = vld [vmem:[#allocation7 + $0x1e8] sm:$0xff]  }
 0x114   : > { %1902 = vmatprep.subr.bf16.mxu0 %v2194_v21  ;;  %v2225_v1 = vld [vmem:[#allocation7 + $0x1a0] sm:$0xff]   ;;  %v2227_v4 = vld [vmem:[#allocation7 + $0x128] sm:$0xff]   ;;  %v2230_v6 = vld [vmem:[#allocation7 + $0x170] sm:$0xff]  }
 0x115   : > { %1923 = vmatpush3.bf16.msra.mxu1 %v2193_v20  ;;  %v466_v38 = vld [vmem:[#allocation2 + $0x2] sm:$0xff]  ;;  %v3021_v39 = vld [vmem:[#allocation2 + $0xa] sm:$0xff]  ;;  %v2234_v10 = vld [vmem:[#allocation7 + $0x178] sm:$0xff]  }
 0x116   : > { %1924 = vmatprep.subr.bf16.mxu1 %v2196_v23  ;;  %v474_v41 = vld [vmem:[#allocation2 + $0x6] sm:$0xff]  ;;  %v468_v43 = vpack.c.bf16 %v3021_v39, %v466_v38  ;;  %v3026_v44 = vld [vmem:[#allocation2 + $0xe] sm:$0xff]  ;;  %v2236_v12 = vld [vmem:[#allocation7 + $0x1f8] sm:$0xff]  }
 0x117   : > { %1903 = vmatpush3.bf16.msra.mxu0 %v2195_v22  ;;  %v470_v45 = vld [vmem:[#allocation2 + $0x4] sm:$0xff]  ;;  %v3028_v46 = vld [vmem:[#allocation2 + $0xc] sm:$0xff]  ;;  %v476_v47 = vpack.c.bf16 %v3026_v44, %v474_v41  ;;  %v491_v14 = vld [vmem:[#allocation2 + $0x16] sm:$0xff] }
 0x118   : > { %1904 = vmatprep.subr.bf16.mxu0 %v2198_v25  ;;  %v472_v48 = vpack.c.bf16 %v3028_v46, %v470_v45  ;;  %1122 = vmatprep.mubr.bf16.mxu0 %v468_v43  ;;  %v2229_v5 = vld [vmem:[#allocation7 + $0x1a8] sm:$0xff]   ;;  %v2232_v7 = vld [vmem:[#allocation7 + $0x1f0] sm:$0xff]   ;;  %v2235_v15 = vld [vmem:[#allocation7 + $0x138] sm:$0xff]   ;;  %v492_v17 = vpack.c.bf16 %v491_v14, %v3026_v44 }
 0x119   : > { %1925 = vmatpush3.bf16.msra.mxu1 %v2197_v24  ;;  %1163 = vmatprep.mubr.bf16.mxu1 %v476_v47  ;;  %v2231_v8 = vld [vmem:[#allocation7 + $0x130] sm:$0xff]   ;;  %v2237_v16 = vld [vmem:[#allocation7 + $0x1b8] sm:$0xff]   ;;  %v2238_v20 = vld [vmem:[#allocation7 + $0x200] sm:$0xff]  }
 0x11a   : > { %1926 = vmatprep.subr.bf16.mxu1 %v2200_v27  ;;  %v2233_v9 = vld [vmem:[#allocation7 + $0x1b0] sm:$0xff]   ;;  %v2239_v22 = vld [vmem:[#allocation7 + $0x208] sm:$0xff]   ;;  %v2241_v24 = vld [vmem:[#allocation7 + $0x218] sm:$0xff]  }
 0x11b   : > { %1905 = vmatpush3.bf16.msra.mxu0 %v2199_v26  ;;  %v483_v11 = vld [vmem:[#allocation2 + $0x12] sm:$0xff]  ;;  %v2242_v25 = vld [vmem:[#allocation7 + $0x220] sm:$0xff]   ;;  %v2243_v26 = vld [vmem:[#allocation7 + $0x228] sm:$0xff]  }
 0x11c   : > { %1906 = vmatprep.subr.bf16.mxu0 %v2202_v29  ;;  %v484_v13 = vpack.c.bf16 %v483_v11, %v3021_v39  ;;  %v487_v18 = vld [vmem:[#allocation2 + $0x14] sm:$0xff]  ;;  %v496_v29 = vpack.c.bf16 %v2629_v0, %v3017_v33 }
 0x11d   : > { %1927 = vmatpush3.bf16.msra.mxu1 %v2201_v28  ;;  %v488_v21 = vpack.c.bf16 %v487_v18, %v3028_v46  ;;  %v2240_v23 = vld [vmem:[#allocation7 + $0x210] sm:$0xff]   ;;  %v2245_v28 = vld [vmem:[#allocation7 + $0x238] sm:$0xff]  }
 0x11e   : > { %1928 = vmatprep.subr.bf16.mxu1 %v2204_v31  ;;  %v2244_v27 = vld [vmem:[#allocation7 + $0x230] sm:$0xff]   ;;  %v1799_v31 = vld [vmem:[#allocation9] ss:$0 sm:$0xff] }
 0x11f   : > { %1907 = vmatpush3.bf16.msra.mxu0 %v2203_v30 }
 0x120   : > { %1936 = vmatprep.subr.bf16.mxu0 %v2206_v35 }
 0x121   : > { %1929 = vmatpush3.bf16.msra.mxu1 %v2205_v34 }
 0x122   : > { %1958 = vmatprep.subr.bf16.mxu1 %v2208_v36  ;;  %1123 = vmatmul.mubr.bf16.vlgmr.msra.gmra.mrb[0].mxu0 %v464_v40 }
 0x123   : > { %1937 = vmatpush3.bf16.msra.mxu0 %v2207_v37  ;;  %1204 = vmatprep.mubr.bf16.mxu0 %v484_v13 }
 0x124   : > { %1164 = vmatmul.mubr.bf16.vlgmr.msra.gmra.mrb[0].mxu1 %v472_v48  ;;  %1938 = vmatprep.subr.bf16.mxu0 %v2210_v49 }
 0x125   : > { %1959 = vmatpush3.bf16.msra.mxu1 %v2209_v42  ;;  %1245 = vmatprep.mubr.bf16.mxu1 %v492_v17 }
 0x126   : > { %1960 = vmatprep.subr.bf16.mxu1 %v2212_v50 }
 0x127   : > { %1939 = vmatpush3.bf16.msra.mxu0 %v2211_v51 }
 0x128   : > { %1940 = vmatprep.subr.bf16.mxu0 %v2214_v53 }
 0x129   : > { %1961 = vmatpush3.bf16.msra.mxu1 %v2213_v52 }
 0x12a   : > { %1962 = vmatprep.subr.bf16.mxu1 %v2216_v54 }
 0x12b   : > { %1941 = vmatpush3.bf16.msra.mxu0 %v2215_v55 }
 0x12c   : > { %1942 = vmatprep.subr.bf16.mxu0 %v2218_v57 }
 0x12d   : > { %1963 = vmatpush3.bf16.msra.mxu1 %v2217_v56 }
 0x12e   : > { %1964 = vmatprep.subr.bf16.mxu1 %v2220_v58 }
 0x12f   : > { %1943 = vmatpush3.bf16.msra.mxu0 %v2219_v59 }
 0x130   : > { %1944 = vmatprep.subr.bf16.mxu0 %v2222_v61 }
 0x131   : > { %1965 = vmatpush3.bf16.msra.mxu1 %v2221_v60 }
 0x132   : > { %1966 = vmatprep.subr.bf16.mxu1 %v2224_v62 }
 0x133   : > { %1945 = vmatpush3.bf16.msra.mxu0 %v2223_v63 }
 0x134   : > { %1946 = vmatprep.subr.bf16.mxu0 %v2226_v2 }
 0x135   : > { %1967 = vmatpush3.bf16.msra.mxu1 %v2225_v1 }
 0x136   : > { %1968 = vmatprep.subr.bf16.mxu1 %v2228_v3 }
 0x137   : > { %1947 = vmatpush3.bf16.msra.mxu0 %v2227_v4 }
 0x138   : > { %1948 = vmatprep.subr.bf16.mxu0 %v2230_v6 }
 0x139   : > { %1969 = vmatpush3.bf16.msra.mxu1 %v2229_v5 }
 0x13a   : > { %1970 = vmatprep.subr.bf16.mxu1 %v2232_v7 }
 0x13b   : > { %1949 = vmatpush3.bf16.msra.mxu0 %v2231_v8 }
 0x13c   : > { %1950 = vmatprep.subr.bf16.mxu0 %v2234_v10 }
 0x13d   : > { %1971 = vmatpush3.bf16.msra.mxu1 %v2233_v9 }
 0x13e   : > { %1972 = vmatprep.subr.bf16.mxu1 %v2236_v12 }
 0x13f   : > { %1951 = vmatpush3.bf16.msra.mxu0 %v2235_v15 }
 0x140   : > { %1998 = vmatprep.subr.bf16.mxu0 %v2629_v0 }
 0x141   : > { %1973 = vmatpush3.bf16.msra.mxu1 %v2237_v16 }
 0x142   : > { %2018 = vmatprep.subr.bf16.mxu1 %v2629_v0  ;;  %1205 = vmatmul.mubr.bf16.vlgmr.msra.gmra.mrb[4].mxu0 %v480_v19 }
 0x143   : > { %1999 = vmatpush3.bf16.msra.mxu0 %v2238_v20  ;;  %2014 = vmatprep.mubr.msk.bf16.mxu0 %vm2630_vm0, %v2629_v0 }
 0x144   : > { %1246 = vmatmul.mubr.bf16.vlgmr.msra.gmra.mrb[4].mxu1 %v488_v21  ;;  %2000 = vmatprep.subr.bf16.mxu0 %v2629_v0 }
 0x145   : > { %2034 = vmatprep.mubr.msk.bf16.mxu1 %vm2630_vm0, %v2629_v0 }
 0x147   : > { %2001 = vmatpush3.bf16.msra.mxu0 %v2239_v22 }
 0x148   : > { %2002 = vmatprep.subr.bf16.mxu0 %v2629_v0 }
 0x14b   : > { %2003 = vmatpush3.bf16.msra.mxu0 %v2240_v23 }
 0x14c   : > { %2004 = vmatprep.subr.bf16.mxu0 %v2629_v0 }
 0x14f   : > { %2005 = vmatpush3.bf16.msra.mxu0 %v2241_v24 }
 0x150   : > { %2006 = vmatprep.subr.bf16.mxu0 %v2629_v0 }
 0x153   : > { %2007 = vmatpush3.bf16.msra.mxu0 %v2242_v25 }
 0x154   : > { %2008 = vmatprep.subr.bf16.mxu0 %v2629_v0 }
 0x157   : > { %2009 = vmatpush3.bf16.msra.mxu0 %v2243_v26 }
 0x158   : > { %2010 = vmatprep.subr.bf16.mxu0 %v2629_v0 }
 0x15b   : > { %2011 = vmatpush3.bf16.msra.mxu0 %v2244_v27 }
 0x15c   : > { %2012 = vmatprep.subr.bf16.mxu0 %v2629_v0 }
 0x15f   : > { %2013 = vmatpush3.bf16.msra.mxu0 %v2245_v28 }
 0x162   : > { %2015 = vmatmul.mubr.bf16.vlgmr.msra.gmra.mrb[8].mxu0 %v496_v29 }
 0x1f5   : > { %v1908_v30 = vpop.f32.mrb[0].mxu0 }
 0x1f6   : > { %v1909_v34 = vpop.f32.mrb[1].mxu0 }
 0x1f7   : > { %v1930_v35 = vpop.f32.mrb[0].mxu1  ;;  %v1910_v36 = vadd.f32 %v1909_v34, %v1908_v30  ;;  %v1911_v37 = vpop.f32.mrb[2].mxu0 }
 0x1f8   : > { %v1931_v38 = vpop.f32.mrb[1].mxu1  ;;  %v1912_v39 = vpop.f32.mrb[3].mxu0 }
 0x1f9   : > { %v1932_v40 = vadd.f32 %v1931_v38, %v1930_v35  ;;  %v1933_v41 = vpop.f32.mrb[2].mxu1  ;;  %v1125_v42 = vadd.f32 %v1910_v36, %v1799_v31  ;;  %v1913_v43 = vadd.f32 %v1912_v39, %v1911_v37 }
 0x1fa   : > { %v1934_v44 = vpop.f32.mrb[3].mxu1 }
 0x1fb   : > { %v1935_v45 = vadd.f32 %v1934_v44, %v1933_v41  ;;  %v1128_v46 = vadd.f32 %v1913_v43, %v1799_v31  ;;  %v1166_v47 = vadd.f32 %v1932_v40, %v1125_v42 }
 0x1fd   : > { %v1169_v48 = vadd.f32 %v1935_v45, %v1128_v46 }
 0x215   : > { %v1952_v49 = vpop.f32.mrb[4].mxu0 }
 0x216   : > { %v1953_v50 = vpop.f32.mrb[5].mxu0 }
 0x217   : > { %v1974_v51 = vpop.f32.mrb[4].mxu1  ;;  %v1954_v52 = vadd.f32 %v1953_v50, %v1952_v49  ;;  %v1955_v53 = vpop.f32.mrb[6].mxu0 }
 0x218   : > { %v1975_v54 = vpop.f32.mrb[5].mxu1  ;;  %v1956_v55 = vpop.f32.mrb[7].mxu0 }
 0x219   : > { %v1976_v56 = vadd.f32 %v1975_v54, %v1974_v51  ;;  %v1977_v57 = vpop.f32.mrb[6].mxu1  ;;  %v1207_v58 = vadd.f32 %v1954_v52, %v1166_v47  ;;  %v1957_v59 = vadd.f32 %v1956_v55, %v1955_v53 }
 0x21a   : > { %v1978_v60 = vpop.f32.mrb[7].mxu1 }
 0x21b   : > { %v1979_v61 = vadd.f32 %v1978_v60, %v1977_v57  ;;  %v1210_v62 = vadd.f32 %v1957_v59, %v1169_v48  ;;  %v1248_v63 = vadd.f32 %v1976_v56, %v1207_v58  ;;  %v2631_v48 = vmov -1.0  }
 0x21d   : > { %v1251_v1 = vadd.f32 %v1979_v61, %v1210_v62 }
 0x235   : > { %v1288_v2 = vpop.f32.mrb[8].mxu0 }
 0x236   : > { %v1289_v3 = vadd.f32 %v1288_v2, %v1248_v63  ;;  %v2016_v4 = vpop.f32.mrb[9].mxu0  ;;  %v2246_v63 = vld [vmem:[#allocation13] sm:$0xff]   ;;  %v2248_v2 = vld [vmem:[#allocation13 + $0x10] sm:$0xff]  }
 0x237   : > { %v1291_v5 = vpop.f32.mrb[10].mxu0  ;;  %2019 = vmatpush3.bf16.msra.mxu1 %v2246_v63  ;;  %v2250_v4 = vld [vmem:[#allocation13 + $0x20] sm:$0xff]  }
 0x238   : > { %v1297_v6 = vmul.f32 0.70710677, %v1289_v3  ;;  %v1292_v7 = vadd.f32 %v1291_v5, %v1251_v1  ;;  %v2017_v8 = vpop.f32.mrb[11].mxu0  ;;  %v1295_v53 = vmul.f32 0.5, %v1289_v3  ;;  %2020 = vmatprep.subr.bf16.mxu1 %v2629_v0  ;;  %v2247_v1 = vld [vmem:[#allocation13 + $0x8] sm:$0xff]   ;;  %v2249_v3 = vld [vmem:[#allocation13 + $0x18] sm:$0xff]  }
 0x239   : > { %v2251_v5 = vld [vmem:[#allocation13 + $0x28] sm:$0xff]  }
 0x23a   : > { %v1303_v9 = vand.u32 2147483647, %v1297_v6  ;;  %v1298_v10 = vmul.f32 0.70710677, %v1292_v7  ;;  %vm1299_vm1 = vcmp.ge.f32.partialorder %v1297_v6, 0.0  ;;  %v1296_v58 = vmul.f32 0.5, %v1292_v7 }
 0x23b   : > { %v1301_v49 = vsel %vm1299_vm1, 1.0, %v2631_v48  ;;  %2021 = vmatpush3.bf16.msra.mxu1 %v2247_v1  ;;  %v2252_v6 = vld [vmem:[#allocation13 + $0x30] sm:$0xff]   ;;  %v2253_v7 = vld [vmem:[#allocation13 + $0x38] sm:$0xff]  }
 0x23c   : > { %v1305_v11 = vmul.f32 0.3275911, %v1303_v9  ;;  %v1304_v12 = vand.u32 2147483647, %v1298_v10  ;;  %v1329_v16 = vsub.f32 0.0, %v1303_v9  ;;  %vm1300_vm2 = vcmp.ge.f32.partialorder %v1298_v10, 0.0  ;;  %2022 = vmatprep.subr.bf16.mxu1 %v2629_v0 }
 0x23d   : > { %v1302_v54 = vsel %vm1300_vm2, 1.0, %v2631_v48 }
 0x23e   : > { %v1307_v13 = vadd.f32 1.0, %v1305_v11  ;;  %v1306_v14 = vmul.f32 0.3275911, %v1304_v12  ;;  %v1330_v17 = vsub.f32 0.0, %v1304_v12  ;;  %v1331_v19 = vmul.f32 %v1329_v16, %v1303_v9 }
 0x23f   : > { %2023 = vmatpush3.bf16.msra.mxu1 %v2248_v2 }
 0x240   : > { %2254 = vrcp.f32 %v1307_v13  ;;  %v1308_v15 = vadd.f32 1.0, %v1306_v14  ;;  %v1332_v22 = vmul.f32 %v1330_v17, %v1304_v12  ;;  %v1333_v24 = vmul.f32 1.442695, %v1331_v19  ;;  %2024 = vmatprep.subr.bf16.mxu1 %v2629_v0 }
 0x242   : > { %2256 = vrcp.f32 %v1308_v15  ;;  %v1335_v28 = vmul.f32 1.442695, %v1332_v22 }
 0x243   : > { %2258 = vpow2.f32 %v1333_v24  ;;  %2025 = vmatpush3.bf16.msra.mxu1 %v2249_v3 }
 0x244   : > { %2260 = vpow2.f32 %v1335_v28  ;;  %2026 = vmatprep.subr.bf16.mxu1 %v2629_v0 }
 0x247   : > { %2027 = vmatpush3.bf16.msra.mxu1 %v2250_v4 }
 0x248   : > { %2028 = vmatprep.subr.bf16.mxu1 %v2629_v0 }
 0x24a   : > { %v2255_v18 = vpop.eup %2254 }
 0x24b   : > { %v1311_v20 = vmul.f32 1.0614054, %v2255_v18  ;;  %2029 = vmatpush3.bf16.msra.mxu1 %v2251_v5 }
 0x24c   : > { %v2257_v21 = vpop.eup %2256  ;;  %2030 = vmatprep.subr.bf16.mxu1 %v2629_v0 }
 0x24d   : > { %v1313_v23 = vadd.f32 -1.4531521, %v1311_v20  ;;  %v1312_v25 = vmul.f32 1.0614054, %v2257_v21  ;;  %v2259_v42 = vpop.eup %2258 }
 0x24e   : > { %v2261_v46 = vpop.eup %2260 }
 0x24f   : > { %v1315_v26 = vmul.f32 %v2255_v18, %v1313_v23  ;;  %v1314_v27 = vadd.f32 -1.4531521, %v1312_v25  ;;  %2031 = vmatpush3.bf16.msra.mxu1 %v2252_v6  ;;  %v1872_v25 = vld [vmem:[#allocation10] ss:$0 sm:$0xff] }
 0x250   : > { %2032 = vmatprep.subr.bf16.mxu1 %v2629_v0 }
 0x251   : > { %v1317_v29 = vadd.f32 1.4214138, %v1315_v26  ;;  %v1316_v30 = vmul.f32 %v2257_v21, %v1314_v27 }
 0x253   : > { %v1319_v31 = vmul.f32 %v2255_v18, %v1317_v29  ;;  %v1318_v34 = vadd.f32 1.4214138, %v1316_v30  ;;  %2033 = vmatpush3.bf16.msra.mxu1 %v2253_v7  ;;  %v1873_v30 = vld [vmem:[#allocation12] ss:$0 sm:$0xff] }
 0x255   : > { %v1321_v35 = vadd.f32 -0.28449672, %v1319_v31  ;;  %v1320_v36 = vmul.f32 %v2257_v21, %v1318_v34 }
 0x257   : > { %v1323_v37 = vmul.f32 %v2255_v18, %v1321_v35  ;;  %v1322_v38 = vadd.f32 -0.28449672, %v1320_v36 }
 0x259   : > { %v1325_v39 = vadd.f32 0.2548296, %v1323_v37  ;;  %v1324_v40 = vmul.f32 %v2257_v21, %v1322_v38 }
 0x25b   : > { %v1327_v41 = vmul.f32 %v2255_v18, %v1325_v39  ;;  %v1326_v43 = vadd.f32 0.2548296, %v1324_v40  ;;  %v1874_v40 = vld [vmem:[#allocation15] ss:$0 sm:$0xff] }
 0x25d   : > { %v1337_v44 = vmul.f32 %v2259_v42, %v1327_v41  ;;  %v1328_v45 = vmul.f32 %v2257_v21, %v1326_v43 }
 0x25f   : > { %v1339_v47 = vsub.f32 1.0, %v1337_v44  ;;  %v1338_v50 = vmul.f32 %v2261_v46, %v1328_v45 }
 0x261   : > { %v1341_v51 = vmul.f32 %v1339_v47, %v1301_v49  ;;  %v1340_v52 = vsub.f32 1.0, %v1338_v50 }
 0x263   : > { %v1343_v55 = vadd.f32 1.0, %v1341_v51  ;;  %v1342_v56 = vmul.f32 %v1340_v52, %v1302_v54 }
 0x265   : > { %v1345_v57 = vmul.f32 %v1343_v55, %v1295_v53  ;;  %v1344_v59 = vadd.f32 1.0, %v1342_v56 }
 0x267   : > { %1349 = vadd.xlane.f32.xlu0 %v1345_v57  ;;  %v1356_v60 = vmul.f32 %v1345_v57, %v1345_v57  ;;  %v1346_v61 = vmul.f32 %v1344_v59, %v1296_v58 }
 0x269   : > { %1358 = vadd.xlane.f32.xlu1 %v1356_v60  ;;  %v1357_v62 = vmul.f32 %v1346_v61, %v1346_v61 }
 0x26b   : > { %1351 = vadd.xlane.f32.xlu0 %v1346_v61 }
 0x26d   : > { %1360 = vadd.xlane.f32.xlu1 %v1357_v62 }
 0x2f4   : > { %v1350_v8 = vpop.xlane.xlu0 %1349 }
 0x2f5   : > { %v1354_v9 = vmul.f32 0.0078125, %v1350_v8 }
 0x2f6   : > { %v1359_v10 = vpop.xlane.xlu1 %1358 }
 0x2f7   : > { %v1364_v11 = vmul.f32 %v1354_v9, %v1354_v9  ;;  %v1362_v12 = vmul.f32 0.0078125, %v1359_v10  ;;  %v1370_v0 = vsub.f32 %v1345_v57, %v1354_v9 }
 0x2f8   : > { %v1352_v13 = vpop.xlane.xlu0 %1351 }
 0x2f9   : > { %v1366_v14 = vsub.f32 %v1362_v12, %v1364_v11  ;;  %v1355_v15 = vmul.f32 0.0078125, %v1352_v13 }
 0x2fa   : > { %v1361_v16 = vpop.xlane.xlu1 %1360 }
 0x2fb   : > { %v1368_v17 = vmax.f32 %v1366_v14, 0.0  ;;  %v1365_v18 = vmul.f32 %v1355_v15, %v1355_v15  ;;  %v1363_v19 = vmul.f32 0.0078125, %v1361_v16  ;;  %v1371_v27 = vsub.f32 %v1346_v61, %v1355_v15 }
 0x2fd   : > { %v1372_v20 = vadd.f32 1e-05, %v1368_v17  ;;  %v1367_v21 = vsub.f32 %v1363_v19, %v1365_v18 }
 0x2ff   : > { %2262 = vrsqrt.f32 %v1372_v20  ;;  %v1369_v22 = vmax.f32 %v1367_v21, 0.0 }
 0x301   : > { %v1373_v23 = vadd.f32 1e-05, %v1369_v22 }
 0x303   : > { %2264 = vrsqrt.f32 %v1373_v23 }
 0x309   : > { %v2263_v24 = vpop.eup %2262 }
 0x30a   : > { %v1376_v26 = vmul.f32 %v2263_v24, %v1370_v0 }
 0x30c   : > { %v1384_v28 = vmul.f32 %v1872_v25, %v1376_v26 }
 0x30d   : > { %v2265_v29 = vpop.eup %2264 }
 0x30e   : > { %v1377_v31 = vmul.f32 %v2265_v29, %v1371_v27  ;;  %v1392_v35 = vadd.f32 %v1873_v30, %v1384_v28 }
 0x310   : > { %v1385_v34 = vmul.f32 %v1872_v25, %v1377_v31  ;;  %v3060_v37 = vadd.f32 %v1392_v35, %v3014_v32 }
 0x312   : > { %v1393_v36 = vadd.f32 %v1873_v30, %v1385_v34 }
 0x314   : > { %v3063_v38 = vadd.f32 %v1393_v36, %v3017_v33 }
 0x316   : > { %v1396_v39 = vpack.c.bf16 %v3063_v38, %v3060_v37 }
 0x318   : > { %2035 = vmatmul.mubr.bf16.vlgmr.msra.gmra.mrb[8].mxu1 %v1396_v39 }
 0x3eb   : > { %v1502_v41 = vpop.f32.mrb[8].mxu1 }
 0x3ec   : > { %v1503_v42 = vadd.f32 %v1874_v40, %v1502_v41  ;;  %v2036_v43 = vpop.f32.mrb[9].mxu1 }
 0x3ed   : > { %v1505_v44 = vpop.f32.mrb[10].mxu1 }
 0x3ee   : > { %v1511_v45 = vmul.f32 0.70710677, %v1503_v42  ;;  %v1506_v46 = vadd.f32 %v1874_v40, %v1505_v44  ;;  %v2037_v47 = vpop.f32.mrb[11].mxu1  ;;  %v1509_v24 = vmul.f32 0.5, %v1503_v42 }
 0x3f0   : > { %v1517_v49 = vand.u32 2147483647, %v1511_v45  ;;  %v1512_v50 = vmul.f32 0.70710677, %v1506_v46  ;;  %vm1513_vm3 = vcmp.ge.f32.partialorder %v1511_v45, 0.0  ;;  %v1510_v29 = vmul.f32 0.5, %v1506_v46 }
 0x3f1   : > { %v1515_v21 = vsel %vm1513_vm3, 1.0, %v2631_v48 }
 0x3f2   : > { %v1519_v51 = vmul.f32 0.3275911, %v1517_v49  ;;  %v1518_v32 = vand.u32 2147483647, %v1512_v50  ;;  %v1543_v54 = vsub.f32 0.0, %v1517_v49  ;;  %vm1514_vm4 = vcmp.ge.f32.partialorder %v1512_v50, 0.0 }
 0x3f3   : > { %v1516_v25 = vsel %vm1514_vm4, 1.0, %v2631_v48 }
 0x3f4   : > { %v1521_v52 = vadd.f32 1.0, %v1519_v51  ;;  %v1520_v53 = vmul.f32 0.3275911, %v1518_v32  ;;  %v1544_v55 = vsub.f32 0.0, %v1518_v32  ;;  %v1545_v57 = vmul.f32 %v1543_v54, %v1517_v49  ;;  %v1883_v54 = vld [vmem:[#allocation16] ss:$0 sm:$0xff] }
 0x3f6   : > { %2266 = vrcp.f32 %v1521_v52  ;;  %v1522_v33 = vadd.f32 1.0, %v1520_v53  ;;  %v1546_v60 = vmul.f32 %v1544_v55, %v1518_v32  ;;  %v1547_v62 = vmul.f32 1.442695, %v1545_v57  ;;  %v1884_v57 = vld [vmem:[#allocation18] ss:$0 sm:$0xff] }
 0x3f8   : > { %2268 = vrcp.f32 %v1522_v33  ;;  %v1549_v3 = vmul.f32 1.442695, %v1546_v60 }
 0x3f9   : > { %2270 = vpow2.f32 %v1547_v62 }
 0x3fa   : > { %2272 = vpow2.f32 %v1549_v3 }
 0x400   : > { %v2267_v56 = vpop.eup %2266 }
 0x401   : > { %v1525_v58 = vmul.f32 1.0614054, %v2267_v56 }
 0x402   : > { %v2269_v59 = vpop.eup %2268 }
 0x403   : > { %v1527_v61 = vadd.f32 -1.4531521, %v1525_v58  ;;  %v1526_v63 = vmul.f32 1.0614054, %v2269_v59  ;;  %v2271_v15 = vpop.eup %2270 }
 0x404   : > { %v2273_v19 = vpop.eup %2272 }
 0x405   : > { %v1529_v1 = vmul.f32 %v2267_v56, %v1527_v61  ;;  %v1528_v2 = vadd.f32 -1.4531521, %v1526_v63 }
 0x407   : > { %v1531_v4 = vadd.f32 1.4214138, %v1529_v1  ;;  %v1530_v5 = vmul.f32 %v2269_v59, %v1528_v2 }
 0x409   : > { %v1533_v6 = vmul.f32 %v2267_v56, %v1531_v4  ;;  %v1532_v7 = vadd.f32 1.4214138, %v1530_v5 }
 0x40b   : > { %v1535_v8 = vadd.f32 -0.28449672, %v1533_v6  ;;  %v1534_v9 = vmul.f32 %v2269_v59, %v1532_v7 }
 0x40d   : > { %v1537_v10 = vmul.f32 %v2267_v56, %v1535_v8  ;;  %v1536_v11 = vadd.f32 -0.28449672, %v1534_v9 }
 0x40f   : > { %v1539_v12 = vadd.f32 0.2548296, %v1537_v10  ;;  %v1538_v13 = vmul.f32 %v2269_v59, %v1536_v11 }
 0x411   : > { %v1541_v14 = vmul.f32 %v2267_v56, %v1539_v12  ;;  %v1540_v16 = vadd.f32 0.2548296, %v1538_v13 }
 0x413   : > { %v1551_v17 = vmul.f32 %v2271_v15, %v1541_v14  ;;  %v1542_v18 = vmul.f32 %v2269_v59, %v1540_v16 }
 0x415   : > { %v1553_v20 = vsub.f32 1.0, %v1551_v17  ;;  %v1552_v22 = vmul.f32 %v2273_v19, %v1542_v18 }
 0x417   : > { %v1555_v23 = vmul.f32 %v1553_v20, %v1515_v21  ;;  %v1554_v0 = vsub.f32 1.0, %v1552_v22 }
 0x419   : > { %v1557_v26 = vadd.f32 1.0, %v1555_v23  ;;  %v1556_v27 = vmul.f32 %v1554_v0, %v1516_v25 }
 0x41b   : > { %v1559_v28 = vmul.f32 %v1557_v26, %v1509_v24  ;;  %v1558_v30 = vadd.f32 1.0, %v1556_v27 }
 0x41d   : > { %1563 = vadd.xlane.f32.xlu0 %v1559_v28  ;;  %v1560_v31 = vmul.f32 %v1558_v30, %v1510_v29  ;;  %v1569_v34 = vmul.f32 %v1559_v28, %v1559_v28 }
 0x41f   : > { %1565 = vadd.xlane.f32.xlu1 %v1560_v31  ;;  %v1570_v35 = vmul.f32 %v1560_v31, %v1560_v31 }
 0x421   : > { %1571 = vadd.xlane.f32.xlu0 %v1569_v34 }
 0x423   : > { %1573 = vadd.xlane.f32.xlu1 %v1570_v35 }
 0x4aa   : > { %v1564_v36 = vpop.xlane.xlu0 %1563 }
 0x4ab   : > { %v1567_v39 = vmul.f32 0.0078125, %v1564_v36 }
 0x4ac   : > { %v1566_v40 = vpop.xlane.xlu1 %1565 }
 0x4ad   : > { %v1568_v41 = vmul.f32 0.0078125, %v1566_v40  ;;  %v1577_v42 = vmul.f32 %v1567_v39, %v1567_v39  ;;  %v1583_v53 = vsub.f32 %v1559_v28, %v1567_v39 }
 0x4ae   : > { %v1572_v43 = vpop.xlane.xlu0 %1571 }
 0x4af   : > { %v1575_v44 = vmul.f32 0.0078125, %v1572_v43  ;;  %v1578_v47 = vmul.f32 %v1568_v41, %v1568_v41  ;;  %v1584_v56 = vsub.f32 %v1560_v31, %v1568_v41 }
 0x4b0   : > { %v1574_v45 = vpop.xlane.xlu1 %1573 }
 0x4b1   : > { %v1579_v48 = vsub.f32 %v1575_v44, %v1577_v42  ;;  %v1576_v49 = vmul.f32 0.0078125, %v1574_v45 }
 0x4b3   : > { %v1581_v46 = vmax.f32 %v1579_v48, 0.0  ;;  %v1580_v50 = vsub.f32 %v1576_v49, %v1578_v47 }
 0x4b5   : > { %v1585_v51 = vadd.f32 1e-05, %v1581_v46  ;;  %v1582_v32 = vmax.f32 %v1580_v50, 0.0 }
 0x4b7   : > { %2274 = vrsqrt.f32 %v1585_v51  ;;  %v1586_v52 = vadd.f32 1e-05, %v1582_v32 }
 0x4b9   : > { %2276 = vrsqrt.f32 %v1586_v52 }
 0x4c1   : > { %v2275_v33 = vpop.eup %2274 }
 0x4c2   : > { %v1589_v55 = vmul.f32 %v2275_v33, %v1583_v53 }
 0x4c3   : > { %v2277_v58 = vpop.eup %2276 }
 0x4c4   : > { %v1597_v59 = vmul.f32 %v1883_v54, %v1589_v55  ;;  %v1590_v60 = vmul.f32 %v2277_v58, %v1584_v56 }
 0x4c6   : > { %v1605_v61 = vadd.f32 %v1884_v57, %v1597_v59  ;;  %v1598_v62 = vmul.f32 %v1883_v54, %v1590_v60 }
 0x4c8   : > { %v1607_v63 = vadd.f32 %v1605_v61, %v3060_v37  ;;  %v1606_v1 = vadd.f32 %v1884_v57, %v1598_v62 }
 0x4ca   : > { %1609 = vst [vmem:[%s454_s22] sm:$0xff] %v1607_v63  ;;  %v1608_v2 = vadd.f32 %v1606_v1, %v3063_v38 }
 0x4cc   : > { %1610 = vst [vmem:[%s454_s22 + $0x8] sm:$0xff] %v1608_v2 }
 0x4cd   : > { %2545 = shalt.err (!%p2542_p10)
}
 0x4ce   : > { %s2546_s17 = scalar_lea.hbm %s3076_s25, 256  ;;  %s2550_s22 = scalar_lea.hbm %s3158_s18, 512 }
 0x4cf   : > { %p2547_p11 = scmp.ne.s32.totalorder %s3076_s25, %s2546_s17  ;;  %p2551_p7 = scmp.lt.u32.totalorder %s3076_s25, %s3158_s18 }
 0x4d0   : > { %p2552_p6 = scmp.lt.u32.totalorder %s2550_s22, %s2546_s17  ;;  %p2554_p12 = scmp.lt.u32.totalorder %s2546_s17, %s3076_s25 }
 0x4d1   : > { %p2548_p0 = pnand %p2547_p11, %p3159_p13 }
 0x4d2   : > { %p2553_p9 = por %p2552_p6, %p2551_p7 }
 0x4d3   : > { %p2549_p5 = pneg %p2548_p0 }
 0x4d4   : > { %p2555_p1 = por %p2554_p12, %p2553_p9 }
 0x4d6   : > { %p2556_p3 = pnand %p2555_p1, %p2549_p5 }
 0x4d8   : > { %2559 = shalt.err (!%p2556_p3)
}
 0x4d9   : > { %s2633_s28 = smov 128   ;;  %s2634_s26 = smov 8  }
 0x4da   : > { %2072 = dma.vmem_to_hbm [thread:$0]  (%p3159_p13), %s3078_s13, 256, %s3076_s25, %s1612_s15, %s2633_s28, %s2633_s28, %s2634_s26  }
 0x4db PF: > { %s1640_s21 = sand.u32 1, %s2602_s30   ;;  %p3160_p2 = scmp.ne.s32.totalorder %s3147_s23, 0 }
 0x4dc   : > { %p3161_p8 = scmp.ge.s32.totalorder %s2614_s12, 2  ;;  %s1641_s1 = scalar_lea.sflag [#allocation6], %s1640_s21 }
 0x4de   : > { %p2104_p4 = pnand %p3161_p8, %p3160_p2 }
 0x4e0   : > { %2597 = dma.done.wait (!%p2104_p4), %s1641_s1, 256  }
 0x4e1   : > { %2599 = vsyncadd (!%p2104_p4), %s1641_s1, 4294967040  ;;  %p26_p10 = scmp.ge.s32.totalorder %s2904_s19, 4   ;;  %s3162_s30 = smov %s2606_s10 }
 0x4e2   : > { %s3163_s10 = smov %s2610_s11  ;;  %s3164_s11 = smov %s2915_s24 }
 0x4e3   : > { %s3165_s12 = smov %s2904_s19  ;;  %28 = sbr.rel (!%p26_p10) target bundleno = 12 (0xc), region = 133 }
 0x4ea   :  { %1646 = vsyncpa [#allocation5], 1 }
 0x4eb   :  { %1648 = vsyncpa [#allocation5 + $0x1], 1 }
 0x4ec   :  { %1649 = vsyncpa [#allocation8], 1 }
 0x4ed   :  { %1650 = vsyncpa [#allocation11], 1 }
 0x4ee   :  { %1651 = vsyncpa [#allocation14], 1 }
 0x4ef   :  { %1652 = vsyncpa [#allocation17], 1 }
 0x4f0   :  { %1653 = vsyncpa [#allocation6], 1 }
 0x4f1   :  { %1655 = vsyncpa [#allocation6 + $0x1], 1 }

// kernel: gpn_forward.4
= control target key start
LH: loop header
LB: loop body
LE: loop exit
PB: predicated region body
PF: predicated region fallthrough
CT: control target
= control target key end

     0   :  { %s3111_s0 = inlined_call_operand.hbm [shape: f32[2,16,128], index: 0, kind: input, shape index: {}, may-alias: {0,9}]   ;;  %s3112_s1 = inlined_call_operand.hbm [shape: bf16[1152,128], index: 1, kind: input, shape index: {}]   ;;  %s3113_s2 = inlined_call_operand.hbm [shape: f32[1,128], index: 2, kind: input, shape index: {}]   ;;  %s3114_s3 = inlined_call_operand.hbm [shape: f32[1,128], index: 3, kind: input, shape index: {}]   ;;  %s3115_s4 = inlined_call_operand.hbm [shape: f32[1,128], index: 4, kind: input, shape index: {}]   ;;  %s3116_s5 = inlined_call_operand.hbm [shape: bf16[128,128], index: 5, kind: input, shape index: {}]   ;;  %s3117_s6 = inlined_call_operand.hbm [shape: f32[1,128], index: 6, kind: input, shape index: {}]   ;;  %s3118_s7 = inlined_call_operand.hbm [shape: f32[1,128], index: 7, kind: input, shape index: {}]   ;;  %s3119_s8 = inlined_call_operand.hbm [shape: f32[1,128], index: 8, kind: input, shape index: {}]   ;;  %s3120_s9 = inlined_call_operand.hbm [shape: f32[2,16,128], index: 9, kind: output, shape index: {}, may-alias: {0,9}]  }
   0x1   :  { %3125 = sst [smem:[#allocation26_spill]] %s3112_s1 }
   0x2   :  { %3126 = sst [smem:[#allocation27_spill]] %s3120_s9 }
   0x3   :  { %14 = vsyncpa [#allocation5], 0 }
   0x4   :  { %16 = vsyncpa [#allocation5 + $0x1], 0 }
   0x5   :  { %17 = vsyncpa [#allocation8], 0 }
   0x6   :  { %18 = vsyncpa [#allocation11], 0 }
   0x7   :  { %19 = vsyncpa [#allocation14], 0 }
   0x8   :  { %20 = vsyncpa [#allocation17], 0 }
   0x9   :  { %21 = vsyncpa [#allocation6], 0 }
   0xa   :  { %23 = vsyncpa [#allocation6 + $0x1], 0  ;;  %s2685_s30 = smov 0   ;;  %s2687_s10 = smov 0  }
   0xb   :  { %s2689_s11 = smov 0   ;;  %s2691_s12 = smov 0  }
   0xc LB: > { %s2616_s13 = smov [#allocation7]   ;;  %s2706_s15 = sadd.s32 4294967295, %s2614_s12   ;;  %s2614_s12 = sphi %s2691_s12, %s3153_s12   ;;  %s2610_s11 = sphi %s2689_s11, %s3152_s11   ;;  %s2606_s10 = sphi %s2687_s10, %s3151_s10   ;;  %s2602_s30 = sphi %s2685_s30, %s3150_s30  }
   0xd   : > { %s266_s14 = sshll.u32 %s2616_s13, 4  ;;  %p1775_p0 = scmp.ge.s32.totalorder %s2614_s12, 1  ;;  %s2711_s14 = int_to_ptr.vmem [resolvable:$true] %s266_s14 }
   0xe   : > { %p3122_p1 = scmp.eq.s32.totalorder %s2706_s15, 0  ;;  %p254_p2 = scmp.lt.s32.totalorder %s2614_s12, 3 }
   0xf   : > { %s2617_s17 = smov [#allocation10]   ;;  %s2618_s20 = smov [#allocation13]  }
  0x10   : > { %p2713_p3 = pnand %p1775_p0, %p254_p2  ;;  %s291_s18 = sshll.u32 %s2617_s17, 4  ;;  %s2726_s18 = int_to_ptr.vmem [resolvable:$true] %s291_s18 }
  0x11   : > { %s312_s21 = sshll.u32 %s2618_s20, 4  ;;  %s3129_s1 = sld [smem:[#allocation26_spill]]  ;;  %s2728_s21 = int_to_ptr.vmem [resolvable:$true] %s312_s21 }
  0x12   : > { %s3127_s16 = scalar_select %p2713_p3, 1, 0 }
  0x13   : > { %p2074_p5 = pneg %p2713_p3 }
  0x15   : > { %p2722_p6 = pnand %p2074_p5, %p3122_p1 }
  0x17   : > { %s2278_s24 = scalar_lea.hbm %s3129_s1, 9216  ;;  %p2738_p8 = pneg %p2722_p6 }
  0x18   : > { %p2279_p7 = scmp.ne.s32.totalorder %s3129_s1, %s2278_s24  ;;  %p2285_p11 = scmp.lt.u32.totalorder %s2278_s24, %s3129_s1 }
  0x1a   : > { %p2281_p9 = pnand %p2738_p8, %p2279_p7 }
  0x1c   : > { %p2282_p10 = pneg %p2281_p9 }
  0x1e   : > { %p2287_p12 = pnand %p2285_p11, %p2282_p10 }
  0x20   : > { %2290 = shalt.err (!%p2287_p12)
}
  0x21   : > { %s2291_s13 = scalar_lea.vmem %s2711_s14, 9216  ;;  %p2299_p5 = scmp.lt.s32.totalorder %s2711_s14, %s2711_s14 }
  0x22   : > { %p2292_p13 = scmp.ne.s32.totalorder %s2711_s14, %s2291_s13  ;;  %p2300_p4 = scmp.lt.s32.totalorder %s2291_s13, %s2291_s13 }
  0x24   : > { %p2294_p0 = pnand %p2292_p13, %p2738_p8  ;;  %p2301_p7 = por %p2300_p4, %p2299_p5 }
  0x26   : > { %p2295_p2 = pneg %p2294_p0 }
  0x28   : > { %p2302_p9 = pnand %p2301_p7, %p2295_p2 }
  0x2a   : > { %2305 = shalt.err (!%p2302_p9)
}
  0x2b   : > { %s2619_s17 = smov 64   ;;  %s2620_s20 = smov 4  }
  0x2c   : > { %2077 = dma.hbm_to_vmem [thread:$0]  (!%p2722_p6), %s3129_s1, 9216, %s2711_s14, [#allocation8], %s2619_s17, %s2619_s17, %s2620_s20  }
  0x2d   : > { %s2306_s26 = scalar_lea.hbm %s3114_s3, 16 }
  0x2e   : > { %p2307_p4 = scmp.ne.s32.totalorder %s3114_s3, %s2306_s26  ;;  %p2313_p12 = scmp.lt.u32.totalorder %s2306_s26, %s3114_s3 }
  0x30   : > { %p2309_p10 = pnand %p2307_p4, %p2738_p8 }
  0x32   : > { %p2310_p11 = pneg %p2309_p10 }
  0x34   : > { %p2315_p13 = pnand %p2313_p12, %p2310_p11 }
  0x36   : > { %2318 = shalt.err (!%p2315_p13)
}
  0x37   : > { %s2319_s14 = scalar_lea.vmem %s2726_s18, 16  ;;  %s2326_s22 = scalar_lea.vmem %s2726_s18, 32 }
  0x38   : > { %p2320_p0 = scmp.ne.s32.totalorder %s2726_s18, %s2319_s14  ;;  %p2327_p7 = scmp.lt.s32.totalorder %s2726_s18, %s2726_s18 }
  0x39   : > { %p2328_p9 = scmp.lt.s32.totalorder %s2326_s22, %s2319_s14 }
  0x3a   : > { %p2322_p2 = pnand %p2320_p0, %p2738_p8 }
  0x3b   : > { %p2329_p4 = por %p2328_p9, %p2327_p7 }
  0x3c   : > { %p2323_p5 = pneg %p2322_p2 }
  0x3e   : > { %p2330_p10 = pnand %p2329_p4, %p2323_p5 }
  0x40   : > { %2333 = shalt.err (!%p2330_p10)
}
  0x41   : > { %2083 = dma.hbm_to_vmem [thread:$0]  (!%p2722_p6), %s3114_s3, 16, %s2726_s18, [#allocation11]  }
  0x42   : > { %s2334_s26 = scalar_lea.hbm %s3116_s5, 1024 }
  0x43   : > { %p2335_p11 = scmp.ne.s32.totalorder %s3116_s5, %s2334_s26  ;;  %p2341_p0 = scmp.lt.u32.totalorder %s2334_s26, %s3116_s5 }
  0x45   : > { %p2337_p12 = pnand %p2335_p11, %p2738_p8 }
  0x47   : > { %p2338_p13 = pneg %p2337_p12 }
  0x49   : > { %p2343_p2 = pnand %p2341_p0, %p2338_p13 }
  0x4b   : > { %2346 = shalt.err (!%p2343_p2)
}
  0x4c   : > { %s2347_s18 = scalar_lea.vmem %s2728_s21, 1024  ;;  %p2355_p4 = scmp.lt.s32.totalorder %s2728_s21, %s2728_s21 }
  0x4d   : > { %p2348_p5 = scmp.ne.s32.totalorder %s2728_s21, %s2347_s18  ;;  %p2356_p10 = scmp.lt.s32.totalorder %s2347_s18, %s2347_s18 }
  0x4f   : > { %p2350_p7 = pnand %p2348_p5, %p2738_p8  ;;  %p2357_p11 = por %p2356_p10, %p2355_p4 }
  0x51   : > { %p2351_p9 = pneg %p2350_p7 }
  0x53   : > { %p2358_p12 = pnand %p2357_p11, %p2351_p9 }
  0x55   : > { %2361 = shalt.err (!%p2358_p12)
}
  0x56   : > { %2089 = dma.hbm_to_vmem [thread:$0]  (!%p2722_p6), %s3116_s5, 1024, %s2728_s21, [#allocation14], %s2619_s17, %s2619_s17, %s2620_s20  }
  0x57   : > { %s2621_s23 = smov [#allocation16]   ;;  %s2622_s25 = smov [#allocation9]  }
  0x58   : > { %s337_s24 = sshll.u32 %s2621_s23, 4  ;;  %s280_s26 = sshll.u32 %s2622_s25, 4  ;;  %s338_s24 = int_to_ptr.vmem [resolvable:$true] %s337_s24  ;;  %s281_s26 = int_to_ptr.vmem [resolvable:$true] %s280_s26 }
  0x59   : > { %s2362_s13 = scalar_lea.hbm %s3118_s7, 16 }
  0x5a   : > { %p2363_p13 = scmp.ne.s32.totalorder %s3118_s7, %s2362_s13  ;;  %p2369_p5 = scmp.lt.u32.totalorder %s2362_s13, %s3118_s7 }
  0x5c   : > { %p2365_p0 = pnand %p2363_p13, %p2738_p8 }
  0x5e   : > { %p2366_p2 = pneg %p2365_p0 }
  0x60   : > { %p2371_p7 = pnand %p2369_p5, %p2366_p2 }
  0x62   : > { %2374 = shalt.err (!%p2371_p7)
}
  0x63   : > { %s2375_s21 = scalar_lea.vmem %s338_s24, 16  ;;  %s2382_s17 = scalar_lea.vmem %s338_s24, 32 }
  0x64   : > { %p2376_p9 = scmp.ne.s32.totalorder %s338_s24, %s2375_s21  ;;  %p2383_p11 = scmp.lt.s32.totalorder %s338_s24, %s338_s24 }
  0x65   : > { %p2384_p12 = scmp.lt.s32.totalorder %s2382_s17, %s2375_s21 }
  0x66   : > { %p2378_p4 = pnand %p2376_p9, %p2738_p8 }
  0x67   : > { %p2385_p1 = por %p2384_p12, %p2383_p11 }
  0x68   : > { %p2379_p10 = pneg %p2378_p4 }
  0x6a   : > { %p2386_p3 = pnand %p2385_p1, %p2379_p10 }
  0x6c   : > { %2389 = shalt.err (!%p2386_p3)
}
  0x6d   : > { %2095 = dma.hbm_to_vmem [thread:$0]  (!%p2722_p6), %s3118_s7, 16, %s338_s24, [#allocation17]  }
  0x6e   : > { %s2390_s25 = scalar_lea.hbm %s3113_s2, 16 }
  0x6f   : > { %p2391_p13 = scmp.ne.s32.totalorder %s3113_s2, %s2390_s25  ;;  %p2397_p3 = scmp.lt.u32.totalorder %s2390_s25, %s3113_s2 }
  0x71   : > { %p2393_p0 = pnand %p2391_p13, %p2738_p8 }
  0x73   : > { %p2394_p1 = pneg %p2393_p0 }
  0x75   : > { %p2399_p2 = pnand %p2397_p3, %p2394_p1 }
  0x77   : > { %2402 = shalt.err (!%p2399_p2)
}
  0x78   : > { %s2403_s18 = scalar_lea.vmem %s281_s26, 16  ;;  %s2410_s24 = scalar_lea.vmem %s281_s26, 32 }
  0x79   : > { %p2404_p5 = scmp.ne.s32.totalorder %s281_s26, %s2403_s18  ;;  %p2411_p4 = scmp.lt.s32.totalorder %s281_s26, %s281_s26 }
  0x7a   : > { %p2412_p10 = scmp.lt.s32.totalorder %s2410_s24, %s2403_s18 }
  0x7b   : > { %p2406_p7 = pnand %p2404_p5, %p2738_p8 }
  0x7c   : > { %p2413_p11 = por %p2412_p10, %p2411_p4 }
  0x7d   : > { %p2407_p9 = pneg %p2406_p7 }
  0x7f   : > { %p2414_p12 = pnand %p2413_p11, %p2407_p9 }
  0x81   : > { %2417 = shalt.err (!%p2414_p12)
}
  0x82   : > { %2080 = dma.hbm_to_vmem [thread:$0]  (!%p2722_p6), %s3113_s2, 16, %s281_s26, [#allocation8]  }
  0x83   : > { %s2623_s17 = smov [#allocation12]   ;;  %s2624_s9 = smov [#allocation15]  }
  0x84   : > { %s302_s20 = sshll.u32 %s2623_s17, 4  ;;  %s326_s1 = sshll.u32 %s2624_s9, 4  ;;  %s303_s20 = int_to_ptr.vmem [resolvable:$true] %s302_s20  ;;  %s327_s1 = int_to_ptr.vmem [resolvable:$true] %s326_s1 }
  0x85   : > { %s2418_s28 = scalar_lea.hbm %s3115_s4, 16 }
  0x86   : > { %p2419_p13 = scmp.ne.s32.totalorder %s3115_s4, %s2418_s28  ;;  %p2425_p3 = scmp.lt.u32.totalorder %s2418_s28, %s3115_s4 }
  0x88   : > { %p2421_p0 = pnand %p2419_p13, %p2738_p8 }
  0x8a   : > { %p2422_p1 = pneg %p2421_p0 }
  0x8c   : > { %p2427_p2 = pnand %p2425_p3, %p2422_p1 }
  0x8e   : > { %2430 = shalt.err (!%p2427_p2)
}
  0x8f   : > { %s2431_s26 = scalar_lea.vmem %s303_s20, 16  ;;  %s2438_s24 = scalar_lea.vmem %s303_s20, 32 }
  0x90   : > { %p2432_p5 = scmp.ne.s32.totalorder %s303_s20, %s2431_s26  ;;  %p2439_p4 = scmp.lt.s32.totalorder %s303_s20, %s303_s20 }
  0x91   : > { %p2440_p10 = scmp.lt.s32.totalorder %s2438_s24, %s2431_s26 }
  0x92   : > { %p2434_p7 = pnand %p2432_p5, %p2738_p8 }
  0x93   : > { %p2441_p11 = por %p2440_p10, %p2439_p4 }
  0x94   : > { %p2435_p9 = pneg %p2434_p7 }
  0x96   : > { %p2442_p12 = pnand %p2441_p11, %p2435_p9 }
  0x98   : > { %2445 = shalt.err (!%p2442_p12)
}
  0x99   : > { %2086 = dma.hbm_to_vmem [thread:$0]  (!%p2722_p6), %s3115_s4, 16, %s303_s20, [#allocation11]  }
  0x9a   : > { %s2446_s23 = scalar_lea.hbm %s3117_s6, 16 }
  0x9b   : > { %p2447_p13 = scmp.ne.s32.totalorder %s3117_s6, %s2446_s23  ;;  %p2453_p3 = scmp.lt.u32.totalorder %s2446_s23, %s3117_s6 }
  0x9d   : > { %p2449_p0 = pnand %p2447_p13, %p2738_p8 }
  0x9f   : > { %p2450_p1 = pneg %p2449_p0 }
  0xa1   : > { %p2455_p2 = pnand %p2453_p3, %p2450_p1 }
  0xa3   : > { %2458 = shalt.err (!%p2455_p2)
}
  0xa4   : > { %s2459_s14 = scalar_lea.vmem %s327_s1, 16  ;;  %s2466_s20 = scalar_lea.vmem %s327_s1, 32 }
  0xa5   : > { %p2460_p5 = scmp.ne.s32.totalorder %s327_s1, %s2459_s14  ;;  %p2467_p4 = scmp.lt.s32.totalorder %s327_s1, %s327_s1 }
  0xa6   : > { %p2468_p10 = scmp.lt.s32.totalorder %s2466_s20, %s2459_s14 }
  0xa7   : > { %p2462_p7 = pnand %p2460_p5, %p2738_p8 }
  0xa8   : > { %p2469_p11 = por %p2468_p10, %p2467_p4 }
  0xa9   : > { %p2463_p9 = pneg %p2462_p7 }
  0xab   : > { %p2470_p12 = pnand %p2469_p11, %p2463_p9 }
  0xad   : > { %2473 = shalt.err (!%p2470_p12)
}
  0xae   : > { %2092 = dma.hbm_to_vmem [thread:$0]  (!%p2722_p6), %s3117_s6, 16, %s327_s1, [#allocation14]  }
  0xaf   : > { %s2625_s24 = smov [#allocation18]   ;;  %s2474_s9 = scalar_lea.hbm %s3119_s8, 16 }
  0xb0   : > { %s348_s22 = sshll.u32 %s2625_s24, 4  ;;  %p2475_p13 = scmp.ne.s32.totalorder %s3119_s8, %s2474_s9  ;;  %s349_s22 = int_to_ptr.vmem [resolvable:$true] %s348_s22 }
  0xb1   : > { %p2481_p3 = scmp.lt.u32.totalorder %s2474_s9, %s3119_s8 }
  0xb2   : > { %p2477_p0 = pnand %p2475_p13, %p2738_p8 }
  0xb4   : > { %p2478_p1 = pneg %p2477_p0 }
  0xb6   : > { %p2483_p2 = pnand %p2481_p3, %p2478_p1 }
  0xb8   : > { %2486 = shalt.err (!%p2483_p2)
}
  0xb9   : > { %s2487_s1 = scalar_lea.vmem %s349_s22, 16  ;;  %s2494_s13 = scalar_lea.vmem %s349_s22, 32 }
  0xba   : > { %p2488_p5 = scmp.ne.s32.totalorder %s349_s22, %s2487_s1  ;;  %p2495_p4 = scmp.lt.s32.totalorder %s349_s22, %s349_s22 }
  0xbb   : > { %p2496_p10 = scmp.lt.s32.totalorder %s2494_s13, %s2487_s1 }
  0xbc   : > { %p2490_p7 = pnand %p2488_p5, %p2738_p8 }
  0xbd   : > { %p2497_p11 = por %p2496_p10, %p2495_p4 }
  0xbe   : > { %p2491_p9 = pneg %p2490_p7 }
  0xc0   : > { %p2498_p12 = pnand %p2497_p11, %p2491_p9 }
  0xc2   : > { %2501 = shalt.err (!%p2498_p12)
}
  0xc3   : > { %2098 = dma.hbm_to_vmem [thread:$0]  (!%p2722_p6), %s3119_s8, 16, %s349_s22, [#allocation17]  }
  0xc4   : > { %s1774_s27 = sadd.s32 4294967294, %s2614_s12   ;;  %s2904_s19 = sadd.s32 1, %s2614_s12  }
  0xc5   : > { %s33_s18 = ssub.s32 %s2614_s12, %s2904_s19  ;;  %s36_s26 = sadd.s32 1, %s2610_s11 }
  0xc6   : > { %p34_p8 = scmp.eq.s32.totalorder %s33_s18, 0  ;;  %p43_p13 = scmp.ne.s32.totalorder %s2610_s11, %s2606_s10 }
  0xc7   : > { %p44_p0 = scmp.eq.s32.totalorder %s2614_s12, 0  ;;  %p49_p1 = scmp.ne.s32.totalorder %s2606_s10, %s2602_s30 }
  0xc8   : > { %s2915_s24 = scalar_select %p34_p8, %s2610_s11, %s36_s26  }
  0xc9   : > { %p2917_p3 = por %p44_p0, %p43_p13  ;;  %p3132_p2 = scmp.eq.s32.totalorder %s2706_s15, 0 }
  0xca   : > { %p241_p5 = scmp.eq.s32.totalorder %s2706_s15, 1  ;;  %p247_p7 = scmp.eq.s32.totalorder %s1774_s27, 1 }
  0xcb   : > { %p2923_p6 = por %p3132_p2, %p49_p1  ;;  %p2115_p9 = scmp.lt.s32.totalorder %s2614_s12, 2 }
  0xcc   : > { %s359_s17 = sand.u32 1, %s2610_s11   ;;  %p2930_p4 = por %p241_p5, %p43_p13 }
  0xcd   : > { %p2934_p10 = por %p247_p7, %p49_p1  ;;  %s1785_s25 = sshll.u32 %s359_s17, 4 }
  0xce   : > { %s3134_s9 = scalar_select %p2930_p4, 1, 0 }
  0xcf   : > { %s3135_s23 = scalar_select %p2934_p10, 1, 0 }
  0xd0   : > { %s1890_s28 = sshll.u32 %s2614_s12, 8  ;;  %s363_s14 = scalar_lea.vmem [#allocation4], %s1785_s25 }
  0xd1   : > { %s2942_s13 = scalar_lea.hbm %s3111_s0, %s1890_s28  ;;  %s370_s20 = sshll.u32 %s363_s14, 4  ;;  %s2944_s20 = int_to_ptr.vmem [resolvable:$true] %s370_s20 }
  0xd2   : > { %p2948_p11 = pnand %p2115_p9, %p2917_p3  ;;  %s2952_s18 = scalar_lea.sflag [#allocation5], %s359_s17 }
  0xd3   : > { %s2502_s26 = scalar_lea.hbm %s2942_s13, 256  ;;  %s2507_s21 = scalar_lea.hbm %s3111_s0, 512 }
  0xd4   : > { %p2503_p12 = scmp.ne.s32.totalorder %s2942_s13, %s2502_s26  ;;  %p2504_p8 = pneg %p2948_p11 }
  0xd5   : > { %p2508_p1 = scmp.lt.u32.totalorder %s2942_s13, %s3111_s0  ;;  %p2509_p3 = scmp.lt.u32.totalorder %s2507_s21, %s2502_s26 }
  0xd6   : > { %p2505_p13 = pnand %p2504_p8, %p2503_p12  ;;  %p2511_p5 = scmp.lt.u32.totalorder %s2502_s26, %s2942_s13 }
  0xd7   : > { %p2510_p2 = por %p2509_p3, %p2508_p1 }
  0xd8   : > { %p2506_p0 = pneg %p2505_p13 }
  0xd9   : > { %p2512_p7 = por %p2511_p5, %p2510_p2 }
  0xdb   : > { %p2513_p9 = pnand %p2512_p7, %p2506_p0 }
  0xdd   : > { %2516 = shalt.err (!%p2513_p9)
}
  0xde   : > { %s2517_s17 = scalar_lea.vmem %s2944_s20, 256  ;;  %s2626_s14 = smov [#allocation4]  }
  0xdf   : > { %p2518_p12 = scmp.ne.s32.totalorder %s2944_s20, %s2517_s17  ;;  %s2522_s25 = sshll.u32 %s2626_s14, 4  ;;  %s2523_s25 = int_to_ptr.vmem [resolvable:$false] %s2522_s25 }
  0xe0   : > { %s2524_s28 = scalar_lea.vmem %s2523_s25, 512  ;;  %p2525_p4 = scmp.lt.s32.totalorder %s2944_s20, %s2523_s25 }
  0xe1   : > { %p2520_p13 = pnand %p2518_p12, %p2504_p8  ;;  %p2526_p1 = scmp.lt.s32.totalorder %s2524_s28, %s2517_s17 }
  0xe3   : > { %p2521_p10 = pneg %p2520_p13  ;;  %p2527_p3 = por %p2526_p1, %p2525_p4 }
  0xe5   : > { %p2528_p2 = pnand %p2527_p3, %p2521_p10 }
  0xe7   : > { %2531 = shalt.err (!%p2528_p2)
}
  0xe8   : > { %s2627_s26 = smov 128   ;;  %s2628_s21 = smov 8  }
  0xe9   : > { %2102 = dma.hbm_to_vmem [thread:$0]  (!%p2948_p11), %s2942_s13, 256, %s2944_s20, %s2952_s18, %s2627_s26, %s2627_s26, %s2628_s21  }
  0xea   : > { %p3137_p8 = scmp.ne.s32.totalorder %s3127_s16, 0 }
  0xeb   : > { %s2983_s29 = sand.u32 (!%p3137_p8), 1, %s2606_s10  }
  0xec   : > { %382 = sbr.rel (%p3137_p8) target bundleno = 1243 (0x4db), region = 56  ;;  %s1789_s1 = sshll.u32 (!%p3137_p8), %s2983_s29, 4 }
  0xed   : > { %s385_s17 = scalar_lea.sflag (!%p3137_p8), [#allocation5], %s2983_s29  ;;  %s2989_s14 = scalar_lea.vmem (!%p3137_p8), [#allocation4], %s1789_s1 }
  0xf3   : > { %2577 = dma.done.wait (%p2923_p6), %s385_s17, 256  }
  0xf4   : > { %2579 = vsyncadd (%p2923_p6), %s385_s17, 4294967040  ;;  %p3138_p4 = scmp.eq.s32.totalorder %s2706_s15, 0 }
  0xf6   : > { %2581 = dma.done.wait (%p3138_p4), [#allocation8], 9232   ;;  %p3139_p10 = pmov %p3138_p4 }
  0xf7   : > { %p3140_p11 = pmov %p3138_p4 }
  0xf8   : > { %2583 = vsyncadd (%p3139_p10), [#allocation8], 4294958064 }
  0xf9   : > { %2585 = dma.done.wait (%p3140_p11), [#allocation11], 32   ;;  %p3141_p0 = pmov %p3138_p4 }
  0xfb   : > { %2587 = vsyncadd (%p3141_p0), [#allocation11], 4294967264  ;;  %p3142_p5 = pmov %p3141_p0 }
  0xfc   : > { %p3143_p7 = pmov %p3141_p0 }
  0xfd   : > { %2589 = dma.done.wait (%p3142_p5), [#allocation14], 1040  }
  0xfe   : > { %2591 = vsyncadd (%p3143_p7), [#allocation14], 4294966256  ;;  %p3144_p6 = pmov %p3141_p0 }
  0xff   : > { %p3145_p9 = pmov %p3141_p0 }
 0x100   : > { %2593 = dma.done.wait (%p3144_p6), [#allocation17], 32  }
 0x101   : > { %2595 = vsyncadd (%p3145_p9), [#allocation17], 4294967264  ;;  %v2629_v0 = vmov 0.0   ;;  %v2174_v1 = vld [vmem:[#allocation7 + $0x40] sm:$0xff]   ;;  %v2178_v5 = vld [vmem:[#allocation7 + $0x48] sm:$0xff]   ;;  %vm2630_vm0 = vmmov 0  }
 0x102   : > { %458 = vst [vmem:[#allocation2] sm:$0xf] %v2629_v0  ;;  %459 = vst [vmem:[#allocation2 + $0x14] sm:$0xf] %v2629_v0  ;;  %v2175_v2 = vld [vmem:[#allocation7] sm:$0xff]   ;;  %1892 = vmatprep.subr.bf16.mxu0 %v2174_v1  ;;  %v2179_v6 = vld [vmem:[#allocation7 + $0x8] sm:$0xff]  }
 0x103   : > { %v2176_v3 = vld [vmem:[#allocation7 + $0xc0] sm:$0xff]   ;;  %1893 = vmatpush3.bf16.msra.mxu0 %v2175_v2  ;;  %v2180_v7 = vld [vmem:[#allocation7 + $0xc8] sm:$0xff]   ;;  %v2182_v9 = vld [vmem:[#allocation7 + $0x50] sm:$0xff]   ;;  %s1891_s16 = sshll.u32 %s2706_s15, 8  ;;  %s454_s22 = scalar_lea.vmem [#allocation19], %s1789_s1 }
 0x104   : > { %v2177_v4 = vld [vmem:[#allocation7 + $0x80] sm:$0xff]   ;;  %1914 = vmatprep.subr.bf16.mxu1 %v2176_v3  ;;  %1894 = vmatprep.subr.bf16.mxu0 %v2178_v5  ;;  %v2181_v8 = vld [vmem:[#allocation7 + $0x88] sm:$0xff]   ;;  %v2183_v10 = vld [vmem:[#allocation7 + $0x10] sm:$0xff]   ;;  %s1625_s13 = sshll.u32 %s454_s22, 4  ;;  %s3146_s18 = sld [smem:[#allocation27_spill]]  ;;  %s3066_s13 = int_to_ptr.vmem [resolvable:$true] %s1625_s13 }
 0x105   : > { %1915 = vmatpush3.bf16.msra.mxu1 %v2177_v4  ;;  %v2184_v11 = vld [vmem:[#allocation7 + $0xd0] sm:$0xff]   ;;  %v2186_v13 = vld [vmem:[#allocation7 + $0x58] sm:$0xff]   ;;  %v2190_v17 = vld [vmem:[#allocation7 + $0x60] sm:$0xff]   ;;  %s1612_s15 = scalar_lea.sflag [#allocation6], %s2983_s29  ;;  %s2532_s28 = scalar_lea.vmem %s3066_s13, 256 }
 0x106   : > { %1916 = vmatprep.subr.bf16.mxu1 %v2180_v7  ;;  %v2185_v12 = vld [vmem:[#allocation7 + $0x90] sm:$0xff]   ;;  %v2187_v14 = vld [vmem:[#allocation7 + $0x18] sm:$0xff]   ;;  %v2191_v18 = vld [vmem:[#allocation7 + $0x20] sm:$0xff]   ;;  %p2533_p12 = scmp.ne.s32.totalorder %s3066_s13, %s2532_s28  ;;  %p3147_p13 = scmp.ne.s32.totalorder %s3134_s9, 0 }
 0x107   : > { %1895 = vmatpush3.bf16.msra.mxu0 %v2179_v6  ;;  %v2188_v15 = vld [vmem:[#allocation7 + $0xd8] sm:$0xff]   ;;  %v2192_v19 = vld [vmem:[#allocation7 + $0xe0] sm:$0xff]   ;;  %v2194_v21 = vld [vmem:[#allocation7 + $0x68] sm:$0xff]   ;;  %s2632_s26 = smov [#allocation19]  }
 0x108   : > { %1896 = vmatprep.subr.bf16.mxu0 %v2182_v9  ;;  %v2189_v16 = vld [vmem:[#allocation7 + $0x98] sm:$0xff]   ;;  %v2193_v20 = vld [vmem:[#allocation7 + $0xa0] sm:$0xff]   ;;  %v2195_v22 = vld [vmem:[#allocation7 + $0x28] sm:$0xff]   ;;  %p2534_p1 = pnand %p2533_p12, %p3147_p13  ;;  %s2536_s21 = sshll.u32 %s2632_s26, 4  ;;  %s2537_s21 = int_to_ptr.vmem [resolvable:$false] %s2536_s21 }
 0x109   : > { %1917 = vmatpush3.bf16.msra.mxu1 %v2181_v8  ;;  %v2196_v23 = vld [vmem:[#allocation7 + $0xe8] sm:$0xff]   ;;  %v2198_v25 = vld [vmem:[#allocation7 + $0x70] sm:$0xff]   ;;  %v2202_v29 = vld [vmem:[#allocation7 + $0x78] sm:$0xff]   ;;  %s2538_s1 = scalar_lea.vmem %s2537_s21, 512  ;;  %p2539_p2 = scmp.lt.s32.totalorder %s3066_s13, %s2537_s21 }
 0x10a   : > { %1918 = vmatprep.subr.bf16.mxu1 %v2184_v11  ;;  %v2197_v24 = vld [vmem:[#allocation7 + $0xa8] sm:$0xff]   ;;  %v2199_v26 = vld [vmem:[#allocation7 + $0x30] sm:$0xff]   ;;  %v2203_v30 = vld [vmem:[#allocation7 + $0x38] sm:$0xff]   ;;  %s3064_s25 = scalar_lea.hbm %s3146_s18, %s1891_s16  ;;  %p2535_p3 = pneg %p2534_p1 }
 0x10b   : > { %1897 = vmatpush3.bf16.msra.mxu0 %v2183_v10  ;;  %v2200_v27 = vld [vmem:[#allocation7 + $0xf0] sm:$0xff]   ;;  %v2204_v31 = vld [vmem:[#allocation7 + $0xf8] sm:$0xff]   ;;  %v2206_v35 = vld [vmem:[#allocation7 + $0x140] sm:$0xff]   ;;  %p2540_p8 = scmp.lt.s32.totalorder %s2538_s1, %s2532_s28 }
 0x10c   : > { %1898 = vmatprep.subr.bf16.mxu0 %v2186_v13  ;;  %v2201_v28 = vld [vmem:[#allocation7 + $0xb0] sm:$0xff]   ;;  %v3017_v33 = vld [vmem:[%s2989_s14 + $0x8] sm:$0xff]  ;;  %v2208_v36 = vld [vmem:[#allocation7 + $0x1c0] sm:$0xff]  }
 0x10d   : > { %1919 = vmatpush3.bf16.msra.mxu1 %v2185_v12  ;;  %v3014_v32 = vld [vmem:[%s2989_s14] sm:$0xff]  ;;  %461 = vst [vmem:[#allocation2 + $0xc] sm:$0xff] %v3017_v33  ;;  %v2205_v34 = vld [vmem:[#allocation7 + $0xb8] sm:$0xff]   ;;  %v2210_v42 = vld [vmem:[#allocation7 + $0x148] sm:$0xff]   ;;  %p2541_p4 = por %p2540_p8, %p2539_p2 }
 0x10e   : > { %1920 = vmatprep.subr.bf16.mxu1 %v2188_v15  ;;  %460 = vst [vmem:[#allocation2 + $0x4] sm:$0xff] %v3014_v32  ;;  %v2207_v37 = vld [vmem:[#allocation7 + $0x100] sm:$0xff]   ;;  %v2212_v52 = vld [vmem:[#allocation7 + $0x1c8] sm:$0xff]   ;;  %v2214_v55 = vld [vmem:[#allocation7 + $0x150] sm:$0xff]  }
 0x10f   : > { %1899 = vmatpush3.bf16.msra.mxu0 %v2187_v14  ;;  %v2209_v41 = vld [vmem:[#allocation7 + $0x180] sm:$0xff]   ;;  %v2211_v53 = vld [vmem:[#allocation7 + $0x108] sm:$0xff]   ;;  %v2216_v56 = vld [vmem:[#allocation7 + $0x1d0] sm:$0xff]   ;;  %p2542_p10 = pnand %p2541_p4, %p2535_p3 }
 0x110   : > { %1900 = vmatprep.subr.bf16.mxu0 %v2190_v17  ;;  %v2213_v54 = vld [vmem:[#allocation7 + $0x188] sm:$0xff]   ;;  %v2215_v57 = vld [vmem:[#allocation7 + $0x110] sm:$0xff]   ;;  %v2218_v59 = vld [vmem:[#allocation7 + $0x158] sm:$0xff]  }
 0x111   : > { %1921 = vmatpush3.bf16.msra.mxu1 %v2189_v16  ;;  %v2217_v58 = vld [vmem:[#allocation7 + $0x190] sm:$0xff]   ;;  %v2220_v60 = vld [vmem:[#allocation7 + $0x1d8] sm:$0xff]   ;;  %v2222_v63 = vld [vmem:[#allocation7 + $0x160] sm:$0xff]  }
 0x112   : > { %1922 = vmatprep.subr.bf16.mxu1 %v2192_v19  ;;  %v2219_v61 = vld [vmem:[#allocation7 + $0x118] sm:$0xff]   ;;  %v2224_v1 = vld [vmem:[#allocation7 + $0x1e0] sm:$0xff]   ;;  %v2226_v4 = vld [vmem:[#allocation7 + $0x168] sm:$0xff]  }
 0x113   : > { %1901 = vmatpush3.bf16.msra.mxu0 %v2191_v18  ;;  %v2221_v62 = vld [vmem:[#allocation7 + $0x198] sm:$0xff]   ;;  %v2223_v2 = vld [vmem:[#allocation7 + $0x120] sm:$0xff]   ;;  %v2228_v5 = vld [vmem:[#allocation7 + $0x1e8] sm:$0xff]  }
 0x114   : > { %1902 = vmatprep.subr.bf16.mxu0 %v2194_v21  ;;  %v2225_v3 = vld [vmem:[#allocation7 + $0x1a0] sm:$0xff]   ;;  %v2227_v6 = vld [vmem:[#allocation7 + $0x128] sm:$0xff]   ;;  %v2230_v8 = vld [vmem:[#allocation7 + $0x170] sm:$0xff]  }
 0x115   : > { %1923 = vmatpush3.bf16.msra.mxu1 %v2193_v20  ;;  %v466_v38 = vld [vmem:[#allocation2 + $0x1] sm:$0xff]  ;;  %v467_v39 = vld [vmem:[#allocation2 + $0x9] sm:$0xff] }
 0x116   : > { %1924 = vmatprep.subr.bf16.mxu1 %v2196_v23  ;;  %v462_v40 = vld [vmem:[#allocation2] sm:$0xff]  ;;  %v468_v43 = vpack.c.bf16 %v467_v39, %v466_v38  ;;  %v3021_v44 = vld [vmem:[#allocation2 + $0x8] sm:$0xff]  ;;  %v2234_v12 = vld [vmem:[#allocation7 + $0x178] sm:$0xff]  }
 0x117   : > { %1903 = vmatpush3.bf16.msra.mxu0 %v2195_v22  ;;  %v474_v45 = vld [vmem:[#allocation2 + $0x3] sm:$0xff]  ;;  %v475_v46 = vld [vmem:[#allocation2 + $0xb] sm:$0xff]  ;;  %v464_v47 = vpack.c.bf16 %v3021_v44, %v462_v40  ;;  %v1799_v39 = vld [vmem:[#allocation9] ss:$0 sm:$0xff] }
 0x118   : > { %1904 = vmatprep.subr.bf16.mxu0 %v2198_v25  ;;  %v476_v48 = vpack.c.bf16 %v475_v46, %v474_v45  ;;  %v470_v49 = vld [vmem:[#allocation2 + $0x2] sm:$0xff]  ;;  %v471_v50 = vld [vmem:[#allocation2 + $0xa] sm:$0xff]  ;;  %1122 = vmatprep.mubr.bf16.mxu0 %v468_v43  ;;  %v2238_v25 = vld [vmem:[#allocation7 + $0x200] sm:$0xff]  }
 0x119   : > { %1925 = vmatpush3.bf16.msra.mxu1 %v2197_v24  ;;  %v472_v51 = vpack.c.bf16 %v471_v50, %v470_v49  ;;  %v2229_v7 = vld [vmem:[#allocation7 + $0x1a8] sm:$0xff]   ;;  %v2232_v9 = vld [vmem:[#allocation7 + $0x1f0] sm:$0xff]   ;;  %v2236_v13 = vld [vmem:[#allocation7 + $0x1f8] sm:$0xff]   ;;  %v480_v24 = vpack.c.bf16 %v3017_v33, %v3014_v32 }
 0x11a   : > { %1926 = vmatprep.subr.bf16.mxu1 %v2200_v27  ;;  %1163 = vmatprep.mubr.bf16.mxu1 %v476_v48  ;;  %v2231_v10 = vld [vmem:[#allocation7 + $0x130] sm:$0xff]   ;;  %v2235_v16 = vld [vmem:[#allocation7 + $0x138] sm:$0xff]   ;;  %v2239_v27 = vld [vmem:[#allocation7 + $0x208] sm:$0xff]  }
 0x11b   : > { %1905 = vmatpush3.bf16.msra.mxu0 %v2199_v26  ;;  %v2233_v11 = vld [vmem:[#allocation7 + $0x1b0] sm:$0xff]   ;;  %v2237_v20 = vld [vmem:[#allocation7 + $0x1b8] sm:$0xff]  }
 0x11c   : > { %1906 = vmatprep.subr.bf16.mxu0 %v2202_v29  ;;  %v482_v14 = vld [vmem:[#allocation2 + $0x5] sm:$0xff]  ;;  %v483_v15 = vld [vmem:[#allocation2 + $0xd] sm:$0xff] }
 0x11d   : > { %1927 = vmatpush3.bf16.msra.mxu1 %v2201_v28  ;;  %v484_v17 = vpack.c.bf16 %v483_v15, %v482_v14  ;;  %v490_v18 = vld [vmem:[#allocation2 + $0x7] sm:$0xff]  ;;  %v491_v19 = vld [vmem:[#allocation2 + $0xf] sm:$0xff] }
 0x11e   : > { %1928 = vmatprep.subr.bf16.mxu1 %v2204_v31  ;;  %v492_v21 = vpack.c.bf16 %v491_v19, %v490_v18  ;;  %v486_v22 = vld [vmem:[#allocation2 + $0x6] sm:$0xff]  ;;  %v487_v23 = vld [vmem:[#allocation2 + $0xe] sm:$0xff] }
 0x11f   : > { %1907 = vmatpush3.bf16.msra.mxu0 %v2203_v30  ;;  %v488_v26 = vpack.c.bf16 %v487_v23, %v486_v22  ;;  %v2240_v28 = vld [vmem:[#allocation7 + $0x210] sm:$0xff]   ;;  %v2241_v29 = vld [vmem:[#allocation7 + $0x218] sm:$0xff]   ;;  %v2242_v30 = vld [vmem:[#allocation7 + $0x220] sm:$0xff]  }
 0x120   : > { %1936 = vmatprep.subr.bf16.mxu0 %v2206_v35  ;;  %v2243_v31 = vld [vmem:[#allocation7 + $0x228] sm:$0xff]   ;;  %v2245_v35 = vld [vmem:[#allocation7 + $0x238] sm:$0xff]  }
 0x121   : > { %1929 = vmatpush3.bf16.msra.mxu1 %v2205_v34  ;;  %v2244_v34 = vld [vmem:[#allocation7 + $0x230] sm:$0xff]  }
 0x122   : > { %1958 = vmatprep.subr.bf16.mxu1 %v2208_v36  ;;  %1123 = vmatmul.mubr.bf16.vlgmr.msra.gmra.mrb[0].mxu0 %v464_v47  ;;  %v495_v36 = vld [vmem:[#allocation2 + $0x10] sm:$0xff] }
 0x123   : > { %1937 = vmatpush3.bf16.msra.mxu0 %v2207_v37  ;;  %1204 = vmatprep.mubr.bf16.mxu0 %v484_v17  ;;  %v496_v37 = vpack.c.bf16 %v495_v36, %v3021_v44 }
 0x124   : > { %1164 = vmatmul.mubr.bf16.vlgmr.msra.gmra.mrb[0].mxu1 %v472_v51  ;;  %1938 = vmatprep.subr.bf16.mxu0 %v2210_v42 }
 0x125   : > { %1959 = vmatpush3.bf16.msra.mxu1 %v2209_v41  ;;  %1245 = vmatprep.mubr.bf16.mxu1 %v492_v21 }
 0x126   : > { %1960 = vmatprep.subr.bf16.mxu1 %v2212_v52 }
 0x127   : > { %1939 = vmatpush3.bf16.msra.mxu0 %v2211_v53 }
 0x128   : > { %1940 = vmatprep.subr.bf16.mxu0 %v2214_v55 }
 0x129   : > { %1961 = vmatpush3.bf16.msra.mxu1 %v2213_v54 }
 0x12a   : > { %1962 = vmatprep.subr.bf16.mxu1 %v2216_v56 }
 0x12b   : > { %1941 = vmatpush3.bf16.msra.mxu0 %v2215_v57 }
 0x12c   : > { %1942 = vmatprep.subr.bf16.mxu0 %v2218_v59 }
 0x12d   : > { %1963 = vmatpush3.bf16.msra.mxu1 %v2217_v58 }
 0x12e   : > { %1964 = vmatprep.subr.bf16.mxu1 %v2220_v60 }
 0x12f   : > { %1943 = vmatpush3.bf16.msra.mxu0 %v2219_v61 }
 0x130   : > { %1944 = vmatprep.subr.bf16.mxu0 %v2222_v63 }
 0x131   : > { %1965 = vmatpush3.bf16.msra.mxu1 %v2221_v62 }
 0x132   : > { %1966 = vmatprep.subr.bf16.mxu1 %v2224_v1 }
 0x133   : > { %1945 = vmatpush3.bf16.msra.mxu0 %v2223_v2 }
 0x134   : > { %1946 = vmatprep.subr.bf16.mxu0 %v2226_v4 }
 0x135   : > { %1967 = vmatpush3.bf16.msra.mxu1 %v2225_v3 }
 0x136   : > { %1968 = vmatprep.subr.bf16.mxu1 %v2228_v5 }
 0x137   : > { %1947 = vmatpush3.bf16.msra.mxu0 %v2227_v6 }
 0x138   : > { %1948 = vmatprep.subr.bf16.mxu0 %v2230_v8 }
 0x139   : > { %1969 = vmatpush3.bf16.msra.mxu1 %v2229_v7 }
 0x13a   : > { %1970 = vmatprep.subr.bf16.mxu1 %v2232_v9 }
 0x13b   : > { %1949 = vmatpush3.bf16.msra.mxu0 %v2231_v10 }
 0x13c   : > { %1950 = vmatprep.subr.bf16.mxu0 %v2234_v12 }
 0x13d   : > { %1971 = vmatpush3.bf16.msra.mxu1 %v2233_v11 }
 0x13e   : > { %1972 = vmatprep.subr.bf16.mxu1 %v2236_v13 }
 0x13f   : > { %1951 = vmatpush3.bf16.msra.mxu0 %v2235_v16 }
 0x140   : > { %1998 = vmatprep.subr.bf16.mxu0 %v2629_v0 }
 0x141   : > { %1973 = vmatpush3.bf16.msra.mxu1 %v2237_v20 }
 0x142   : > { %2018 = vmatprep.subr.bf16.mxu1 %v2629_v0  ;;  %1205 = vmatmul.mubr.bf16.vlgmr.msra.gmra.mrb[4].mxu0 %v480_v24 }
 0x143   : > { %1999 = vmatpush3.bf16.msra.mxu0 %v2238_v25  ;;  %2014 = vmatprep.mubr.msk.bf16.mxu0 %vm2630_vm0, %v2629_v0 }
 0x144   : > { %1246 = vmatmul.mubr.bf16.vlgmr.msra.gmra.mrb[4].mxu1 %v488_v26  ;;  %2000 = vmatprep.subr.bf16.mxu0 %v2629_v0 }
 0x145   : > { %2034 = vmatprep.mubr.msk.bf16.mxu1 %vm2630_vm0, %v2629_v0 }
 0x147   : > { %2001 = vmatpush3.bf16.msra.mxu0 %v2239_v27 }
 0x148   : > { %2002 = vmatprep.subr.bf16.mxu0 %v2629_v0 }
 0x14b   : > { %2003 = vmatpush3.bf16.msra.mxu0 %v2240_v28 }
 0x14c   : > { %2004 = vmatprep.subr.bf16.mxu0 %v2629_v0 }
 0x14f   : > { %2005 = vmatpush3.bf16.msra.mxu0 %v2241_v29 }
 0x150   : > { %2006 = vmatprep.subr.bf16.mxu0 %v2629_v0 }
 0x153   : > { %2007 = vmatpush3.bf16.msra.mxu0 %v2242_v30 }
 0x154   : > { %2008 = vmatprep.subr.bf16.mxu0 %v2629_v0 }
 0x157   : > { %2009 = vmatpush3.bf16.msra.mxu0 %v2243_v31 }
 0x158   : > { %2010 = vmatprep.subr.bf16.mxu0 %v2629_v0 }
 0x15b   : > { %2011 = vmatpush3.bf16.msra.mxu0 %v2244_v34 }
 0x15c   : > { %2012 = vmatprep.subr.bf16.mxu0 %v2629_v0 }
 0x15f   : > { %2013 = vmatpush3.bf16.msra.mxu0 %v2245_v35 }
 0x162   : > { %2015 = vmatmul.mubr.bf16.vlgmr.msra.gmra.mrb[8].mxu0 %v496_v37 }
 0x1f5   : > { %v1908_v38 = vpop.f32.mrb[0].mxu0 }
 0x1f6   : > { %v1909_v40 = vpop.f32.mrb[1].mxu0 }
 0x1f7   : > { %v1930_v41 = vpop.f32.mrb[0].mxu1  ;;  %v1910_v42 = vadd.f32 %v1909_v40, %v1908_v38  ;;  %v1911_v43 = vpop.f32.mrb[2].mxu0 }
 0x1f8   : > { %v1931_v45 = vpop.f32.mrb[1].mxu1  ;;  %v1912_v46 = vpop.f32.mrb[3].mxu0 }
 0x1f9   : > { %v1932_v47 = vadd.f32 %v1931_v45, %v1930_v41  ;;  %v1933_v48 = vpop.f32.mrb[2].mxu1  ;;  %v1125_v49 = vadd.f32 %v1910_v42, %v1799_v39  ;;  %v1913_v50 = vadd.f32 %v1912_v46, %v1911_v43 }
 0x1fa   : > { %v1934_v51 = vpop.f32.mrb[3].mxu1 }
 0x1fb   : > { %v1935_v52 = vadd.f32 %v1934_v51, %v1933_v48  ;;  %v1128_v53 = vadd.f32 %v1913_v50, %v1799_v39  ;;  %v1166_v54 = vadd.f32 %v1932_v47, %v1125_v49 }
 0x1fd   : > { %v1169_v55 = vadd.f32 %v1935_v52, %v1128_v53 }
 0x215   : > { %v1952_v44 = vpop.f32.mrb[4].mxu0 }
 0x216   : > { %v1953_v56 = vpop.f32.mrb[5].mxu0 }
 0x217   : > { %v1974_v57 = vpop.f32.mrb[4].mxu1  ;;  %v1954_v58 = vadd.f32 %v1953_v56, %v1952_v44  ;;  %v1955_v59 = vpop.f32.mrb[6].mxu0 }
 0x218   : > { %v1975_v60 = vpop.f32.mrb[5].mxu1  ;;  %v1956_v61 = vpop.f32.mrb[7].mxu0 }
 0x219   : > { %v1976_v62 = vadd.f32 %v1975_v60, %v1974_v57  ;;  %v1977_v63 = vpop.f32.mrb[6].mxu1  ;;  %v1207_v1 = vadd.f32 %v1954_v58, %v1166_v54  ;;  %v1957_v2 = vadd.f32 %v1956_v61, %v1955_v59 }
 0x21a   : > { %v1978_v3 = vpop.f32.mrb[7].mxu1 }
 0x21b   : > { %v1979_v4 = vadd.f32 %v1978_v3, %v1977_v63  ;;  %v1210_v5 = vadd.f32 %v1957_v2, %v1169_v55  ;;  %v1248_v6 = vadd.f32 %v1976_v62, %v1207_v1  ;;  %v2631_v55 = vmov -1.0  }
 0x21d   : > { %v1251_v7 = vadd.f32 %v1979_v4, %v1210_v5 }
 0x235   : > { %v1288_v8 = vpop.f32.mrb[8].mxu0 }
 0x236   : > { %v1289_v9 = vadd.f32 %v1288_v8, %v1248_v6  ;;  %v2016_v10 = vpop.f32.mrb[9].mxu0  ;;  %v2246_v6 = vld [vmem:[#allocation13] sm:$0xff]   ;;  %v2248_v8 = vld [vmem:[#allocation13 + $0x10] sm:$0xff]  }
 0x237   : > { %v1291_v11 = vpop.f32.mrb[10].mxu0  ;;  %2019 = vmatpush3.bf16.msra.mxu1 %v2246_v6  ;;  %v2250_v10 = vld [vmem:[#allocation13 + $0x20] sm:$0xff]  }
 0x238   : > { %v1297_v12 = vmul.f32 0.70710677, %v1289_v9  ;;  %v1292_v13 = vadd.f32 %v1291_v11, %v1251_v7  ;;  %v2017_v14 = vpop.f32.mrb[11].mxu0  ;;  %v1295_v59 = vmul.f32 0.5, %v1289_v9  ;;  %2020 = vmatprep.subr.bf16.mxu1 %v2629_v0  ;;  %v2247_v7 = vld [vmem:[#allocation13 + $0x8] sm:$0xff]   ;;  %v2249_v9 = vld [vmem:[#allocation13 + $0x18] sm:$0xff]  }
 0x239   : > { %v2251_v11 = vld [vmem:[#allocation13 + $0x28] sm:$0xff]  }
 0x23a   : > { %v1303_v15 = vand.u32 2147483647, %v1297_v12  ;;  %v1298_v16 = vmul.f32 0.70710677, %v1292_v13  ;;  %vm1299_vm1 = vcmp.ge.f32.partialorder %v1297_v12, 0.0  ;;  %v1296_v1 = vmul.f32 0.5, %v1292_v13 }
 0x23b   : > { %v1301_v44 = vsel %vm1299_vm1, 1.0, %v2631_v55  ;;  %2021 = vmatpush3.bf16.msra.mxu1 %v2247_v7  ;;  %v2252_v12 = vld [vmem:[#allocation13 + $0x30] sm:$0xff]   ;;  %v2253_v13 = vld [vmem:[#allocation13 + $0x38] sm:$0xff]  }
 0x23c   : > { %v1305_v17 = vmul.f32 0.3275911, %v1303_v15  ;;  %v1304_v18 = vand.u32 2147483647, %v1298_v16  ;;  %v1329_v22 = vsub.f32 0.0, %v1303_v15  ;;  %vm1300_vm2 = vcmp.ge.f32.partialorder %v1298_v16, 0.0  ;;  %2022 = vmatprep.subr.bf16.mxu1 %v2629_v0 }
 0x23d   : > { %v1302_v60 = vsel %vm1300_vm2, 1.0, %v2631_v55 }
 0x23e   : > { %v1307_v19 = vadd.f32 1.0, %v1305_v17  ;;  %v1306_v20 = vmul.f32 0.3275911, %v1304_v18  ;;  %v1330_v23 = vsub.f32 0.0, %v1304_v18  ;;  %v1331_v25 = vmul.f32 %v1329_v22, %v1303_v15 }
 0x23f   : > { %2023 = vmatpush3.bf16.msra.mxu1 %v2248_v8 }
 0x240   : > { %2254 = vrcp.f32 %v1307_v19  ;;  %v1308_v21 = vadd.f32 1.0, %v1306_v20  ;;  %v1332_v28 = vmul.f32 %v1330_v23, %v1304_v18  ;;  %v1333_v30 = vmul.f32 1.442695, %v1331_v25  ;;  %2024 = vmatprep.subr.bf16.mxu1 %v2629_v0 }
 0x242   : > { %2256 = vrcp.f32 %v1308_v21  ;;  %v1335_v36 = vmul.f32 1.442695, %v1332_v28 }
 0x243   : > { %2258 = vpow2.f32 %v1333_v30  ;;  %2025 = vmatpush3.bf16.msra.mxu1 %v2249_v9 }
 0x244   : > { %2260 = vpow2.f32 %v1335_v36  ;;  %2026 = vmatprep.subr.bf16.mxu1 %v2629_v0 }
 0x247   : > { %2027 = vmatpush3.bf16.msra.mxu1 %v2250_v10 }
 0x248   : > { %2028 = vmatprep.subr.bf16.mxu1 %v2629_v0 }
 0x24a   : > { %v2255_v24 = vpop.eup %2254 }
 0x24b   : > { %v1311_v26 = vmul.f32 1.0614054, %v2255_v24  ;;  %2029 = vmatpush3.bf16.msra.mxu1 %v2251_v11 }
 0x24c   : > { %v2257_v27 = vpop.eup %2256  ;;  %2030 = vmatprep.subr.bf16.mxu1 %v2629_v0 }
 0x24d   : > { %v1313_v29 = vadd.f32 -1.4531521, %v1311_v26  ;;  %v1312_v31 = vmul.f32 1.0614054, %v2257_v27  ;;  %v2259_v49 = vpop.eup %2258 }
 0x24e   : > { %v2261_v53 = vpop.eup %2260 }
 0x24f   : > { %v1315_v34 = vmul.f32 %v2255_v24, %v1313_v29  ;;  %v1314_v35 = vadd.f32 -1.4531521, %v1312_v31  ;;  %2031 = vmatpush3.bf16.msra.mxu1 %v2252_v12  ;;  %v1872_v31 = vld [vmem:[#allocation10] ss:$0 sm:$0xff] }
 0x250   : > { %2032 = vmatprep.subr.bf16.mxu1 %v2629_v0 }
 0x251   : > { %v1317_v37 = vadd.f32 1.4214138, %v1315_v34  ;;  %v1316_v38 = vmul.f32 %v2257_v27, %v1314_v35 }
 0x253   : > { %v1319_v39 = vmul.f32 %v2255_v24, %v1317_v37  ;;  %v1318_v40 = vadd.f32 1.4214138, %v1316_v38  ;;  %2033 = vmatpush3.bf16.msra.mxu1 %v2253_v13  ;;  %v1873_v38 = vld [vmem:[#allocation12] ss:$0 sm:$0xff] }
 0x255   : > { %v1321_v41 = vadd.f32 -0.28449672, %v1319_v39  ;;  %v1320_v42 = vmul.f32 %v2257_v27, %v1318_v40 }
 0x257   : > { %v1323_v43 = vmul.f32 %v2255_v24, %v1321_v41  ;;  %v1322_v45 = vadd.f32 -0.28449672, %v1320_v42 }
 0x259   : > { %v1325_v46 = vadd.f32 0.2548296, %v1323_v43  ;;  %v1324_v47 = vmul.f32 %v2257_v27, %v1322_v45 }
 0x25b   : > { %v1327_v48 = vmul.f32 %v2255_v24, %v1325_v46  ;;  %v1326_v50 = vadd.f32 0.2548296, %v1324_v47  ;;  %v1874_v47 = vld [vmem:[#allocation15] ss:$0 sm:$0xff] }
 0x25d   : > { %v1337_v51 = vmul.f32 %v2259_v49, %v1327_v48  ;;  %v1328_v52 = vmul.f32 %v2257_v27, %v1326_v50 }
 0x25f   : > { %v1339_v54 = vsub.f32 1.0, %v1337_v51  ;;  %v1338_v56 = vmul.f32 %v2261_v53, %v1328_v52 }
 0x261   : > { %v1341_v57 = vmul.f32 %v1339_v54, %v1301_v44  ;;  %v1340_v58 = vsub.f32 1.0, %v1338_v56 }
 0x263   : > { %v1343_v61 = vadd.f32 1.0, %v1341_v57  ;;  %v1342_v62 = vmul.f32 %v1340_v58, %v1302_v60 }
 0x265   : > { %v1345_v63 = vmul.f32 %v1343_v61, %v1295_v59  ;;  %v1344_v2 = vadd.f32 1.0, %v1342_v62 }
 0x267   : > { %1349 = vadd.xlane.f32.xlu0 %v1345_v63  ;;  %v1356_v3 = vmul.f32 %v1345_v63, %v1345_v63  ;;  %v1346_v4 = vmul.f32 %v1344_v2, %v1296_v1 }
 0x269   : > { %1358 = vadd.xlane.f32.xlu1 %v1356_v3  ;;  %v1357_v5 = vmul.f32 %v1346_v4, %v1346_v4 }
 0x26b   : > { %1351 = vadd.xlane.f32.xlu0 %v1346_v4 }
 0x26d   : > { %1360 = vadd.xlane.f32.xlu1 %v1357_v5 }
 0x2f4   : > { %v1350_v14 = vpop.xlane.xlu0 %1349 }
 0x2f5   : > { %v1354_v15 = vmul.f32 0.0078125, %v1350_v14 }
 0x2f6   : > { %v1359_v16 = vpop.xlane.xlu1 %1358 }
 0x2f7   : > { %v1364_v17 = vmul.f32 %v1354_v15, %v1354_v15  ;;  %v1362_v18 = vmul.f32 0.0078125, %v1359_v16  ;;  %v1370_v0 = vsub.f32 %v1345_v63, %v1354_v15 }
 0x2f8   : > { %v1352_v19 = vpop.xlane.xlu0 %1351 }
 0x2f9   : > { %v1366_v20 = vsub.f32 %v1362_v18, %v1364_v17  ;;  %v1355_v21 = vmul.f32 0.0078125, %v1352_v19 }
 0x2fa   : > { %v1361_v22 = vpop.xlane.xlu1 %1360 }
 0x2fb   : > { %v1368_v23 = vmax.f32 %v1366_v20, 0.0  ;;  %v1365_v24 = vmul.f32 %v1355_v21, %v1355_v21  ;;  %v1363_v25 = vmul.f32 0.0078125, %v1361_v22  ;;  %v1371_v35 = vsub.f32 %v1346_v4, %v1355_v21 }
 0x2fd   : > { %v1372_v26 = vadd.f32 1e-05, %v1368_v23  ;;  %v1367_v27 = vsub.f32 %v1363_v25, %v1365_v24 }
 0x2ff   : > { %2262 = vrsqrt.f32 %v1372_v26  ;;  %v1369_v28 = vmax.f32 %v1367_v27, 0.0 }
 0x301   : > { %v1373_v29 = vadd.f32 1e-05, %v1369_v28 }
 0x303   : > { %2264 = vrsqrt.f32 %v1373_v29 }
 0x309   : > { %v2263_v30 = vpop.eup %2262 }
 0x30a   : > { %v1376_v34 = vmul.f32 %v2263_v30, %v1370_v0 }
 0x30c   : > { %v1384_v36 = vmul.f32 %v1872_v31, %v1376_v34 }
 0x30d   : > { %v2265_v37 = vpop.eup %2264 }
 0x30e   : > { %v1377_v39 = vmul.f32 %v2265_v37, %v1371_v35  ;;  %v1392_v41 = vadd.f32 %v1873_v38, %v1384_v36 }
 0x310   : > { %v1385_v40 = vmul.f32 %v1872_v31, %v1377_v39  ;;  %v3048_v43 = vadd.f32 %v1392_v41, %v3014_v32 }
 0x312   : > { %v1393_v42 = vadd.f32 %v1873_v38, %v1385_v40 }
 0x314   : > { %v3051_v45 = vadd.f32 %v1393_v42, %v3017_v33 }
 0x316   : > { %v1396_v46 = vpack.c.bf16 %v3051_v45, %v3048_v43 }
 0x318   : > { %2035 = vmatmul.mubr.bf16.vlgmr.msra.gmra.mrb[8].mxu1 %v1396_v46 }
 0x3eb   : > { %v1502_v48 = vpop.f32.mrb[8].mxu1 }
 0x3ec   : > { %v1503_v49 = vadd.f32 %v1874_v47, %v1502_v48  ;;  %v2036_v50 = vpop.f32.mrb[9].mxu1 }
 0x3ed   : > { %v1505_v51 = vpop.f32.mrb[10].mxu1 }
 0x3ee   : > { %v1511_v52 = vmul.f32 0.70710677, %v1503_v49  ;;  %v1506_v53 = vadd.f32 %v1874_v47, %v1505_v51  ;;  %v2037_v54 = vpop.f32.mrb[11].mxu1  ;;  %v1509_v30 = vmul.f32 0.5, %v1503_v49 }
 0x3f0   : > { %v1517_v44 = vand.u32 2147483647, %v1511_v52  ;;  %v1512_v56 = vmul.f32 0.70710677, %v1506_v53  ;;  %vm1513_vm3 = vcmp.ge.f32.partialorder %v1511_v52, 0.0  ;;  %v1510_v37 = vmul.f32 0.5, %v1506_v53 }
 0x3f1   : > { %v1515_v27 = vsel %vm1513_vm3, 1.0, %v2631_v55 }
 0x3f2   : > { %v1519_v57 = vmul.f32 0.3275911, %v1517_v44  ;;  %v1518_v32 = vand.u32 2147483647, %v1512_v56  ;;  %v1543_v60 = vsub.f32 0.0, %v1517_v44  ;;  %vm1514_vm4 = vcmp.ge.f32.partialorder %v1512_v56, 0.0 }
 0x3f3   : > { %v1516_v31 = vsel %vm1514_vm4, 1.0, %v2631_v55 }
 0x3f4   : > { %v1521_v58 = vadd.f32 1.0, %v1519_v57  ;;  %v1520_v59 = vmul.f32 0.3275911, %v1518_v32  ;;  %v1544_v61 = vsub.f32 0.0, %v1518_v32  ;;  %v1545_v63 = vmul.f32 %v1543_v60, %v1517_v44  ;;  %v1883_v60 = vld [vmem:[#allocation16] ss:$0 sm:$0xff] }
 0x3f6   : > { %2266 = vrcp.f32 %v1521_v58  ;;  %v1522_v33 = vadd.f32 1.0, %v1520_v59  ;;  %v1546_v3 = vmul.f32 %v1544_v61, %v1518_v32  ;;  %v1547_v5 = vmul.f32 1.442695, %v1545_v63  ;;  %v1884_v63 = vld [vmem:[#allocation18] ss:$0 sm:$0xff] }
 0x3f8   : > { %2268 = vrcp.f32 %v1522_v33  ;;  %v1549_v9 = vmul.f32 1.442695, %v1546_v3 }
 0x3f9   : > { %2270 = vpow2.f32 %v1547_v5 }
 0x3fa   : > { %2272 = vpow2.f32 %v1549_v9 }
 0x400   : > { %v2267_v62 = vpop.eup %2266 }
 0x401   : > { %v1525_v1 = vmul.f32 1.0614054, %v2267_v62 }
 0x402   : > { %v2269_v2 = vpop.eup %2268 }
 0x403   : > { %v1527_v4 = vadd.f32 -1.4531521, %v1525_v1  ;;  %v1526_v6 = vmul.f32 1.0614054, %v2269_v2  ;;  %v2271_v21 = vpop.eup %2270 }
 0x404   : > { %v2273_v25 = vpop.eup %2272 }
 0x405   : > { %v1529_v7 = vmul.f32 %v2267_v62, %v1527_v4  ;;  %v1528_v8 = vadd.f32 -1.4531521, %v1526_v6 }
 0x407   : > { %v1531_v10 = vadd.f32 1.4214138, %v1529_v7  ;;  %v1530_v11 = vmul.f32 %v2269_v2, %v1528_v8 }
 0x409   : > { %v1533_v12 = vmul.f32 %v2267_v62, %v1531_v10  ;;  %v1532_v13 = vadd.f32 1.4214138, %v1530_v11 }
 0x40b   : > { %v1535_v14 = vadd.f32 -0.28449672, %v1533_v12  ;;  %v1534_v15 = vmul.f32 %v2269_v2, %v1532_v13 }
 0x40d   : > { %v1537_v16 = vmul.f32 %v2267_v62, %v1535_v14  ;;  %v1536_v17 = vadd.f32 -0.28449672, %v1534_v15 }
 0x40f   : > { %v1539_v18 = vadd.f32 0.2548296, %v1537_v16  ;;  %v1538_v19 = vmul.f32 %v2269_v2, %v1536_v17 }
 0x411   : > { %v1541_v20 = vmul.f32 %v2267_v62, %v1539_v18  ;;  %v1540_v22 = vadd.f32 0.2548296, %v1538_v19 }
 0x413   : > { %v1551_v23 = vmul.f32 %v2271_v21, %v1541_v20  ;;  %v1542_v24 = vmul.f32 %v2269_v2, %v1540_v22 }
 0x415   : > { %v1553_v26 = vsub.f32 1.0, %v1551_v23  ;;  %v1552_v28 = vmul.f32 %v2273_v25, %v1542_v24 }
 0x417   : > { %v1555_v29 = vmul.f32 %v1553_v26, %v1515_v27  ;;  %v1554_v0 = vsub.f32 1.0, %v1552_v28 }
 0x419   : > { %v1557_v34 = vadd.f32 1.0, %v1555_v29  ;;  %v1556_v35 = vmul.f32 %v1554_v0, %v1516_v31 }
 0x41b   : > { %v1559_v36 = vmul.f32 %v1557_v34, %v1509_v30  ;;  %v1558_v38 = vadd.f32 1.0, %v1556_v35 }
 0x41d   : > { %1563 = vadd.xlane.f32.xlu0 %v1559_v36  ;;  %v1560_v39 = vmul.f32 %v1558_v38, %v1510_v37  ;;  %v1569_v40 = vmul.f32 %v1559_v36, %v1559_v36 }
 0x41f   : > { %1565 = vadd.xlane.f32.xlu1 %v1560_v39  ;;  %v1570_v41 = vmul.f32 %v1560_v39, %v1560_v39 }
 0x421   : > { %1571 = vadd.xlane.f32.xlu0 %v1569_v40 }
 0x423   : > { %1573 = vadd.xlane.f32.xlu1 %v1570_v41 }
 0x4aa   : > { %v1564_v42 = vpop.xlane.xlu0 %1563 }
 0x4ab   : > { %v1567_v46 = vmul.f32 0.0078125, %v1564_v42 }
 0x4ac   : > { %v1566_v47 = vpop.xlane.xlu1 %1565 }
 0x4ad   : > { %v1568_v48 = vmul.f32 0.0078125, %v1566_v47  ;;  %v1577_v49 = vmul.f32 %v1567_v46, %v1567_v46  ;;  %v1583_v59 = vsub.f32 %v1559_v36, %v1567_v46 }
 0x4ae   : > { %v1572_v50 = vpop.xlane.xlu0 %1571 }
 0x4af   : > { %v1575_v51 = vmul.f32 0.0078125, %v1572_v50  ;;  %v1578_v54 = vmul.f32 %v1568_v48, %v1568_v48  ;;  %v1584_v62 = vsub.f32 %v1560_v39, %v1568_v48 }
 0x4b0   : > { %v1574_v52 = vpop.xlane.xlu1 %1573 }
 0x4b1   : > { %v1579_v55 = vsub.f32 %v1575_v51, %v1577_v49  ;;  %v1576_v44 = vmul.f32 0.0078125, %v1574_v52 }
 0x4b3   : > { %v1581_v53 = vmax.f32 %v1579_v55, 0.0  ;;  %v1580_v56 = vsub.f32 %v1576_v44, %v1578_v54 }
 0x4b5   : > { %v1585_v57 = vadd.f32 1e-05, %v1581_v53  ;;  %v1582_v32 = vmax.f32 %v1580_v56, 0.0 }
 0x4b7   : > { %2274 = vrsqrt.f32 %v1585_v57  ;;  %v1586_v58 = vadd.f32 1e-05, %v1582_v32 }
 0x4b9   : > { %2276 = vrsqrt.f32 %v1586_v58 }
 0x4c1   : > { %v2275_v33 = vpop.eup %2274 }
 0x4c2   : > { %v1589_v61 = vmul.f32 %v2275_v33, %v1583_v59 }
 0x4c3   : > { %v2277_v1 = vpop.eup %2276 }
 0x4c4   : > { %v1597_v2 = vmul.f32 %v1883_v60, %v1589_v61  ;;  %v1590_v3 = vmul.f32 %v2277_v1, %v1584_v62 }
 0x4c6   : > { %v1605_v4 = vadd.f32 %v1884_v63, %v1597_v2  ;;  %v1598_v5 = vmul.f32 %v1883_v60, %v1590_v3 }
 0x4c8   : > { %v1607_v6 = vadd.f32 %v1605_v4, %v3048_v43  ;;  %v1606_v7 = vadd.f32 %v1884_v63, %v1598_v5 }
 0x4ca   : > { %1609 = vst [vmem:[%s454_s22] sm:$0xff] %v1607_v6  ;;  %v1608_v8 = vadd.f32 %v1606_v7, %v3051_v45 }
 0x4cc   : > { %1610 = vst [vmem:[%s454_s22 + $0x8] sm:$0xff] %v1608_v8 }
 0x4cd   : > { %2545 = shalt.err (!%p2542_p10)
}
 0x4ce   : > { %s2546_s17 = scalar_lea.hbm %s3064_s25, 256  ;;  %s2550_s22 = scalar_lea.hbm %s3146_s18, 512 }
 0x4cf   : > { %p2547_p11 = scmp.ne.s32.totalorder %s3064_s25, %s2546_s17  ;;  %p2551_p7 = scmp.lt.u32.totalorder %s3064_s25, %s3146_s18 }
 0x4d0   : > { %p2552_p6 = scmp.lt.u32.totalorder %s2550_s22, %s2546_s17  ;;  %p2554_p12 = scmp.lt.u32.totalorder %s2546_s17, %s3064_s25 }
 0x4d1   : > { %p2548_p0 = pnand %p2547_p11, %p3147_p13 }
 0x4d2   : > { %p2553_p9 = por %p2552_p6, %p2551_p7 }
 0x4d3   : > { %p2549_p5 = pneg %p2548_p0 }
 0x4d4   : > { %p2555_p1 = por %p2554_p12, %p2553_p9 }
 0x4d6   : > { %p2556_p3 = pnand %p2555_p1, %p2549_p5 }
 0x4d8   : > { %2559 = shalt.err (!%p2556_p3)
}
 0x4d9   : > { %s2633_s28 = smov 128   ;;  %s2634_s26 = smov 8  }
 0x4da   : > { %2072 = dma.vmem_to_hbm [thread:$0]  (%p3147_p13), %s3066_s13, 256, %s3064_s25, %s1612_s15, %s2633_s28, %s2633_s28, %s2634_s26  }
 0x4db PF: > { %s1640_s21 = sand.u32 1, %s2602_s30   ;;  %p3148_p2 = scmp.ne.s32.totalorder %s3135_s23, 0 }
 0x4dc   : > { %p3149_p8 = scmp.ge.s32.totalorder %s2614_s12, 2  ;;  %s1641_s1 = scalar_lea.sflag [#allocation6], %s1640_s21 }
 0x4de   : > { %p2104_p4 = pnand %p3149_p8, %p3148_p2 }
 0x4e0   : > { %2597 = dma.done.wait (!%p2104_p4), %s1641_s1, 256  }
 0x4e1   : > { %2599 = vsyncadd (!%p2104_p4), %s1641_s1, 4294967040  ;;  %p26_p10 = scmp.ge.s32.totalorder %s2904_s19, 4   ;;  %s3150_s30 = smov %s2606_s10 }
 0x4e2   : > { %s3151_s10 = smov %s2610_s11  ;;  %s3152_s11 = smov %s2915_s24 }
 0x4e3   : > { %s3153_s12 = smov %s2904_s19  ;;  %28 = sbr.rel (!%p26_p10) target bundleno = 12 (0xc), region = 133 }
 0x4ea   :  { %1646 = vsyncpa [#allocation5], 1 }
 0x4eb   :  { %1648 = vsyncpa [#allocation5 + $0x1], 1 }
 0x4ec   :  { %1649 = vsyncpa [#allocation8], 1 }
 0x4ed   :  { %1650 = vsyncpa [#allocation11], 1 }
 0x4ee   :  { %1651 = vsyncpa [#allocation14], 1 }
 0x4ef   :  { %1652 = vsyncpa [#allocation17], 1 }
 0x4f0   :  { %1653 = vsyncpa [#allocation6], 1 }
 0x4f1   :  { %1655 = vsyncpa [#allocation6 + $0x1], 1 }

</bundles_post_ra>
